<compile_context>
chip_gen: v5e
topology: v5e:2x2
jax: 0.10.0
libtpu: 0.0.40
codegen_flags: <defaults>
</compile_context>

<pallas_src>
import functools
import math

import jax
import jax.numpy as jnp
from jax import lax
from jax.experimental import pallas as pl
from jax.experimental.pallas import tpu as pltpu


def _layer_norm(y, gamma, beta, eps=1e-5):
    mu = jnp.mean(y, axis=-1, keepdims=True)
    var = jnp.mean((y - mu) ** 2, axis=-1, keepdims=True)
    return (y - mu) * lax.rsqrt(var + eps) * gamma + beta


def _gelu_exact(x):
    # nn.GELU() default == exact erf formulation (keep for parity with torch).
    return 0.5 * x * (1.0 + lax.erf(x * (1.0 / math.sqrt(2.0))))


def encoder_kernel(x_ref,
                   wq_ref, wk_ref, wv_ref, wo_ref,
                   bq_ref, bk_ref, bv_ref, bo_ref,
                   w1_ref, b1_ref, w2_ref, b2_ref,
                   gamma_ref, beta_ref,
                   o_ref,
                   ctx_ref,
                   *, num_heads):
    bt, S, H = x_ref.shape
    hd = H // num_heads
    M = bt * S

    # Fold the batch tile into the matmul M dimension (leading-dim merge only,
    # the last dim stays the lane dim -> cheap).
    x = x_ref[...].reshape(M, H).astype(jnp.float32)   # f32 residual copy
    xb = x.astype(jnp.bfloat16)

    # ---- QKV projections: bf16 MXU operands, f32 accumulation ----------------
    # The 1/sqrt(head_dim) attention scale is pre-folded into wq/bq.
    # Cast to bf16 ONCE here; all per-head slices below are on the bf16 copies.
    q = (jnp.dot(xb, wq_ref[...], preferred_element_type=jnp.float32)
         + bq_ref[...]).astype(jnp.bfloat16)
    k = (jnp.dot(xb, wk_ref[...], preferred_element_type=jnp.float32)
         + bk_ref[...]).astype(jnp.bfloat16)
    v = (jnp.dot(xb, wv_ref[...], preferred_element_type=jnp.float32)
         + bv_ref[...]).astype(jnp.bfloat16)

    # ---- Multi-head attention -------------------------------------------------
    # Each head's context is written into the (M, H) bf16 VMEM scratch at its
    # lane offset; the output projection then runs ONCE with full contraction
    # depth K=H (instead of nh shallow K=hd matmuls + nh f32 accumulate passes).
    # TODO(synk): at nh=12 / long S use lax.fori_loop + flash-style K/V tiling
    # (online softmax) to bound live ranges and VMEM instead of this unroll.
    for h in range(num_heads):               # short static unroll over heads
        lo = h * hd
        qh = q[:, lo:lo + hd].reshape(bt, S, hd)        # (bt, S, hd) bf16
        kh = k[:, lo:lo + hd].reshape(bt, S, hd)
        vh = v[:, lo:lo + hd].reshape(bt, S, hd)
        scores = jnp.einsum('bqd,bkd->bqk', qh, kh,
                            preferred_element_type=jnp.float32)   # (bt, S, S)
        m = jnp.max(scores, axis=-1, keepdims=True)
        e = jnp.exp(scores - m)
        denom = jnp.sum(e, axis=-1, keepdims=True)
        probs = e * pl.reciprocal(denom, approx=True)              # EUP slot
        ctx = jnp.einsum('bqk,bkd->bqd', probs.astype(jnp.bfloat16), vh,
                         preferred_element_type=jnp.float32)       # (bt, S, hd)
        ctx_ref[:, lo:lo + hd] = ctx.reshape(M, hd).astype(jnp.bfloat16)

    attn = jnp.dot(ctx_ref[...], wo_ref[...],
                   preferred_element_type=jnp.float32) + bo_ref[...]

    # ---- Residual + LayerNorm (shared params, f32) ----------------------------
    gamma = gamma_ref[...]
    beta = beta_ref[...]
    ln_out = _layer_norm(x + attn, gamma, beta)

    # ---- FeedForward ----------------------------------------------------------
    hidden = jnp.dot(ln_out.astype(jnp.bfloat16), w1_ref[...],
                     preferred_element_type=jnp.float32) + b1_ref[...]
    hidden = _gelu_exact(hidden)
    ff_out = jnp.dot(hidden.astype(jnp.bfloat16), w2_ref[...],
                     preferred_element_type=jnp.float32) + b2_ref[...]

    # ---- Residual + (same) LayerNorm ------------------------------------------
    encoded = _layer_norm(ff_out + ln_out, gamma, beta)

    o_ref[...] = encoded.reshape(bt, S, H).astype(o_ref.dtype)


def _tpu_generation_info():
    """(vmem_capacity_bytes, tensorcores_per_chip) with conservative fallbacks."""
    cap = None
    try:
        cap = int(pltpu.get_tpu_info().vmem_capacity_bytes)
    except Exception:
        cap = None
    kind = ""
    try:
        kind = jax.devices()[0].device_kind.lower()
    except Exception:
        pass
    is_v7 = "v7" in kind
    if cap is None:
        cap = (64 if is_v7 else 128) * 1024 * 1024
    cores = 2 if is_v7 else 1
    return cap, cores


def _pick_batch_tile(B, S, H, inter, in_bytes, weight_bytes, vmem_limit,
                     prefer_two_steps):
    """Largest batch tile whose estimated working set fits the VMEM budget.

    On 2-TensorCore parts (v7x) additionally prefer >= 2 grid steps so the
    'parallel' grid axis can be split across cores, as long as every step still
    gets >= 128 MXU rows.  On single-core parts (v5e/v6e) extra grid steps are
    pure per-step overhead, so just take the biggest tile that fits.
    """
    def act_bytes(bt):
        M = bt * S
        b = 2 * 2 * M * H * in_bytes     # double-buffered input & output tiles
        b += 3 * M * H * 4               # x / ln_out / attn f32 working copies
        b += 3 * M * H * 2               # q, k, v bf16
        b += M * H * 2                   # ctx assembly scratch (bf16)
        b += 3 * bt * S * S * 4          # scores / exp / probs for one live head
        b += M * inter * 4               # FFN hidden (f32)
        return b

    budget = int(vmem_limit * 0.8) - weight_bytes
    divs = [d for d in range(1, B + 1) if B % d == 0]
    fit = [d for d in divs if act_bytes(d) <= budget] or [1]
    bt = max(fit)
    if prefer_two_steps:
        two = [d for d in fit if (B // d) >= 2 and d * S >= 128]
        if two:
            bt = max(two)
    return bt


def encoder_forward(x, params, num_heads):
    B, S, H = x.shape
    assert H % num_heads == 0, "hidden_size must divide evenly into heads"
    assert H % 128 == 0, "hidden_size must be a multiple of 128 (lane-dense I/O)"
    assert S % 8 == 0, "sequence length must be a multiple of 8 (sublane)"
    hd = H // num_heads
    inter = params["w1"].shape[1]
    scale = 1.0 / math.sqrt(hd)

    # bf16 matmul operands; attention scale folded into the query projection.
    # Biases / LN params stay f32.
    wq = (params["wq"] * scale).astype(jnp.bfloat16)
    wk = params["wk"].astype(jnp.bfloat16)
    wv = params["wv"].astype(jnp.bfloat16)
    wo = params["wo"].astype(jnp.bfloat16)
    w1 = params["w1"].astype(jnp.bfloat16)
    w2 = params["w2"].astype(jnp.bfloat16)
    bq = (params["bq"] * scale).astype(jnp.float32)
    bk = params["bk"].astype(jnp.float32)
    bv = params["bv"].astype(jnp.float32)
    bo = params["bo"].astype(jnp.float32)
    b1 = params["b1"].astype(jnp.float32)
    b2 = params["b2"].astype(jnp.float32)
    gamma = params["gamma"].astype(jnp.float32)
    beta = params["beta"].astype(jnp.float32)

    param_list = [wq, wk, wv, wo, bq, bk, bv, bo, w1, b1, w2, b2, gamma, beta]
    weight_bytes = sum(int(p.size) * p.dtype.itemsize for p in param_list)

    vmem_cap, num_cores = _tpu_generation_info()
    vmem_limit = (vmem_cap * 3) // 4    # ~48 MiB on v7x, ~96 MiB on v5e/v6e

    bt = _pick_batch_tile(B, S, H, inter, x.dtype.itemsize, weight_bytes,
                          vmem_limit, prefer_two_steps=(num_cores >= 2 and B >= 2))
    grid = (B // bt,)

    # Advisory cost estimate so XLA schedules the custom call sensibly.
    flops = 2 * B * S * (4 * H * H + 2 * S * H + 2 * H * inter)
    transcendentals = B * S * (S * num_heads + inter)
    bytes_accessed = 2 * B * S * H * x.dtype.itemsize + weight_bytes

    def make_call(single_buffer_params):
        in_specs = [pl.BlockSpec((bt, S, H), lambda b: (b, 0, 0))]
        for p in param_list:
            # Whole-weight blocks with a constant index map (grid-invariant);
            # single-buffer them so resident parameters aren't duplicated.
            kwargs = {}
            if single_buffer_params:
                kwargs["pipeline_mode"] = pl.Buffered(1)
            in_specs.append(
                pl.BlockSpec(p.shape, lambda b, _nd=p.ndim: (0,) * _nd, **kwargs))
        return pl.pallas_call(
            functools.partial(encoder_kernel, num_heads=num_heads),
            out_shape=jax.ShapeDtypeStruct((B, S, H), x.dtype),
            grid_spec=pltpu.PrefetchScalarGridSpec(
                num_scalar_prefetch=0,
                grid=grid,
                in_specs=in_specs,
                out_specs=pl.BlockSpec((bt, S, H), lambda b: (b, 0, 0)),
                scratch_shapes=[pltpu.VMEM((bt * S, H), jnp.bfloat16)],  # ctx
            ),
            compiler_params=pltpu.CompilerParams(
                dimension_semantics=("parallel",),
                vmem_limit_bytes=int(vmem_limit)),
            cost_estimate=pl.CostEstimate(
                flops=flops,
                transcendentals=transcendentals,
                bytes_accessed=bytes_accessed),
        )

    single = hasattr(pl, "Buffered")
    try:
        return make_call(single)(x, *param_list)
    except Exception:
        if not single:
            raise
        # Fallback for environments where single-buffering params is rejected.
        return make_call(False)(x, *param_list)


# ----------------------- pure-JAX reference (for checking) -----------------
def encoder_reference(x, params, num_heads):
    B, S, H = x.shape
    hd = H // num_heads

    def linear(y, w, b):
        return jnp.einsum("bsh,ho->bso", y, w) + b

    q = linear(x, params["wq"], params["bq"])
    k = linear(x, params["wk"], params["bk"])
    v = linear(x, params["wv"], params["bv"])
    q = q.reshape(B, S, num_heads, hd).transpose(0, 2, 1, 3)
    k = k.reshape(B, S, num_heads, hd).transpose(0, 2, 3, 1)
    v = v.reshape(B, S, num_heads, hd).transpose(0, 2, 1, 3)
    scores = jnp.matmul(q, k) / math.sqrt(hd)
    probs = jax.nn.softmax(scores, axis=-1)
    ctx = jnp.matmul(probs, v).transpose(0, 2, 1, 3).reshape(B, S, H)
    attn_out = linear(ctx, params["wo"], params["bo"])

    def ln(y):
        mu = jnp.mean(y, axis=-1, keepdims=True)
        var = jnp.mean((y - mu) ** 2, axis=-1, keepdims=True)
        return (y - mu) / jnp.sqrt(var + 1e-5) * params["gamma"] + params["beta"]

    ln_out = ln(x + attn_out)
    hidden = linear(ln_out, params["w1"], params["b1"])
    hidden = 0.5 * hidden * (1.0 + lax.erf(hidden / math.sqrt(2.0)))
    ff_out = linear(hidden, params["w2"], params["b2"])
    return ln(ff_out + ln_out)


if __name__ == "__main__":
    # Small shapes consistent with the module's forward: (B, S, hidden).
    # hidden is a multiple of 128 so loads/stores are lane-dense (like the real 768).
    B, S, H, NUM_HEADS, INTER = 2, 8, 128, 4, 512
    key = jax.random.PRNGKey(0)
    keys = jax.random.split(key, 16)

    def w(k, shape, scale=0.05):
        return (scale * jax.random.normal(k, shape)).astype(jnp.float32)

    # Weights stored already transposed to (in, out); biases/LN params as (1, dim)
    params = {
        "wq": w(keys[0], (H, H)),      "bq": w(keys[1], (1, H)),
        "wk": w(keys[2], (H, H)),      "bk": w(keys[3], (1, H)),
        "wv": w(keys[4], (H, H)),      "bv": w(keys[5], (1, H)),
        "wo": w(keys[6], (H, H)),      "bo": w(keys[7], (1, H)),
        "w1": w(keys[8], (H, INTER)),  "b1": w(keys[9], (1, INTER)),
        "w2": w(keys[10], (INTER, H)), "b2": w(keys[11], (1, H)),
        "gamma": jnp.ones((1, H), jnp.float32),   # nn.LayerNorm init
        "beta": jnp.zeros((1, H), jnp.float32),
    }

    x = jax.random.normal(keys[12], (B, S, H), dtype=jnp.float32)

    out = encoder_forward(x, params, NUM_HEADS)
    out = jax.block_until_ready(out)

    ref = encoder_reference(x, params, NUM_HEADS)
    assert out.shape == (B, S, H)
    # bf16 MXU operands + approx reciprocal -> ~1e-2-level agreement vs f32 reference.
    assert jnp.allclose(out, ref, atol=5e-2, rtol=5e-2), "mismatch vs reference"

    print("KERNEL_OK")
</pallas_src>

<mosaic_0001>
module attributes {stable_mosaic.version = 11 : i64} {
  func.func @encoder_kernel(%arg0: i32, %arg1: memref<2x8x128xf32, #tpu.memory_space<vmem>>, %arg2: memref<128x128xbf16, #tpu.memory_space<vmem>>, %arg3: memref<128x128xbf16, #tpu.memory_space<vmem>>, %arg4: memref<128x128xbf16, #tpu.memory_space<vmem>>, %arg5: memref<128x128xbf16, #tpu.memory_space<vmem>>, %arg6: memref<1x128xf32, #tpu.memory_space<vmem>>, %arg7: memref<1x128xf32, #tpu.memory_space<vmem>>, %arg8: memref<1x128xf32, #tpu.memory_space<vmem>>, %arg9: memref<1x128xf32, #tpu.memory_space<vmem>>, %arg10: memref<128x512xbf16, #tpu.memory_space<vmem>>, %arg11: memref<1x512xf32, #tpu.memory_space<vmem>>, %arg12: memref<512x128xbf16, #tpu.memory_space<vmem>>, %arg13: memref<1x128xf32, #tpu.memory_space<vmem>>, %arg14: memref<1x128xf32, #tpu.memory_space<vmem>>, %arg15: memref<1x128xf32, #tpu.memory_space<vmem>>, %arg16: memref<2x8x128xf32, #tpu.memory_space<vmem>>, %arg17: memref<16x128xbf16, #tpu.memory_space<vmem>>) attributes {dimension_semantics = [#tpu.dimension_semantics<parallel>], iteration_bounds = array<i64: 1>, scalar_prefetch = 0 : i64, scratch_operands = 1 : i64, tpu.core_type = #tpu.core_type<tc>, window_params = [{transform_indices = @transform_0, window_bounds = array<i64: 2, 8, 128>}, {pipeline_mode = #tpu.pipeline_mode<synchronous>, transform_indices = @transform_1, window_bounds = array<i64: 128, 128>}, {pipeline_mode = #tpu.pipeline_mode<synchronous>, transform_indices = @transform_2, window_bounds = array<i64: 128, 128>}, {pipeline_mode = #tpu.pipeline_mode<synchronous>, transform_indices = @transform_3, window_bounds = array<i64: 128, 128>}, {pipeline_mode = #tpu.pipeline_mode<synchronous>, transform_indices = @transform_4, window_bounds = array<i64: 128, 128>}, {pipeline_mode = #tpu.pipeline_mode<synchronous>, transform_indices = @transform_5, window_bounds = array<i64: 1, 128>}, {pipeline_mode = #tpu.pipeline_mode<synchronous>, transform_indices = @transform_6, window_bounds = array<i64: 1, 128>}, {pipeline_mode = #tpu.pipeline_mode<synchronous>, transform_indices = @transform_7, window_bounds = array<i64: 1, 128>}, {pipeline_mode = #tpu.pipeline_mode<synchronous>, transform_indices = @transform_8, window_bounds = array<i64: 1, 128>}, {pipeline_mode = #tpu.pipeline_mode<synchronous>, transform_indices = @transform_9, window_bounds = array<i64: 128, 512>}, {pipeline_mode = #tpu.pipeline_mode<synchronous>, transform_indices = @transform_10, window_bounds = array<i64: 1, 512>}, {pipeline_mode = #tpu.pipeline_mode<synchronous>, transform_indices = @transform_11, window_bounds = array<i64: 512, 128>}, {pipeline_mode = #tpu.pipeline_mode<synchronous>, transform_indices = @transform_12, window_bounds = array<i64: 1, 128>}, {pipeline_mode = #tpu.pipeline_mode<synchronous>, transform_indices = @transform_13, window_bounds = array<i64: 1, 128>}, {pipeline_mode = #tpu.pipeline_mode<synchronous>, transform_indices = @transform_14, window_bounds = array<i64: 1, 128>}, {transform_indices = @transform_15, window_bounds = array<i64: 2, 8, 128>}]} {
    %c0 = arith.constant 0 : index
    %c0_0 = arith.constant 0 : index
    %c0_1 = arith.constant 0 : index
    %0 = vector.load %arg1[%c0, %c0_0, %c0_1] : memref<2x8x128xf32, #tpu.memory_space<vmem>>, vector<2x8x128xf32>
    %1 = vector.shape_cast %0 : vector<2x8x128xf32> to vector<16x128xf32>
    %2 = arith.truncf %1 : vector<16x128xf32> to vector<16x128xbf16>
    %c0_2 = arith.constant 0 : index
    %c0_3 = arith.constant 0 : index
    %3 = vector.load %arg2[%c0_2, %c0_3] : memref<128x128xbf16, #tpu.memory_space<vmem>>, vector<128x128xbf16>
    %cst = arith.constant dense<0.000000e+00> : vector<16x128xf32>
    %4 = tpu.matmul %2, %3, %cst {dimension_numbers = #tpu.dot_dimension_numbers<[1], [0], [0], [1], [0, 0, 1, 1], [], []>} : vector<16x128xbf16>, vector<128x128xbf16>, vector<16x128xf32> -> vector<16x128xf32>
    %c0_4 = arith.constant 0 : index
    %c0_5 = arith.constant 0 : index
    %5 = vector.load %arg6[%c0_4, %c0_5] : memref<1x128xf32, #tpu.memory_space<vmem>>, vector<1x128xf32>
    %6 = vector.broadcast %5 : vector<1x128xf32> to vector<16x128xf32>
    %7 = arith.addf %4, %6 : vector<16x128xf32>
    %8 = arith.truncf %7 : vector<16x128xf32> to vector<16x128xbf16>
    %c0_6 = arith.constant 0 : index
    %c0_7 = arith.constant 0 : index
    %9 = vector.load %arg3[%c0_6, %c0_7] : memref<128x128xbf16, #tpu.memory_space<vmem>>, vector<128x128xbf16>
    %cst_8 = arith.constant dense<0.000000e+00> : vector<16x128xf32>
    %10 = tpu.matmul %2, %9, %cst_8 {dimension_numbers = #tpu.dot_dimension_numbers<[1], [0], [0], [1], [0, 0, 1, 1], [], []>} : vector<16x128xbf16>, vector<128x128xbf16>, vector<16x128xf32> -> vector<16x128xf32>
    %c0_9 = arith.constant 0 : index
    %c0_10 = arith.constant 0 : index
    %11 = vector.load %arg7[%c0_9, %c0_10] : memref<1x128xf32, #tpu.memory_space<vmem>>, vector<1x128xf32>
    %12 = vector.broadcast %11 : vector<1x128xf32> to vector<16x128xf32>
    %13 = arith.addf %10, %12 : vector<16x128xf32>
    %14 = arith.truncf %13 : vector<16x128xf32> to vector<16x128xbf16>
    %c0_11 = arith.constant 0 : index
    %c0_12 = arith.constant 0 : index
    %15 = vector.load %arg4[%c0_11, %c0_12] : memref<128x128xbf16, #tpu.memory_space<vmem>>, vector<128x128xbf16>
    %cst_13 = arith.constant dense<0.000000e+00> : vector<16x128xf32>
    %16 = tpu.matmul %2, %15, %cst_13 {dimension_numbers = #tpu.dot_dimension_numbers<[1], [0], [0], [1], [0, 0, 1, 1], [], []>} : vector<16x128xbf16>, vector<128x128xbf16>, vector<16x128xf32> -> vector<16x128xf32>
    %c0_14 = arith.constant 0 : index
    %c0_15 = arith.constant 0 : index
    %17 = vector.load %arg8[%c0_14, %c0_15] : memref<1x128xf32, #tpu.memory_space<vmem>>, vector<1x128xf32>
    %18 = vector.broadcast %17 : vector<1x128xf32> to vector<16x128xf32>
    %19 = arith.addf %16, %18 : vector<16x128xf32>
    %20 = arith.truncf %19 : vector<16x128xf32> to vector<16x128xbf16>
    %21 = vector.extract_strided_slice %8 {offsets = [0, 0], sizes = [16, 32], strides = [1, 1]} : vector<16x128xbf16> to vector<16x32xbf16>
    %22 = vector.shape_cast %21 : vector<16x32xbf16> to vector<2x8x32xbf16>
    %23 = vector.extract_strided_slice %14 {offsets = [0, 0], sizes = [16, 32], strides = [1, 1]} : vector<16x128xbf16> to vector<16x32xbf16>
    %24 = vector.shape_cast %23 : vector<16x32xbf16> to vector<2x8x32xbf16>
    %25 = vector.extract_strided_slice %20 {offsets = [0, 0], sizes = [16, 32], strides = [1, 1]} : vector<16x128xbf16> to vector<16x32xbf16>
    %26 = vector.shape_cast %25 : vector<16x32xbf16> to vector<2x8x32xbf16>
    "tpu.trace_start"() <{level = 10 : i32, message = "bqd,bkd->bqk"}> : () -> ()
    %cst_16 = arith.constant dense<0.000000e+00> : vector<2x8x8xf32>
    %27 = tpu.matmul %22, %24, %cst_16 {dimension_numbers = #tpu.dot_dimension_numbers<[2], [2], [1], [1], [0, 0, 0, 1, 1, 1], [0], [0]>} : vector<2x8x32xbf16>, vector<2x8x32xbf16>, vector<2x8x8xf32> -> vector<2x8x8xf32>
    "tpu.trace_stop"() : () -> ()
    %cst_17 = arith.constant dense<0xFF800000> : vector<2x8xf32>
    %28 = vector.multi_reduction <maximumf>, %27, %cst_17 [2] : vector<2x8x8xf32> to vector<2x8xf32>
    %29 = vector.shape_cast %28 : vector<2x8xf32> to vector<2x8x1xf32>
    %30 = vector.broadcast %29 : vector<2x8x1xf32> to vector<2x8x8xf32>
    %31 = arith.subf %27, %30 : vector<2x8x8xf32>
    %32 = math.exp %31 : vector<2x8x8xf32>
    %cst_18 = arith.constant dense<0.000000e+00> : vector<2x8xf32>
    %33 = vector.multi_reduction <add>, %32, %cst_18 [2] : vector<2x8x8xf32> to vector<2x8xf32>
    %34 = vector.shape_cast %33 : vector<2x8xf32> to vector<2x8x1xf32>
    %35 = tpu.reciprocal %34 {approx = true} : vector<2x8x1xf32> -> vector<2x8x1xf32>
    %36 = vector.broadcast %35 : vector<2x8x1xf32> to vector<2x8x8xf32>
    %37 = arith.mulf %32, %36 : vector<2x8x8xf32>
    %38 = arith.truncf %37 : vector<2x8x8xf32> to vector<2x8x8xbf16>
    "tpu.trace_start"() <{level = 10 : i32, message = "bqk,bkd->bqd"}> : () -> ()
    %cst_19 = arith.constant dense<0.000000e+00> : vector<2x8x32xf32>
    %39 = tpu.matmul %38, %26, %cst_19 {dimension_numbers = #tpu.dot_dimension_numbers<[2], [1], [1], [2], [0, 0, 0, 1, 1, 2], [0], [0]>} : vector<2x8x8xbf16>, vector<2x8x32xbf16>, vector<2x8x32xf32> -> vector<2x8x32xf32>
    "tpu.trace_stop"() : () -> ()
    %40 = vector.shape_cast %39 : vector<2x8x32xf32> to vector<16x32xf32>
    %41 = arith.truncf %40 : vector<16x32xf32> to vector<16x32xbf16>
    %c0_20 = arith.constant 0 : index
    %c0_21 = arith.constant 0 : index
    %42 = vector.load %arg17[%c0_20, %c0_21] : memref<16x128xbf16, #tpu.memory_space<vmem>>, vector<16x32xbf16>
    tpu.vector_store %arg17[%c0_20, %c0_21], %41 {strides = array<i32>} : memref<16x128xbf16, #tpu.memory_space<vmem>>, vector<16x32xbf16>,
    %43 = vector.extract_strided_slice %8 {offsets = [0, 32], sizes = [16, 32], strides = [1, 1]} : vector<16x128xbf16> to vector<16x32xbf16>
    %44 = vector.shape_cast %43 : vector<16x32xbf16> to vector<2x8x32xbf16>
    %45 = vector.extract_strided_slice %14 {offsets = [0, 32], sizes = [16, 32], strides = [1, 1]} : vector<16x128xbf16> to vector<16x32xbf16>
    %46 = vector.shape_cast %45 : vector<16x32xbf16> to vector<2x8x32xbf16>
    %47 = vector.extract_strided_slice %20 {offsets = [0, 32], sizes = [16, 32], strides = [1, 1]} : vector<16x128xbf16> to vector<16x32xbf16>
    %48 = vector.shape_cast %47 : vector<16x32xbf16> to vector<2x8x32xbf16>
    "tpu.trace_start"() <{level = 10 : i32, message = "bqd,bkd->bqk"}> : () -> ()
    %cst_22 = arith.constant dense<0.000000e+00> : vector<2x8x8xf32>
    %49 = tpu.matmul %44, %46, %cst_22 {dimension_numbers = #tpu.dot_dimension_numbers<[2], [2], [1], [1], [0, 0, 0, 1, 1, 1], [0], [0]>} : vector<2x8x32xbf16>, vector<2x8x32xbf16>, vector<2x8x8xf32> -> vector<2x8x8xf32>
    "tpu.trace_stop"() : () -> ()
    %cst_23 = arith.constant dense<0xFF800000> : vector<2x8xf32>
    %50 = vector.multi_reduction <maximumf>, %49, %cst_23 [2] : vector<2x8x8xf32> to vector<2x8xf32>
    %51 = vector.shape_cast %50 : vector<2x8xf32> to vector<2x8x1xf32>
    %52 = vector.broadcast %51 : vector<2x8x1xf32> to vector<2x8x8xf32>
    %53 = arith.subf %49, %52 : vector<2x8x8xf32>
    %54 = math.exp %53 : vector<2x8x8xf32>
    %cst_24 = arith.constant dense<0.000000e+00> : vector<2x8xf32>
    %55 = vector.multi_reduction <add>, %54, %cst_24 [2] : vector<2x8x8xf32> to vector<2x8xf32>
    %56 = vector.shape_cast %55 : vector<2x8xf32> to vector<2x8x1xf32>
    %57 = tpu.reciprocal %56 {approx = true} : vector<2x8x1xf32> -> vector<2x8x1xf32>
    %58 = vector.broadcast %57 : vector<2x8x1xf32> to vector<2x8x8xf32>
    %59 = arith.mulf %54, %58 : vector<2x8x8xf32>
    %60 = arith.truncf %59 : vector<2x8x8xf32> to vector<2x8x8xbf16>
    "tpu.trace_start"() <{level = 10 : i32, message = "bqk,bkd->bqd"}> : () -> ()
    %cst_25 = arith.constant dense<0.000000e+00> : vector<2x8x32xf32>
    %61 = tpu.matmul %60, %48, %cst_25 {dimension_numbers = #tpu.dot_dimension_numbers<[2], [1], [1], [2], [0, 0, 0, 1, 1, 2], [0], [0]>} : vector<2x8x8xbf16>, vector<2x8x32xbf16>, vector<2x8x32xf32> -> vector<2x8x32xf32>
    "tpu.trace_stop"() : () -> ()
    %62 = vector.shape_cast %61 : vector<2x8x32xf32> to vector<16x32xf32>
    %63 = arith.truncf %62 : vector<16x32xf32> to vector<16x32xbf16>
    %c0_26 = arith.constant 0 : index
    %c32 = arith.constant 32 : index
    %64 = vector.load %arg17[%c0_26, %c32] : memref<16x128xbf16, #tpu.memory_space<vmem>>, vector<16x32xbf16>
    tpu.vector_store %arg17[%c0_26, %c32], %63 {strides = array<i32>} : memref<16x128xbf16, #tpu.memory_space<vmem>>, vector<16x32xbf16>,
    %65 = vector.extract_strided_slice %8 {offsets = [0, 64], sizes = [16, 32], strides = [1, 1]} : vector<16x128xbf16> to vector<16x32xbf16>
    %66 = vector.shape_cast %65 : vector<16x32xbf16> to vector<2x8x32xbf16>
    %67 = vector.extract_strided_slice %14 {offsets = [0, 64], sizes = [16, 32], strides = [1, 1]} : vector<16x128xbf16> to vector<16x32xbf16>
    %68 = vector.shape_cast %67 : vector<16x32xbf16> to vector<2x8x32xbf16>
    %69 = vector.extract_strided_slice %20 {offsets = [0, 64], sizes = [16, 32], strides = [1, 1]} : vector<16x128xbf16> to vector<16x32xbf16>
    %70 = vector.shape_cast %69 : vector<16x32xbf16> to vector<2x8x32xbf16>
    "tpu.trace_start"() <{level = 10 : i32, message = "bqd,bkd->bqk"}> : () -> ()
    %cst_27 = arith.constant dense<0.000000e+00> : vector<2x8x8xf32>
    %71 = tpu.matmul %66, %68, %cst_27 {dimension_numbers = #tpu.dot_dimension_numbers<[2], [2], [1], [1], [0, 0, 0, 1, 1, 1], [0], [0]>} : vector<2x8x32xbf16>, vector<2x8x32xbf16>, vector<2x8x8xf32> -> vector<2x8x8xf32>
    "tpu.trace_stop"() : () -> ()
    %cst_28 = arith.constant dense<0xFF800000> : vector<2x8xf32>
    %72 = vector.multi_reduction <maximumf>, %71, %cst_28 [2] : vector<2x8x8xf32> to vector<2x8xf32>
    %73 = vector.shape_cast %72 : vector<2x8xf32> to vector<2x8x1xf32>
    %74 = vector.broadcast %73 : vector<2x8x1xf32> to vector<2x8x8xf32>
    %75 = arith.subf %71, %74 : vector<2x8x8xf32>
    %76 = math.exp %75 : vector<2x8x8xf32>
    %cst_29 = arith.constant dense<0.000000e+00> : vector<2x8xf32>
    %77 = vector.multi_reduction <add>, %76, %cst_29 [2] : vector<2x8x8xf32> to vector<2x8xf32>
    %78 = vector.shape_cast %77 : vector<2x8xf32> to vector<2x8x1xf32>
    %79 = tpu.reciprocal %78 {approx = true} : vector<2x8x1xf32> -> vector<2x8x1xf32>
    %80 = vector.broadcast %79 : vector<2x8x1xf32> to vector<2x8x8xf32>
    %81 = arith.mulf %76, %80 : vector<2x8x8xf32>
    %82 = arith.truncf %81 : vector<2x8x8xf32> to vector<2x8x8xbf16>
    "tpu.trace_start"() <{level = 10 : i32, message = "bqk,bkd->bqd"}> : () -> ()
    %cst_30 = arith.constant dense<0.000000e+00> : vector<2x8x32xf32>
    %83 = tpu.matmul %82, %70, %cst_30 {dimension_numbers = #tpu.dot_dimension_numbers<[2], [1], [1], [2], [0, 0, 0, 1, 1, 2], [0], [0]>} : vector<2x8x8xbf16>, vector<2x8x32xbf16>, vector<2x8x32xf32> -> vector<2x8x32xf32>
    "tpu.trace_stop"() : () -> ()
    %84 = vector.shape_cast %83 : vector<2x8x32xf32> to vector<16x32xf32>
    %85 = arith.truncf %84 : vector<16x32xf32> to vector<16x32xbf16>
    %c0_31 = arith.constant 0 : index
    %c64 = arith.constant 64 : index
    %86 = vector.load %arg17[%c0_31, %c64] : memref<16x128xbf16, #tpu.memory_space<vmem>>, vector<16x32xbf16>
    tpu.vector_store %arg17[%c0_31, %c64], %85 {strides = array<i32>} : memref<16x128xbf16, #tpu.memory_space<vmem>>, vector<16x32xbf16>,
    %87 = vector.extract_strided_slice %8 {offsets = [0, 96], sizes = [16, 32], strides = [1, 1]} : vector<16x128xbf16> to vector<16x32xbf16>
    %88 = vector.shape_cast %87 : vector<16x32xbf16> to vector<2x8x32xbf16>
    %89 = vector.extract_strided_slice %14 {offsets = [0, 96], sizes = [16, 32], strides = [1, 1]} : vector<16x128xbf16> to vector<16x32xbf16>
    %90 = vector.shape_cast %89 : vector<16x32xbf16> to vector<2x8x32xbf16>
    %91 = vector.extract_strided_slice %20 {offsets = [0, 96], sizes = [16, 32], strides = [1, 1]} : vector<16x128xbf16> to vector<16x32xbf16>
    %92 = vector.shape_cast %91 : vector<16x32xbf16> to vector<2x8x32xbf16>
    "tpu.trace_start"() <{level = 10 : i32, message = "bqd,bkd->bqk"}> : () -> ()
    %cst_32 = arith.constant dense<0.000000e+00> : vector<2x8x8xf32>
    %93 = tpu.matmul %88, %90, %cst_32 {dimension_numbers = #tpu.dot_dimension_numbers<[2], [2], [1], [1], [0, 0, 0, 1, 1, 1], [0], [0]>} : vector<2x8x32xbf16>, vector<2x8x32xbf16>, vector<2x8x8xf32> -> vector<2x8x8xf32>
    "tpu.trace_stop"() : () -> ()
    %cst_33 = arith.constant dense<0xFF800000> : vector<2x8xf32>
    %94 = vector.multi_reduction <maximumf>, %93, %cst_33 [2] : vector<2x8x8xf32> to vector<2x8xf32>
    %95 = vector.shape_cast %94 : vector<2x8xf32> to vector<2x8x1xf32>
    %96 = vector.broadcast %95 : vector<2x8x1xf32> to vector<2x8x8xf32>
    %97 = arith.subf %93, %96 : vector<2x8x8xf32>
    %98 = math.exp %97 : vector<2x8x8xf32>
    %cst_34 = arith.constant dense<0.000000e+00> : vector<2x8xf32>
    %99 = vector.multi_reduction <add>, %98, %cst_34 [2] : vector<2x8x8xf32> to vector<2x8xf32>
    %100 = vector.shape_cast %99 : vector<2x8xf32> to vector<2x8x1xf32>
    %101 = tpu.reciprocal %100 {approx = true} : vector<2x8x1xf32> -> vector<2x8x1xf32>
    %102 = vector.broadcast %101 : vector<2x8x1xf32> to vector<2x8x8xf32>
    %103 = arith.mulf %98, %102 : vector<2x8x8xf32>
    %104 = arith.truncf %103 : vector<2x8x8xf32> to vector<2x8x8xbf16>
    "tpu.trace_start"() <{level = 10 : i32, message = "bqk,bkd->bqd"}> : () -> ()
    %cst_35 = arith.constant dense<0.000000e+00> : vector<2x8x32xf32>
    %105 = tpu.matmul %104, %92, %cst_35 {dimension_numbers = #tpu.dot_dimension_numbers<[2], [1], [1], [2], [0, 0, 0, 1, 1, 2], [0], [0]>} : vector<2x8x8xbf16>, vector<2x8x32xbf16>, vector<2x8x32xf32> -> vector<2x8x32xf32>
    "tpu.trace_stop"() : () -> ()
    %106 = vector.shape_cast %105 : vector<2x8x32xf32> to vector<16x32xf32>
    %107 = arith.truncf %106 : vector<16x32xf32> to vector<16x32xbf16>
    %c0_36 = arith.constant 0 : index
    %c96 = arith.constant 96 : index
    %108 = vector.load %arg17[%c0_36, %c96] : memref<16x128xbf16, #tpu.memory_space<vmem>>, vector<16x32xbf16>
    tpu.vector_store %arg17[%c0_36, %c96], %107 {strides = array<i32>} : memref<16x128xbf16, #tpu.memory_space<vmem>>, vector<16x32xbf16>,
    %c0_37 = arith.constant 0 : index
    %c0_38 = arith.constant 0 : index
    %109 = vector.load %arg17[%c0_37, %c0_38] : memref<16x128xbf16, #tpu.memory_space<vmem>>, vector<16x128xbf16>
    %c0_39 = arith.constant 0 : index
    %c0_40 = arith.constant 0 : index
    %110 = vector.load %arg5[%c0_39, %c0_40] : memref<128x128xbf16, #tpu.memory_space<vmem>>, vector<128x128xbf16>
    %cst_41 = arith.constant dense<0.000000e+00> : vector<16x128xf32>
    %111 = tpu.matmul %109, %110, %cst_41 {dimension_numbers = #tpu.dot_dimension_numbers<[1], [0], [0], [1], [0, 0, 1, 1], [], []>} : vector<16x128xbf16>, vector<128x128xbf16>, vector<16x128xf32> -> vector<16x128xf32>
    %c0_42 = arith.constant 0 : index
    %c0_43 = arith.constant 0 : index
    %112 = vector.load %arg9[%c0_42, %c0_43] : memref<1x128xf32, #tpu.memory_space<vmem>>, vector<1x128xf32>
    %113 = vector.broadcast %112 : vector<1x128xf32> to vector<16x128xf32>
    %114 = arith.addf %111, %113 : vector<16x128xf32>
    %c0_44 = arith.constant 0 : index
    %c0_45 = arith.constant 0 : index
    %115 = vector.load %arg14[%c0_44, %c0_45] : memref<1x128xf32, #tpu.memory_space<vmem>>, vector<1x128xf32>
    %c0_46 = arith.constant 0 : index
    %c0_47 = arith.constant 0 : index
    %116 = vector.load %arg15[%c0_46, %c0_47] : memref<1x128xf32, #tpu.memory_space<vmem>>, vector<1x128xf32>
    %117 = arith.addf %1, %114 : vector<16x128xf32>
    %cst_48 = arith.constant dense<0.000000e+00> : vector<16xf32>
    %118 = vector.multi_reduction <add>, %117, %cst_48 [1] : vector<16x128xf32> to vector<16xf32>
    %119 = vector.shape_cast %118 : vector<16xf32> to vector<16x1xf32>
    %cst_49 = arith.constant 1.280000e+02 : f32
    %120 = vector.broadcast %cst_49 : f32 to vector<16x1xf32>
    %121 = arith.divf %119, %120 : vector<16x1xf32>
    %122 = vector.broadcast %121 : vector<16x1xf32> to vector<16x128xf32>
    %123 = arith.subf %117, %122 : vector<16x128xf32>
    %124 = arith.mulf %123, %123 : vector<16x128xf32>
    %cst_50 = arith.constant dense<0.000000e+00> : vector<16xf32>
    %125 = vector.multi_reduction <add>, %124, %cst_50 [1] : vector<16x128xf32> to vector<16xf32>
    %126 = vector.shape_cast %125 : vector<16xf32> to vector<16x1xf32>
    %cst_51 = arith.constant 1.280000e+02 : f32
    %127 = vector.broadcast %cst_51 : f32 to vector<16x1xf32>
    %128 = arith.divf %126, %127 : vector<16x1xf32>
    %129 = vector.broadcast %121 : vector<16x1xf32> to vector<16x128xf32>
    %130 = arith.subf %117, %129 : vector<16x128xf32>
    %cst_52 = arith.constant 9.99999974E-6 : f32
    %131 = vector.broadcast %cst_52 : f32 to vector<16x1xf32>
    %132 = arith.addf %128, %131 : vector<16x1xf32>
    %133 = math.rsqrt %132 : vector<16x1xf32>
    %134 = vector.broadcast %133 : vector<16x1xf32> to vector<16x128xf32>
    %135 = arith.mulf %130, %134 : vector<16x128xf32>
    %136 = vector.broadcast %115 : vector<1x128xf32> to vector<16x128xf32>
    %137 = arith.mulf %135, %136 : vector<16x128xf32>
    %138 = vector.broadcast %116 : vector<1x128xf32> to vector<16x128xf32>
    %139 = arith.addf %137, %138 : vector<16x128xf32>
    %140 = arith.truncf %139 : vector<16x128xf32> to vector<16x128xbf16>
    %c0_53 = arith.constant 0 : index
    %c0_54 = arith.constant 0 : index
    %141 = vector.load %arg10[%c0_53, %c0_54] : memref<128x512xbf16, #tpu.memory_space<vmem>>, vector<128x512xbf16>
    %cst_55 = arith.constant dense<0.000000e+00> : vector<16x512xf32>
    %142 = tpu.matmul %140, %141, %cst_55 {dimension_numbers = #tpu.dot_dimension_numbers<[1], [0], [0], [1], [0, 0, 1, 1], [], []>} : vector<16x128xbf16>, vector<128x512xbf16>, vector<16x512xf32> -> vector<16x512xf32>
    %c0_56 = arith.constant 0 : index
    %c0_57 = arith.constant 0 : index
    %143 = vector.load %arg11[%c0_56, %c0_57] : memref<1x512xf32, #tpu.memory_space<vmem>>, vector<1x512xf32>
    %144 = vector.broadcast %143 : vector<1x512xf32> to vector<16x512xf32>
    %145 = arith.addf %142, %144 : vector<16x512xf32>
    %cst_58 = arith.constant 5.000000e-01 : f32
    %146 = vector.broadcast %cst_58 : f32 to vector<16x512xf32>
    %147 = arith.mulf %146, %145 : vector<16x512xf32>
    %cst_59 = arith.constant 0.707106769 : f32
    %148 = vector.broadcast %cst_59 : f32 to vector<16x512xf32>
    %149 = arith.mulf %145, %148 : vector<16x512xf32>
    %150 = math.erf %149 : vector<16x512xf32>
    %cst_60 = arith.constant 1.000000e+00 : f32
    %151 = vector.broadcast %cst_60 : f32 to vector<16x512xf32>
    %152 = arith.addf %151, %150 : vector<16x512xf32>
    %153 = arith.mulf %147, %152 : vector<16x512xf32>
    %154 = arith.truncf %153 : vector<16x512xf32> to vector<16x512xbf16>
    %c0_61 = arith.constant 0 : index
    %c0_62 = arith.constant 0 : index
    %155 = vector.load %arg12[%c0_61, %c0_62] : memref<512x128xbf16, #tpu.memory_space<vmem>>, vector<512x128xbf16>
    %cst_63 = arith.constant dense<0.000000e+00> : vector<16x128xf32>
    %156 = tpu.matmul %154, %155, %cst_63 {dimension_numbers = #tpu.dot_dimension_numbers<[1], [0], [0], [1], [0, 0, 1, 1], [], []>} : vector<16x512xbf16>, vector<512x128xbf16>, vector<16x128xf32> -> vector<16x128xf32>
    %c0_64 = arith.constant 0 : index
    %c0_65 = arith.constant 0 : index
    %157 = vector.load %arg13[%c0_64, %c0_65] : memref<1x128xf32, #tpu.memory_space<vmem>>, vector<1x128xf32>
    %158 = vector.broadcast %157 : vector<1x128xf32> to vector<16x128xf32>
    %159 = arith.addf %156, %158 : vector<16x128xf32>
    %160 = arith.addf %159, %139 : vector<16x128xf32>
    %cst_66 = arith.constant dense<0.000000e+00> : vector<16xf32>
    %161 = vector.multi_reduction <add>, %160, %cst_66 [1] : vector<16x128xf32> to vector<16xf32>
    %162 = vector.shape_cast %161 : vector<16xf32> to vector<16x1xf32>
    %cst_67 = arith.constant 1.280000e+02 : f32
    %163 = vector.broadcast %cst_67 : f32 to vector<16x1xf32>
    %164 = arith.divf %162, %163 : vector<16x1xf32>
    %165 = vector.broadcast %164 : vector<16x1xf32> to vector<16x128xf32>
    %166 = arith.subf %160, %165 : vector<16x128xf32>
    %167 = arith.mulf %166, %166 : vector<16x128xf32>
    %cst_68 = arith.constant dense<0.000000e+00> : vector<16xf32>
    %168 = vector.multi_reduction <add>, %167, %cst_68 [1] : vector<16x128xf32> to vector<16xf32>
    %169 = vector.shape_cast %168 : vector<16xf32> to vector<16x1xf32>
    %cst_69 = arith.constant 1.280000e+02 : f32
    %170 = vector.broadcast %cst_69 : f32 to vector<16x1xf32>
    %171 = arith.divf %169, %170 : vector<16x1xf32>
    %172 = vector.broadcast %164 : vector<16x1xf32> to vector<16x128xf32>
    %173 = arith.subf %160, %172 : vector<16x128xf32>
    %cst_70 = arith.constant 9.99999974E-6 : f32
    %174 = vector.broadcast %cst_70 : f32 to vector<16x1xf32>
    %175 = arith.addf %171, %174 : vector<16x1xf32>
    %176 = math.rsqrt %175 : vector<16x1xf32>
    %177 = vector.broadcast %176 : vector<16x1xf32> to vector<16x128xf32>
    %178 = arith.mulf %173, %177 : vector<16x128xf32>
    %179 = vector.broadcast %115 : vector<1x128xf32> to vector<16x128xf32>
    %180 = arith.mulf %178, %179 : vector<16x128xf32>
    %181 = vector.broadcast %116 : vector<1x128xf32> to vector<16x128xf32>
    %182 = arith.addf %180, %181 : vector<16x128xf32>
    %183 = vector.shape_cast %182 : vector<16x128xf32> to vector<2x8x128xf32>
    %c0_71 = arith.constant 0 : index
    %c0_72 = arith.constant 0 : index
    %c0_73 = arith.constant 0 : index
    %184 = vector.load %arg16[%c0_71, %c0_72, %c0_73] : memref<2x8x128xf32, #tpu.memory_space<vmem>>, vector<2x8x128xf32>
    tpu.vector_store %arg16[%c0_71, %c0_72, %c0_73], %183 {strides = array<i32>} : memref<2x8x128xf32, #tpu.memory_space<vmem>>, vector<2x8x128xf32>,
    return
  }
  func.func @transform_0(%arg0: i32) -> (i32, i32, i32) {
    %c0_i32 = arith.constant 0 : i32
    %c0_i32_0 = arith.constant 0 : i32
    %c0_i32_1 = arith.constant 0 : i32
    return %arg0, %c0_i32, %c0_i32_0 : i32, i32, i32
  }
  func.func @transform_1(%arg0: i32) -> (i32, i32) {
    %c0_i32 = arith.constant 0 : i32
    %c0_i32_0 = arith.constant 0 : i32
    %c0_i32_1 = arith.constant 0 : i32
    return %c0_i32, %c0_i32_0 : i32, i32
  }
  func.func @transform_2(%arg0: i32) -> (i32, i32) {
    %c0_i32 = arith.constant 0 : i32
    %c0_i32_0 = arith.constant 0 : i32
    %c0_i32_1 = arith.constant 0 : i32
    return %c0_i32, %c0_i32_0 : i32, i32
  }
  func.func @transform_3(%arg0: i32) -> (i32, i32) {
    %c0_i32 = arith.constant 0 : i32
    %c0_i32_0 = arith.constant 0 : i32
    %c0_i32_1 = arith.constant 0 : i32
    return %c0_i32, %c0_i32_0 : i32, i32
  }
  func.func @transform_4(%arg0: i32) -> (i32, i32) {
    %c0_i32 = arith.constant 0 : i32
    %c0_i32_0 = arith.constant 0 : i32
    %c0_i32_1 = arith.constant 0 : i32
    return %c0_i32, %c0_i32_0 : i32, i32
  }
  func.func @transform_5(%arg0: i32) -> (i32, i32) {
    %c0_i32 = arith.constant 0 : i32
    %c0_i32_0 = arith.constant 0 : i32
    %c0_i32_1 = arith.constant 0 : i32
    return %c0_i32, %c0_i32_0 : i32, i32
  }
  func.func @transform_6(%arg0: i32) -> (i32, i32) {
    %c0_i32 = arith.constant 0 : i32
    %c0_i32_0 = arith.constant 0 : i32
    %c0_i32_1 = arith.constant 0 : i32
    return %c0_i32, %c0_i32_0 : i32, i32
  }
  func.func @transform_7(%arg0: i32) -> (i32, i32) {
    %c0_i32 = arith.constant 0 : i32
    %c0_i32_0 = arith.constant 0 : i32
    %c0_i32_1 = arith.constant 0 : i32
    return %c0_i32, %c0_i32_0 : i32, i32
  }
  func.func @transform_8(%arg0: i32) -> (i32, i32) {
    %c0_i32 = arith.constant 0 : i32
    %c0_i32_0 = arith.constant 0 : i32
    %c0_i32_1 = arith.constant 0 : i32
    return %c0_i32, %c0_i32_0 : i32, i32
  }
  func.func @transform_9(%arg0: i32) -> (i32, i32) {
    %c0_i32 = arith.constant 0 : i32
    %c0_i32_0 = arith.constant 0 : i32
    %c0_i32_1 = arith.constant 0 : i32
    return %c0_i32, %c0_i32_0 : i32, i32
  }
  func.func @transform_10(%arg0: i32) -> (i32, i32) {
    %c0_i32 = arith.constant 0 : i32
    %c0_i32_0 = arith.constant 0 : i32
    %c0_i32_1 = arith.constant 0 : i32
    return %c0_i32, %c0_i32_0 : i32, i32
  }
  func.func @transform_11(%arg0: i32) -> (i32, i32) {
    %c0_i32 = arith.constant 0 : i32
    %c0_i32_0 = arith.constant 0 : i32
    %c0_i32_1 = arith.constant 0 : i32
    return %c0_i32, %c0_i32_0 : i32, i32
  }
  func.func @transform_12(%arg0: i32) -> (i32, i32) {
    %c0_i32 = arith.constant 0 : i32
    %c0_i32_0 = arith.constant 0 : i32
    %c0_i32_1 = arith.constant 0 : i32
    return %c0_i32, %c0_i32_0 : i32, i32
  }
  func.func @transform_13(%arg0: i32) -> (i32, i32) {
    %c0_i32 = arith.constant 0 : i32
    %c0_i32_0 = arith.constant 0 : i32
    %c0_i32_1 = arith.constant 0 : i32
    return %c0_i32, %c0_i32_0 : i32, i32
  }
  func.func @transform_14(%arg0: i32) -> (i32, i32) {
    %c0_i32 = arith.constant 0 : i32
    %c0_i32_0 = arith.constant 0 : i32
    %c0_i32_1 = arith.constant 0 : i32
    return %c0_i32, %c0_i32_0 : i32, i32
  }
  func.func @transform_15(%arg0: i32) -> (i32, i32, i32) {
    %c0_i32 = arith.constant 0 : i32
    %c0_i32_0 = arith.constant 0 : i32
    %c0_i32_1 = arith.constant 0 : i32
    return %arg0, %c0_i32, %c0_i32_0 : i32, i32, i32
  }
}

module attributes {stable_mosaic.version = 11 : i64} {
  func.func @encoder_kernel(%arg0: i32, %arg1: memref<2x8x128xf32, #tpu.memory_space<vmem>>, %arg2: memref<128x128xbf16, #tpu.memory_space<vmem>>, %arg3: memref<128x128xbf16, #tpu.memory_space<vmem>>, %arg4: memref<128x128xbf16, #tpu.memory_space<vmem>>, %arg5: memref<128x128xbf16, #tpu.memory_space<vmem>>, %arg6: memref<1x128xf32, #tpu.memory_space<vmem>>, %arg7: memref<1x128xf32, #tpu.memory_space<vmem>>, %arg8: memref<1x128xf32, #tpu.memory_space<vmem>>, %arg9: memref<1x128xf32, #tpu.memory_space<vmem>>, %arg10: memref<128x512xbf16, #tpu.memory_space<vmem>>, %arg11: memref<1x512xf32, #tpu.memory_space<vmem>>, %arg12: memref<512x128xbf16, #tpu.memory_space<vmem>>, %arg13: memref<1x128xf32, #tpu.memory_space<vmem>>, %arg14: memref<1x128xf32, #tpu.memory_space<vmem>>, %arg15: memref<1x128xf32, #tpu.memory_space<vmem>>, %arg16: memref<2x8x128xf32, #tpu.memory_space<vmem>>, %arg17: memref<16x128xbf16, #tpu.memory_space<vmem>>) attributes {dimension_semantics = [#tpu.dimension_semantics<parallel>], iteration_bounds = array<i64: 1>, scalar_prefetch = 0 : i64, scratch_operands = 1 : i64, tpu.core_type = #tpu.core_type<tc>, window_params = [{transform_indices = @transform_0, window_bounds = array<i64: 2, 8, 128>}, {pipeline_mode = #tpu.pipeline_mode<synchronous>, transform_indices = @transform_1, window_bounds = array<i64: 128, 128>}, {pipeline_mode = #tpu.pipeline_mode<synchronous>, transform_indices = @transform_2, window_bounds = array<i64: 128, 128>}, {pipeline_mode = #tpu.pipeline_mode<synchronous>, transform_indices = @transform_3, window_bounds = array<i64: 128, 128>}, {pipeline_mode = #tpu.pipeline_mode<synchronous>, transform_indices = @transform_4, window_bounds = array<i64: 128, 128>}, {pipeline_mode = #tpu.pipeline_mode<synchronous>, transform_indices = @transform_5, window_bounds = array<i64: 1, 128>}, {pipeline_mode = #tpu.pipeline_mode<synchronous>, transform_indices = @transform_6, window_bounds = array<i64: 1, 128>}, {pipeline_mode = #tpu.pipeline_mode<synchronous>, transform_indices = @transform_7, window_bounds = array<i64: 1, 128>}, {pipeline_mode = #tpu.pipeline_mode<synchronous>, transform_indices = @transform_8, window_bounds = array<i64: 1, 128>}, {pipeline_mode = #tpu.pipeline_mode<synchronous>, transform_indices = @transform_9, window_bounds = array<i64: 128, 512>}, {pipeline_mode = #tpu.pipeline_mode<synchronous>, transform_indices = @transform_10, window_bounds = array<i64: 1, 512>}, {pipeline_mode = #tpu.pipeline_mode<synchronous>, transform_indices = @transform_11, window_bounds = array<i64: 512, 128>}, {pipeline_mode = #tpu.pipeline_mode<synchronous>, transform_indices = @transform_12, window_bounds = array<i64: 1, 128>}, {pipeline_mode = #tpu.pipeline_mode<synchronous>, transform_indices = @transform_13, window_bounds = array<i64: 1, 128>}, {pipeline_mode = #tpu.pipeline_mode<synchronous>, transform_indices = @transform_14, window_bounds = array<i64: 1, 128>}, {transform_indices = @transform_15, window_bounds = array<i64: 2, 8, 128>}]} {
    %c0 = arith.constant 0 : index
    %c0_0 = arith.constant 0 : index
    %c0_1 = arith.constant 0 : index
    %0 = vector.load %arg1[%c0, %c0_0, %c0_1] : memref<2x8x128xf32, #tpu.memory_space<vmem>>, vector<2x8x128xf32>
    %1 = vector.shape_cast %0 : vector<2x8x128xf32> to vector<16x128xf32>
    %2 = arith.truncf %1 : vector<16x128xf32> to vector<16x128xbf16>
    %c0_2 = arith.constant 0 : index
    %c0_3 = arith.constant 0 : index
    %3 = vector.load %arg2[%c0_2, %c0_3] : memref<128x128xbf16, #tpu.memory_space<vmem>>, vector<128x128xbf16>
    %cst = arith.constant dense<0.000000e+00> : vector<16x128xf32>
    %4 = tpu.matmul %2, %3, %cst {dimension_numbers = #tpu.dot_dimension_numbers<[1], [0], [0], [1], [0, 0, 1, 1], [], []>} : vector<16x128xbf16>, vector<128x128xbf16>, vector<16x128xf32> -> vector<16x128xf32>
    %c0_4 = arith.constant 0 : index
    %c0_5 = arith.constant 0 : index
    %5 = vector.load %arg6[%c0_4, %c0_5] : memref<1x128xf32, #tpu.memory_space<vmem>>, vector<1x128xf32>
    %6 = vector.broadcast %5 : vector<1x128xf32> to vector<16x128xf32>
    %7 = arith.addf %4, %6 : vector<16x128xf32>
    %8 = arith.truncf %7 : vector<16x128xf32> to vector<16x128xbf16>
    %c0_6 = arith.constant 0 : index
    %c0_7 = arith.constant 0 : index
    %9 = vector.load %arg3[%c0_6, %c0_7] : memref<128x128xbf16, #tpu.memory_space<vmem>>, vector<128x128xbf16>
    %cst_8 = arith.constant dense<0.000000e+00> : vector<16x128xf32>
    %10 = tpu.matmul %2, %9, %cst_8 {dimension_numbers = #tpu.dot_dimension_numbers<[1], [0], [0], [1], [0, 0, 1, 1], [], []>} : vector<16x128xbf16>, vector<128x128xbf16>, vector<16x128xf32> -> vector<16x128xf32>
    %c0_9 = arith.constant 0 : index
    %c0_10 = arith.constant 0 : index
    %11 = vector.load %arg7[%c0_9, %c0_10] : memref<1x128xf32, #tpu.memory_space<vmem>>, vector<1x128xf32>
    %12 = vector.broadcast %11 : vector<1x128xf32> to vector<16x128xf32>
    %13 = arith.addf %10, %12 : vector<16x128xf32>
    %14 = arith.truncf %13 : vector<16x128xf32> to vector<16x128xbf16>
    %c0_11 = arith.constant 0 : index
    %c0_12 = arith.constant 0 : index
    %15 = vector.load %arg4[%c0_11, %c0_12] : memref<128x128xbf16, #tpu.memory_space<vmem>>, vector<128x128xbf16>
    %cst_13 = arith.constant dense<0.000000e+00> : vector<16x128xf32>
    %16 = tpu.matmul %2, %15, %cst_13 {dimension_numbers = #tpu.dot_dimension_numbers<[1], [0], [0], [1], [0, 0, 1, 1], [], []>} : vector<16x128xbf16>, vector<128x128xbf16>, vector<16x128xf32> -> vector<16x128xf32>
    %c0_14 = arith.constant 0 : index
    %c0_15 = arith.constant 0 : index
    %17 = vector.load %arg8[%c0_14, %c0_15] : memref<1x128xf32, #tpu.memory_space<vmem>>, vector<1x128xf32>
    %18 = vector.broadcast %17 : vector<1x128xf32> to vector<16x128xf32>
    %19 = arith.addf %16, %18 : vector<16x128xf32>
    %20 = arith.truncf %19 : vector<16x128xf32> to vector<16x128xbf16>
    %21 = vector.extract_strided_slice %8 {offsets = [0, 0], sizes = [16, 32], strides = [1, 1]} : vector<16x128xbf16> to vector<16x32xbf16>
    %22 = vector.shape_cast %21 : vector<16x32xbf16> to vector<2x8x32xbf16>
    %23 = vector.extract_strided_slice %14 {offsets = [0, 0], sizes = [16, 32], strides = [1, 1]} : vector<16x128xbf16> to vector<16x32xbf16>
    %24 = vector.shape_cast %23 : vector<16x32xbf16> to vector<2x8x32xbf16>
    %25 = vector.extract_strided_slice %20 {offsets = [0, 0], sizes = [16, 32], strides = [1, 1]} : vector<16x128xbf16> to vector<16x32xbf16>
    %26 = vector.shape_cast %25 : vector<16x32xbf16> to vector<2x8x32xbf16>
    "tpu.trace_start"() <{level = 10 : i32, message = "bqd,bkd->bqk"}> : () -> ()
    %cst_16 = arith.constant dense<0.000000e+00> : vector<2x8x8xf32>
    %27 = tpu.matmul %22, %24, %cst_16 {dimension_numbers = #tpu.dot_dimension_numbers<[2], [2], [1], [1], [0, 0, 0, 1, 1, 1], [0], [0]>} : vector<2x8x32xbf16>, vector<2x8x32xbf16>, vector<2x8x8xf32> -> vector<2x8x8xf32>
    "tpu.trace_stop"() : () -> ()
    %cst_17 = arith.constant dense<0xFF800000> : vector<2x8xf32>
    %28 = vector.multi_reduction <maximumf>, %27, %cst_17 [2] : vector<2x8x8xf32> to vector<2x8xf32>
    %29 = vector.shape_cast %28 : vector<2x8xf32> to vector<2x8x1xf32>
    %30 = vector.broadcast %29 : vector<2x8x1xf32> to vector<2x8x8xf32>
    %31 = arith.subf %27, %30 : vector<2x8x8xf32>
    %32 = math.exp %31 : vector<2x8x8xf32>
    %cst_18 = arith.constant dense<0.000000e+00> : vector<2x8xf32>
    %33 = vector.multi_reduction <add>, %32, %cst_18 [2] : vector<2x8x8xf32> to vector<2x8xf32>
    %34 = vector.shape_cast %33 : vector<2x8xf32> to vector<2x8x1xf32>
    %35 = tpu.reciprocal %34 {approx = true} : vector<2x8x1xf32> -> vector<2x8x1xf32>
    %36 = vector.broadcast %35 : vector<2x8x1xf32> to vector<2x8x8xf32>
    %37 = arith.mulf %32, %36 : vector<2x8x8xf32>
    %38 = arith.truncf %37 : vector<2x8x8xf32> to vector<2x8x8xbf16>
    "tpu.trace_start"() <{level = 10 : i32, message = "bqk,bkd->bqd"}> : () -> ()
    %cst_19 = arith.constant dense<0.000000e+00> : vector<2x8x32xf32>
    %39 = tpu.matmul %38, %26, %cst_19 {dimension_numbers = #tpu.dot_dimension_numbers<[2], [1], [1], [2], [0, 0, 0, 1, 1, 2], [0], [0]>} : vector<2x8x8xbf16>, vector<2x8x32xbf16>, vector<2x8x32xf32> -> vector<2x8x32xf32>
    "tpu.trace_stop"() : () -> ()
    %40 = vector.shape_cast %39 : vector<2x8x32xf32> to vector<16x32xf32>
    %41 = arith.truncf %40 : vector<16x32xf32> to vector<16x32xbf16>
    %c0_20 = arith.constant 0 : index
    %c0_21 = arith.constant 0 : index
    %42 = vector.load %arg17[%c0_20, %c0_21] : memref<16x128xbf16, #tpu.memory_space<vmem>>, vector<16x32xbf16>
    tpu.vector_store %arg17[%c0_20, %c0_21], %41 {strides = array<i32>} : memref<16x128xbf16, #tpu.memory_space<vmem>>, vector<16x32xbf16>,
    %43 = vector.extract_strided_slice %8 {offsets = [0, 32], sizes = [16, 32], strides = [1, 1]} : vector<16x128xbf16> to vector<16x32xbf16>
    %44 = vector.shape_cast %43 : vector<16x32xbf16> to vector<2x8x32xbf16>
    %45 = vector.extract_strided_slice %14 {offsets = [0, 32], sizes = [16, 32], strides = [1, 1]} : vector<16x128xbf16> to vector<16x32xbf16>
    %46 = vector.shape_cast %45 : vector<16x32xbf16> to vector<2x8x32xbf16>
    %47 = vector.extract_strided_slice %20 {offsets = [0, 32], sizes = [16, 32], strides = [1, 1]} : vector<16x128xbf16> to vector<16x32xbf16>
    %48 = vector.shape_cast %47 : vector<16x32xbf16> to vector<2x8x32xbf16>
    "tpu.trace_start"() <{level = 10 : i32, message = "bqd,bkd->bqk"}> : () -> ()
    %cst_22 = arith.constant dense<0.000000e+00> : vector<2x8x8xf32>
    %49 = tpu.matmul %44, %46, %cst_22 {dimension_numbers = #tpu.dot_dimension_numbers<[2], [2], [1], [1], [0, 0, 0, 1, 1, 1], [0], [0]>} : vector<2x8x32xbf16>, vector<2x8x32xbf16>, vector<2x8x8xf32> -> vector<2x8x8xf32>
    "tpu.trace_stop"() : () -> ()
    %cst_23 = arith.constant dense<0xFF800000> : vector<2x8xf32>
    %50 = vector.multi_reduction <maximumf>, %49, %cst_23 [2] : vector<2x8x8xf32> to vector<2x8xf32>
    %51 = vector.shape_cast %50 : vector<2x8xf32> to vector<2x8x1xf32>
    %52 = vector.broadcast %51 : vector<2x8x1xf32> to vector<2x8x8xf32>
    %53 = arith.subf %49, %52 : vector<2x8x8xf32>
    %54 = math.exp %53 : vector<2x8x8xf32>
    %cst_24 = arith.constant dense<0.000000e+00> : vector<2x8xf32>
    %55 = vector.multi_reduction <add>, %54, %cst_24 [2] : vector<2x8x8xf32> to vector<2x8xf32>
    %56 = vector.shape_cast %55 : vector<2x8xf32> to vector<2x8x1xf32>
    %57 = tpu.reciprocal %56 {approx = true} : vector<2x8x1xf32> -> vector<2x8x1xf32>
    %58 = vector.broadcast %57 : vector<2x8x1xf32> to vector<2x8x8xf32>
    %59 = arith.mulf %54, %58 : vector<2x8x8xf32>
    %60 = arith.truncf %59 : vector<2x8x8xf32> to vector<2x8x8xbf16>
    "tpu.trace_start"() <{level = 10 : i32, message = "bqk,bkd->bqd"}> : () -> ()
    %cst_25 = arith.constant dense<0.000000e+00> : vector<2x8x32xf32>
    %61 = tpu.matmul %60, %48, %cst_25 {dimension_numbers = #tpu.dot_dimension_numbers<[2], [1], [1], [2], [0, 0, 0, 1, 1, 2], [0], [0]>} : vector<2x8x8xbf16>, vector<2x8x32xbf16>, vector<2x8x32xf32> -> vector<2x8x32xf32>
    "tpu.trace_stop"() : () -> ()
    %62 = vector.shape_cast %61 : vector<2x8x32xf32> to vector<16x32xf32>
    %63 = arith.truncf %62 : vector<16x32xf32> to vector<16x32xbf16>
    %c0_26 = arith.constant 0 : index
    %c32 = arith.constant 32 : index
    %64 = vector.load %arg17[%c0_26, %c32] : memref<16x128xbf16, #tpu.memory_space<vmem>>, vector<16x32xbf16>
    tpu.vector_store %arg17[%c0_26, %c32], %63 {strides = array<i32>} : memref<16x128xbf16, #tpu.memory_space<vmem>>, vector<16x32xbf16>,
    %65 = vector.extract_strided_slice %8 {offsets = [0, 64], sizes = [16, 32], strides = [1, 1]} : vector<16x128xbf16> to vector<16x32xbf16>
    %66 = vector.shape_cast %65 : vector<16x32xbf16> to vector<2x8x32xbf16>
    %67 = vector.extract_strided_slice %14 {offsets = [0, 64], sizes = [16, 32], strides = [1, 1]} : vector<16x128xbf16> to vector<16x32xbf16>
    %68 = vector.shape_cast %67 : vector<16x32xbf16> to vector<2x8x32xbf16>
    %69 = vector.extract_strided_slice %20 {offsets = [0, 64], sizes = [16, 32], strides = [1, 1]} : vector<16x128xbf16> to vector<16x32xbf16>
    %70 = vector.shape_cast %69 : vector<16x32xbf16> to vector<2x8x32xbf16>
    "tpu.trace_start"() <{level = 10 : i32, message = "bqd,bkd->bqk"}> : () -> ()
    %cst_27 = arith.constant dense<0.000000e+00> : vector<2x8x8xf32>
    %71 = tpu.matmul %66, %68, %cst_27 {dimension_numbers = #tpu.dot_dimension_numbers<[2], [2], [1], [1], [0, 0, 0, 1, 1, 1], [0], [0]>} : vector<2x8x32xbf16>, vector<2x8x32xbf16>, vector<2x8x8xf32> -> vector<2x8x8xf32>
    "tpu.trace_stop"() : () -> ()
    %cst_28 = arith.constant dense<0xFF800000> : vector<2x8xf32>
    %72 = vector.multi_reduction <maximumf>, %71, %cst_28 [2] : vector<2x8x8xf32> to vector<2x8xf32>
    %73 = vector.shape_cast %72 : vector<2x8xf32> to vector<2x8x1xf32>
    %74 = vector.broadcast %73 : vector<2x8x1xf32> to vector<2x8x8xf32>
    %75 = arith.subf %71, %74 : vector<2x8x8xf32>
    %76 = math.exp %75 : vector<2x8x8xf32>
    %cst_29 = arith.constant dense<0.000000e+00> : vector<2x8xf32>
    %77 = vector.multi_reduction <add>, %76, %cst_29 [2] : vector<2x8x8xf32> to vector<2x8xf32>
    %78 = vector.shape_cast %77 : vector<2x8xf32> to vector<2x8x1xf32>
    %79 = tpu.reciprocal %78 {approx = true} : vector<2x8x1xf32> -> vector<2x8x1xf32>
    %80 = vector.broadcast %79 : vector<2x8x1xf32> to vector<2x8x8xf32>
    %81 = arith.mulf %76, %80 : vector<2x8x8xf32>
    %82 = arith.truncf %81 : vector<2x8x8xf32> to vector<2x8x8xbf16>
    "tpu.trace_start"() <{level = 10 : i32, message = "bqk,bkd->bqd"}> : () -> ()
    %cst_30 = arith.constant dense<0.000000e+00> : vector<2x8x32xf32>
    %83 = tpu.matmul %82, %70, %cst_30 {dimension_numbers = #tpu.dot_dimension_numbers<[2], [1], [1], [2], [0, 0, 0, 1, 1, 2], [0], [0]>} : vector<2x8x8xbf16>, vector<2x8x32xbf16>, vector<2x8x32xf32> -> vector<2x8x32xf32>
    "tpu.trace_stop"() : () -> ()
    %84 = vector.shape_cast %83 : vector<2x8x32xf32> to vector<16x32xf32>
    %85 = arith.truncf %84 : vector<16x32xf32> to vector<16x32xbf16>
    %c0_31 = arith.constant 0 : index
    %c64 = arith.constant 64 : index
    %86 = vector.load %arg17[%c0_31, %c64] : memref<16x128xbf16, #tpu.memory_space<vmem>>, vector<16x32xbf16>
    tpu.vector_store %arg17[%c0_31, %c64], %85 {strides = array<i32>} : memref<16x128xbf16, #tpu.memory_space<vmem>>, vector<16x32xbf16>,
    %87 = vector.extract_strided_slice %8 {offsets = [0, 96], sizes = [16, 32], strides = [1, 1]} : vector<16x128xbf16> to vector<16x32xbf16>
    %88 = vector.shape_cast %87 : vector<16x32xbf16> to vector<2x8x32xbf16>
    %89 = vector.extract_strided_slice %14 {offsets = [0, 96], sizes = [16, 32], strides = [1, 1]} : vector<16x128xbf16> to vector<16x32xbf16>
    %90 = vector.shape_cast %89 : vector<16x32xbf16> to vector<2x8x32xbf16>
    %91 = vector.extract_strided_slice %20 {offsets = [0, 96], sizes = [16, 32], strides = [1, 1]} : vector<16x128xbf16> to vector<16x32xbf16>
    %92 = vector.shape_cast %91 : vector<16x32xbf16> to vector<2x8x32xbf16>
    "tpu.trace_start"() <{level = 10 : i32, message = "bqd,bkd->bqk"}> : () -> ()
    %cst_32 = arith.constant dense<0.000000e+00> : vector<2x8x8xf32>
    %93 = tpu.matmul %88, %90, %cst_32 {dimension_numbers = #tpu.dot_dimension_numbers<[2], [2], [1], [1], [0, 0, 0, 1, 1, 1], [0], [0]>} : vector<2x8x32xbf16>, vector<2x8x32xbf16>, vector<2x8x8xf32> -> vector<2x8x8xf32>
    "tpu.trace_stop"() : () -> ()
    %cst_33 = arith.constant dense<0xFF800000> : vector<2x8xf32>
    %94 = vector.multi_reduction <maximumf>, %93, %cst_33 [2] : vector<2x8x8xf32> to vector<2x8xf32>
    %95 = vector.shape_cast %94 : vector<2x8xf32> to vector<2x8x1xf32>
    %96 = vector.broadcast %95 : vector<2x8x1xf32> to vector<2x8x8xf32>
    %97 = arith.subf %93, %96 : vector<2x8x8xf32>
    %98 = math.exp %97 : vector<2x8x8xf32>
    %cst_34 = arith.constant dense<0.000000e+00> : vector<2x8xf32>
    %99 = vector.multi_reduction <add>, %98, %cst_34 [2] : vector<2x8x8xf32> to vector<2x8xf32>
    %100 = vector.shape_cast %99 : vector<2x8xf32> to vector<2x8x1xf32>
    %101 = tpu.reciprocal %100 {approx = true} : vector<2x8x1xf32> -> vector<2x8x1xf32>
    %102 = vector.broadcast %101 : vector<2x8x1xf32> to vector<2x8x8xf32>
    %103 = arith.mulf %98, %102 : vector<2x8x8xf32>
    %104 = arith.truncf %103 : vector<2x8x8xf32> to vector<2x8x8xbf16>
    "tpu.trace_start"() <{level = 10 : i32, message = "bqk,bkd->bqd"}> : () -> ()
    %cst_35 = arith.constant dense<0.000000e+00> : vector<2x8x32xf32>
    %105 = tpu.matmul %104, %92, %cst_35 {dimension_numbers = #tpu.dot_dimension_numbers<[2], [1], [1], [2], [0, 0, 0, 1, 1, 2], [0], [0]>} : vector<2x8x8xbf16>, vector<2x8x32xbf16>, vector<2x8x32xf32> -> vector<2x8x32xf32>
    "tpu.trace_stop"() : () -> ()
    %106 = vector.shape_cast %105 : vector<2x8x32xf32> to vector<16x32xf32>
    %107 = arith.truncf %106 : vector<16x32xf32> to vector<16x32xbf16>
    %c0_36 = arith.constant 0 : index
    %c96 = arith.constant 96 : index
    %108 = vector.load %arg17[%c0_36, %c96] : memref<16x128xbf16, #tpu.memory_space<vmem>>, vector<16x32xbf16>
    tpu.vector_store %arg17[%c0_36, %c96], %107 {strides = array<i32>} : memref<16x128xbf16, #tpu.memory_space<vmem>>, vector<16x32xbf16>,
    %c0_37 = arith.constant 0 : index
    %c0_38 = arith.constant 0 : index
    %109 = vector.load %arg17[%c0_37, %c0_38] : memref<16x128xbf16, #tpu.memory_space<vmem>>, vector<16x128xbf16>
    %c0_39 = arith.constant 0 : index
    %c0_40 = arith.constant 0 : index
    %110 = vector.load %arg5[%c0_39, %c0_40] : memref<128x128xbf16, #tpu.memory_space<vmem>>, vector<128x128xbf16>
    %cst_41 = arith.constant dense<0.000000e+00> : vector<16x128xf32>
    %111 = tpu.matmul %109, %110, %cst_41 {dimension_numbers = #tpu.dot_dimension_numbers<[1], [0], [0], [1], [0, 0, 1, 1], [], []>} : vector<16x128xbf16>, vector<128x128xbf16>, vector<16x128xf32> -> vector<16x128xf32>
    %c0_42 = arith.constant 0 : index
    %c0_43 = arith.constant 0 : index
    %112 = vector.load %arg9[%c0_42, %c0_43] : memref<1x128xf32, #tpu.memory_space<vmem>>, vector<1x128xf32>
    %113 = vector.broadcast %112 : vector<1x128xf32> to vector<16x128xf32>
    %114 = arith.addf %111, %113 : vector<16x128xf32>
    %c0_44 = arith.constant 0 : index
    %c0_45 = arith.constant 0 : index
    %115 = vector.load %arg14[%c0_44, %c0_45] : memref<1x128xf32, #tpu.memory_space<vmem>>, vector<1x128xf32>
    %c0_46 = arith.constant 0 : index
    %c0_47 = arith.constant 0 : index
    %116 = vector.load %arg15[%c0_46, %c0_47] : memref<1x128xf32, #tpu.memory_space<vmem>>, vector<1x128xf32>
    %117 = arith.addf %1, %114 : vector<16x128xf32>
    %cst_48 = arith.constant dense<0.000000e+00> : vector<16xf32>
    %118 = vector.multi_reduction <add>, %117, %cst_48 [1] : vector<16x128xf32> to vector<16xf32>
    %119 = vector.shape_cast %118 : vector<16xf32> to vector<16x1xf32>
    %cst_49 = arith.constant 1.280000e+02 : f32
    %120 = vector.broadcast %cst_49 : f32 to vector<16x1xf32>
    %121 = arith.divf %119, %120 : vector<16x1xf32>
    %122 = vector.broadcast %121 : vector<16x1xf32> to vector<16x128xf32>
    %123 = arith.subf %117, %122 : vector<16x128xf32>
    %124 = arith.mulf %123, %123 : vector<16x128xf32>
    %cst_50 = arith.constant dense<0.000000e+00> : vector<16xf32>
    %125 = vector.multi_reduction <add>, %124, %cst_50 [1] : vector<16x128xf32> to vector<16xf32>
    %126 = vector.shape_cast %125 : vector<16xf32> to vector<16x1xf32>
    %cst_51 = arith.constant 1.280000e+02 : f32
    %127 = vector.broadcast %cst_51 : f32 to vector<16x1xf32>
    %128 = arith.divf %126, %127 : vector<16x1xf32>
    %129 = vector.broadcast %121 : vector<16x1xf32> to vector<16x128xf32>
    %130 = arith.subf %117, %129 : vector<16x128xf32>
    %cst_52 = arith.constant 9.99999974E-6 : f32
    %131 = vector.broadcast %cst_52 : f32 to vector<16x1xf32>
    %132 = arith.addf %128, %131 : vector<16x1xf32>
    %133 = math.rsqrt %132 : vector<16x1xf32>
    %134 = vector.broadcast %133 : vector<16x1xf32> to vector<16x128xf32>
    %135 = arith.mulf %130, %134 : vector<16x128xf32>
    %136 = vector.broadcast %115 : vector<1x128xf32> to vector<16x128xf32>
    %137 = arith.mulf %135, %136 : vector<16x128xf32>
    %138 = vector.broadcast %116 : vector<1x128xf32> to vector<16x128xf32>
    %139 = arith.addf %137, %138 : vector<16x128xf32>
    %140 = arith.truncf %139 : vector<16x128xf32> to vector<16x128xbf16>
    %c0_53 = arith.constant 0 : index
    %c0_54 = arith.constant 0 : index
    %141 = vector.load %arg10[%c0_53, %c0_54] : memref<128x512xbf16, #tpu.memory_space<vmem>>, vector<128x512xbf16>
    %cst_55 = arith.constant dense<0.000000e+00> : vector<16x512xf32>
    %142 = tpu.matmul %140, %141, %cst_55 {dimension_numbers = #tpu.dot_dimension_numbers<[1], [0], [0], [1], [0, 0, 1, 1], [], []>} : vector<16x128xbf16>, vector<128x512xbf16>, vector<16x512xf32> -> vector<16x512xf32>
    %c0_56 = arith.constant 0 : index
    %c0_57 = arith.constant 0 : index
    %143 = vector.load %arg11[%c0_56, %c0_57] : memref<1x512xf32, #tpu.memory_space<vmem>>, vector<1x512xf32>
    %144 = vector.broadcast %143 : vector<1x512xf32> to vector<16x512xf32>
    %145 = arith.addf %142, %144 : vector<16x512xf32>
    %cst_58 = arith.constant 5.000000e-01 : f32
    %146 = vector.broadcast %cst_58 : f32 to vector<16x512xf32>
    %147 = arith.mulf %146, %145 : vector<16x512xf32>
    %cst_59 = arith.constant 0.707106769 : f32
    %148 = vector.broadcast %cst_59 : f32 to vector<16x512xf32>
    %149 = arith.mulf %145, %148 : vector<16x512xf32>
    %150 = math.erf %149 : vector<16x512xf32>
    %cst_60 = arith.constant 1.000000e+00 : f32
    %151 = vector.broadcast %cst_60 : f32 to vector<16x512xf32>
    %152 = arith.addf %151, %150 : vector<16x512xf32>
    %153 = arith.mulf %147, %152 : vector<16x512xf32>
    %154 = arith.truncf %153 : vector<16x512xf32> to vector<16x512xbf16>
    %c0_61 = arith.constant 0 : index
    %c0_62 = arith.constant 0 : index
    %155 = vector.load %arg12[%c0_61, %c0_62] : memref<512x128xbf16, #tpu.memory_space<vmem>>, vector<512x128xbf16>
    %cst_63 = arith.constant dense<0.000000e+00> : vector<16x128xf32>
    %156 = tpu.matmul %154, %155, %cst_63 {dimension_numbers = #tpu.dot_dimension_numbers<[1], [0], [0], [1], [0, 0, 1, 1], [], []>} : vector<16x512xbf16>, vector<512x128xbf16>, vector<16x128xf32> -> vector<16x128xf32>
    %c0_64 = arith.constant 0 : index
    %c0_65 = arith.constant 0 : index
    %157 = vector.load %arg13[%c0_64, %c0_65] : memref<1x128xf32, #tpu.memory_space<vmem>>, vector<1x128xf32>
    %158 = vector.broadcast %157 : vector<1x128xf32> to vector<16x128xf32>
    %159 = arith.addf %156, %158 : vector<16x128xf32>
    %160 = arith.addf %159, %139 : vector<16x128xf32>
    %cst_66 = arith.constant dense<0.000000e+00> : vector<16xf32>
    %161 = vector.multi_reduction <add>, %160, %cst_66 [1] : vector<16x128xf32> to vector<16xf32>
    %162 = vector.shape_cast %161 : vector<16xf32> to vector<16x1xf32>
    %cst_67 = arith.constant 1.280000e+02 : f32
    %163 = vector.broadcast %cst_67 : f32 to vector<16x1xf32>
    %164 = arith.divf %162, %163 : vector<16x1xf32>
    %165 = vector.broadcast %164 : vector<16x1xf32> to vector<16x128xf32>
    %166 = arith.subf %160, %165 : vector<16x128xf32>
    %167 = arith.mulf %166, %166 : vector<16x128xf32>
    %cst_68 = arith.constant dense<0.000000e+00> : vector<16xf32>
    %168 = vector.multi_reduction <add>, %167, %cst_68 [1] : vector<16x128xf32> to vector<16xf32>
    %169 = vector.shape_cast %168 : vector<16xf32> to vector<16x1xf32>
    %cst_69 = arith.constant 1.280000e+02 : f32
    %170 = vector.broadcast %cst_69 : f32 to vector<16x1xf32>
    %171 = arith.divf %169, %170 : vector<16x1xf32>
    %172 = vector.broadcast %164 : vector<16x1xf32> to vector<16x128xf32>
    %173 = arith.subf %160, %172 : vector<16x128xf32>
    %cst_70 = arith.constant 9.99999974E-6 : f32
    %174 = vector.broadcast %cst_70 : f32 to vector<16x1xf32>
    %175 = arith.addf %171, %174 : vector<16x1xf32>
    %176 = math.rsqrt %175 : vector<16x1xf32>
    %177 = vector.broadcast %176 : vector<16x1xf32> to vector<16x128xf32>
    %178 = arith.mulf %173, %177 : vector<16x128xf32>
    %179 = vector.broadcast %115 : vector<1x128xf32> to vector<16x128xf32>
    %180 = arith.mulf %178, %179 : vector<16x128xf32>
    %181 = vector.broadcast %116 : vector<1x128xf32> to vector<16x128xf32>
    %182 = arith.addf %180, %181 : vector<16x128xf32>
    %183 = vector.shape_cast %182 : vector<16x128xf32> to vector<2x8x128xf32>
    %c0_71 = arith.constant 0 : index
    %c0_72 = arith.constant 0 : index
    %c0_73 = arith.constant 0 : index
    %184 = vector.load %arg16[%c0_71, %c0_72, %c0_73] : memref<2x8x128xf32, #tpu.memory_space<vmem>>, vector<2x8x128xf32>
    tpu.vector_store %arg16[%c0_71, %c0_72, %c0_73], %183 {strides = array<i32>} : memref<2x8x128xf32, #tpu.memory_space<vmem>>, vector<2x8x128xf32>,
    return
  }
  func.func @transform_0(%arg0: i32) -> (i32, i32, i32) {
    %c0_i32 = arith.constant 0 : i32
    %c0_i32_0 = arith.constant 0 : i32
    %c0_i32_1 = arith.constant 0 : i32
    return %arg0, %c0_i32, %c0_i32_0 : i32, i32, i32
  }
  func.func @transform_1(%arg0: i32) -> (i32, i32) {
    %c0_i32 = arith.constant 0 : i32
    %c0_i32_0 = arith.constant 0 : i32
    %c0_i32_1 = arith.constant 0 : i32
    return %c0_i32, %c0_i32_0 : i32, i32
  }
  func.func @transform_2(%arg0: i32) -> (i32, i32) {
    %c0_i32 = arith.constant 0 : i32
    %c0_i32_0 = arith.constant 0 : i32
    %c0_i32_1 = arith.constant 0 : i32
    return %c0_i32, %c0_i32_0 : i32, i32
  }
  func.func @transform_3(%arg0: i32) -> (i32, i32) {
    %c0_i32 = arith.constant 0 : i32
    %c0_i32_0 = arith.constant 0 : i32
    %c0_i32_1 = arith.constant 0 : i32
    return %c0_i32, %c0_i32_0 : i32, i32
  }
  func.func @transform_4(%arg0: i32) -> (i32, i32) {
    %c0_i32 = arith.constant 0 : i32
    %c0_i32_0 = arith.constant 0 : i32
    %c0_i32_1 = arith.constant 0 : i32
    return %c0_i32, %c0_i32_0 : i32, i32
  }
  func.func @transform_5(%arg0: i32) -> (i32, i32) {
    %c0_i32 = arith.constant 0 : i32
    %c0_i32_0 = arith.constant 0 : i32
    %c0_i32_1 = arith.constant 0 : i32
    return %c0_i32, %c0_i32_0 : i32, i32
  }
  func.func @transform_6(%arg0: i32) -> (i32, i32) {
    %c0_i32 = arith.constant 0 : i32
    %c0_i32_0 = arith.constant 0 : i32
    %c0_i32_1 = arith.constant 0 : i32
    return %c0_i32, %c0_i32_0 : i32, i32
  }
  func.func @transform_7(%arg0: i32) -> (i32, i32) {
    %c0_i32 = arith.constant 0 : i32
    %c0_i32_0 = arith.constant 0 : i32
    %c0_i32_1 = arith.constant 0 : i32
    return %c0_i32, %c0_i32_0 : i32, i32
  }
  func.func @transform_8(%arg0: i32) -> (i32, i32) {
    %c0_i32 = arith.constant 0 : i32
    %c0_i32_0 = arith.constant 0 : i32
    %c0_i32_1 = arith.constant 0 : i32
    return %c0_i32, %c0_i32_0 : i32, i32
  }
  func.func @transform_9(%arg0: i32) -> (i32, i32) {
    %c0_i32 = arith.constant 0 : i32
    %c0_i32_0 = arith.constant 0 : i32
    %c0_i32_1 = arith.constant 0 : i32
    return %c0_i32, %c0_i32_0 : i32, i32
  }
  func.func @transform_10(%arg0: i32) -> (i32, i32) {
    %c0_i32 = arith.constant 0 : i32
    %c0_i32_0 = arith.constant 0 : i32
    %c0_i32_1 = arith.constant 0 : i32
    return %c0_i32, %c0_i32_0 : i32, i32
  }
  func.func @transform_11(%arg0: i32) -> (i32, i32) {
    %c0_i32 = arith.constant 0 : i32
    %c0_i32_0 = arith.constant 0 : i32
    %c0_i32_1 = arith.constant 0 : i32
    return %c0_i32, %c0_i32_0 : i32, i32
  }
  func.func @transform_12(%arg0: i32) -> (i32, i32) {
    %c0_i32 = arith.constant 0 : i32
    %c0_i32_0 = arith.constant 0 : i32
    %c0_i32_1 = arith.constant 0 : i32
    return %c0_i32, %c0_i32_0 : i32, i32
  }
  func.func @transform_13(%arg0: i32) -> (i32, i32) {
    %c0_i32 = arith.constant 0 : i32
    %c0_i32_0 = arith.constant 0 : i32
    %c0_i32_1 = arith.constant 0 : i32
    return %c0_i32, %c0_i32_0 : i32, i32
  }
  func.func @transform_14(%arg0: i32) -> (i32, i32) {
    %c0_i32 = arith.constant 0 : i32
    %c0_i32_0 = arith.constant 0 : i32
    %c0_i32_1 = arith.constant 0 : i32
    return %c0_i32, %c0_i32_0 : i32, i32
  }
  func.func @transform_15(%arg0: i32) -> (i32, i32, i32) {
    %c0_i32 = arith.constant 0 : i32
    %c0_i32_0 = arith.constant 0 : i32
    %c0_i32_1 = arith.constant 0 : i32
    return %arg0, %c0_i32, %c0_i32_0 : i32, i32, i32
  }
}

</mosaic_0001>

<bundles_post_ra>
// kernel: tpu_custom_call.1
= control target key start
LH: loop header
LB: loop body
LE: loop exit
PB: predicated region body
PF: predicated region fallthrough
CT: control target
= control target key end

     0   :  { %20 = vsyncpa [#allocation4], 0  ;;  %s3584_s0 = inlined_call_operand.hbm [shape: f32[2,8,128], index: 0, kind: input, shape index: {}]   ;;  %s3585_s1 = inlined_call_operand.hbm [shape: bf16[128,128], index: 1, kind: input, shape index: {}]   ;;  %s3586_s2 = inlined_call_operand.hbm [shape: bf16[128,128], index: 2, kind: input, shape index: {}]   ;;  %s3587_s3 = inlined_call_operand.hbm [shape: bf16[128,128], index: 3, kind: input, shape index: {}]   ;;  %s3588_s4 = inlined_call_operand.hbm [shape: bf16[128,128], index: 4, kind: input, shape index: {}]   ;;  %s3589_s5 = inlined_call_operand.vmem [shape: f32[1,128], index: 5, kind: input, shape index: {}]   ;;  %s3590_s6 = inlined_call_operand.vmem [shape: f32[1,128], index: 6, kind: input, shape index: {}]   ;;  %s3591_s7 = inlined_call_operand.vmem [shape: f32[1,128], index: 7, kind: input, shape index: {}]   ;;  %s3592_s8 = inlined_call_operand.hbm [shape: f32[1,128], index: 8, kind: input, shape index: {}]   ;;  %s3593_s9 = inlined_call_operand.hbm [shape: bf16[128,512], index: 9, kind: input, shape index: {}]   ;;  %s3594_s10 = inlined_call_operand.vmem [shape: f32[1,512], index: 10, kind: input, shape index: {}]   ;;  %s3595_s11 = inlined_call_operand.hbm [shape: bf16[512,128], index: 11, kind: input, shape index: {}]   ;;  %s3596_s12 = inlined_call_operand.vmem [shape: f32[1,128], index: 12, kind: input, shape index: {}]   ;;  %s3597_s13 = inlined_call_operand.vmem [shape: f32[1,128], index: 13, kind: input, shape index: {}]   ;;  %s3598_s14 = inlined_call_operand.vmem [shape: f32[1,128], index: 14, kind: input, shape index: {}]   ;;  %s3599_s15 = inlined_call_operand.hbm [shape: f32[2,8,128], index: 15, kind: output, shape index: {}]  }
   0x1   :  { %21 = vsyncpa [#allocation7], 0 }
   0x2   :  { %22 = vsyncpa [#allocation10], 0 }
   0x3   :  { %23 = vsyncpa [#allocation13], 0 }
   0x4   :  { %24 = vsyncpa [#allocation16], 0  ;;  %s43_s20 = sshll.u32 %s3585_s1, 4  ;;  %s44_s20 = int_to_ptr.hbm [resolvable:$true] %s43_s20 }
   0x5   :  { %25 = vsyncpa [#allocation5], 0  ;;  %s2906_s21 = smov [#allocation6]   ;;  %s69_s25 = sshll.u32 %s3587_s3, 4  ;;  %s70_s25 = int_to_ptr.hbm [resolvable:$true] %s69_s25 }
   0x6   :  { %s45_s22 = sshll.u32 %s2906_s21, 4  ;;  %s2907_s26 = smov 64   ;;  %s46_s22 = int_to_ptr.vmem [resolvable:$true] %s45_s22 }
   0x7   :  { %s2908_s27 = smov 4   ;;  %s2909_s28 = smov [#allocation9]  }
   0x8   :  { %51 = dma.hbm_to_vmem [thread:$0]  %s44_s20, 1024, %s46_s22, [#allocation7], %s2907_s26, %s2907_s26, %s2908_s27  }
   0x9   :  { %s71_s29 = sshll.u32 %s2909_s28, 4  ;;  %s102_s16 = sshll.u32 %s3592_s8, 4  ;;  %s72_s29 = int_to_ptr.vmem [resolvable:$true] %s71_s29  ;;  %s103_s16 = int_to_ptr.hbm [resolvable:$true] %s102_s16 }
   0xa   :  { %77 = dma.hbm_to_vmem [thread:$0]  %s70_s25, 1024, %s72_s29, [#allocation10], %s2907_s26, %s2907_s26, %s2908_s27  }
   0xb   :  { %s30_s18 = sshll.u32 %s3584_s0, 4  ;;  %s2910_s19 = smov [#allocation12]   ;;  %s31_s18 = int_to_ptr.hbm [resolvable:$true] %s30_s18 }
   0xc   :  { %s104_s21 = sshll.u32 %s2910_s19, 4  ;;  %s2911_s20 = smov [#allocation3]   ;;  %s105_s21 = int_to_ptr.vmem [resolvable:$true] %s104_s21 }
   0xd   :  { %107 = dma.hbm_to_vmem [thread:$0]  %s103_s16, 16, %s105_s21, [#allocation13]  }
   0xe   :  { %s32_s22 = sshll.u32 %s2911_s20, 4  ;;  %s2912_s23 = smov 128   ;;  %s33_s22 = int_to_ptr.vmem [resolvable:$true] %s32_s22 }
   0xf   :  { %s2913_s8 = smov 8   ;;  %s56_s28 = sshll.u32 %s3586_s2, 4  ;;  %s57_s28 = int_to_ptr.hbm [resolvable:$true] %s56_s28 }
  0x10   :  { %38 = dma.hbm_to_vmem [thread:$0]  %s31_s18, 256, %s33_s22, [#allocation4], %s2912_s23, %s2912_s23, %s2913_s8  }
  0x11   :  { %s2914_s0 = smov [#allocation8]   ;;  %s82_s16 = sshll.u32 %s3588_s4, 4  ;;  %s83_s16 = int_to_ptr.hbm [resolvable:$true] %s82_s16 }
  0x12   :  { %s58_s29 = sshll.u32 %s2914_s0, 4  ;;  %s2915_s3 = smov [#allocation11]   ;;  %s59_s29 = int_to_ptr.vmem [resolvable:$true] %s58_s29 }
  0x13   :  { %64 = dma.hbm_to_vmem [thread:$0]  %s57_s28, 1024, %s59_s29, [#allocation7], %s2907_s26, %s2907_s26, %s2908_s27  }
  0x14   :  { %s84_s17 = sshll.u32 %s2915_s3, 4  ;;  %s112_s21 = sshll.u32 %s3593_s9, 4  ;;  %s85_s17 = int_to_ptr.vmem [resolvable:$true] %s84_s17  ;;  %s113_s21 = int_to_ptr.hbm [resolvable:$true] %s112_s21 }
  0x15   :  { %90 = dma.hbm_to_vmem [thread:$0]  %s83_s16, 1024, %s85_s17, [#allocation10], %s2907_s26, %s2907_s26, %s2908_s27  }
  0x16   :  { %s2916_s2 = smov [#allocation14]   ;;  %s127_s24 = sshll.u32 %s3595_s11, 4  ;;  %s128_s24 = int_to_ptr.hbm [resolvable:$true] %s127_s24 }
  0x17   :  { %s114_s20 = sshll.u32 %s2916_s2, 4  ;;  %s2917_s25 = smov 256   ;;  %s115_s20 = int_to_ptr.vmem [resolvable:$true] %s114_s20 }
  0x18   :  { %s2918_s28 = smov 16   ;;  %s2919_s0 = smov [#allocation15]  }
  0x19   :  { %120 = dma.hbm_to_vmem [thread:$0]  %s113_s21, 4096, %s115_s20, [#allocation13], %s2917_s25, %s2917_s25, %s2918_s28  }
  0x1a   :  { %s129_s29 = sshll.u32 %s2919_s0, 4  ;;  %s130_s29 = int_to_ptr.vmem [resolvable:$true] %s129_s29 }
  0x1b   :  { %135 = dma.hbm_to_vmem [thread:$0]  %s128_s24, 4096, %s130_s29, [#allocation16], %s2907_s26, %s2907_s26, %s2908_s27  }
  0x1c   :  { %2894 = dma.done.wait [#allocation4], 256  }
  0x1d   :  { %2895 = vsyncadd [#allocation4], 4294967040 }
  0x1e   :  { %2896 = dma.done.wait [#allocation7], 2048  }
  0x1f   :  { %2897 = vsyncadd [#allocation7], 4294965248 }
  0x20   :  { %2898 = dma.done.wait [#allocation10], 2048  }
  0x21   :  { %2899 = vsyncadd [#allocation10], 4294965248 }
  0x22   :  { %2900 = dma.done.wait [#allocation13], 4112  }
  0x23   :  { %2901 = vsyncadd [#allocation13], 4294963184 }
  0x24   :  { %2902 = dma.done.wait [#allocation16], 4096  }
  0x25   :  { %2903 = vsyncadd [#allocation16], 4294963200  ;;  %v2503_v0 = vld [vmem:[#allocation6 + $0x38] sm:$0xff]  ;;  %v2502_v2 = vld [vmem:[#allocation6 + $0x30] sm:$0xff]  ;;  %vm430_vm0 = vcmask 261120   ;;  %vm469_vm1 = vcmask 64512  }
  0x26   :  { %v2511_v1 = vld [vmem:[#allocation8 + $0x38] sm:$0xff]  ;;  %246 = vmatpush.bf16.msra.mxu0 %v2503_v0  ;;  %v2510_v3 = vld [vmem:[#allocation8 + $0x30] sm:$0xff]  ;;  %v2501_v4 = vld [vmem:[#allocation6 + $0x28] sm:$0xff]  ;;  %vm497_vm2 = vcmask 1043456   ;;  %vm535_vm3 = vcmask 257024   ;;  %vm678_vm4 = vcmask 519424  }
  0x27   :  { %330 = vmatpush.bf16.msra.mxu1 %v2511_v1  ;;  %v2509_v5 = vld [vmem:[#allocation8 + $0x28] sm:$0xff]  ;;  %v2500_v6 = vld [vmem:[#allocation6 + $0x20] sm:$0xff]  ;;  %v2499_v8 = vld [vmem:[#allocation6 + $0x18] sm:$0xff]  ;;  %vm803_vm5 = vcmask 781824   ;;  %vm928_vm6 = vcmask 1044224   ;;  %s2923_s20 = smov [#allocation17]  }
  0x28   :  { %v2508_v7 = vld [vmem:[#allocation8 + $0x20] sm:$0xff]  ;;  %v2507_v9 = vld [vmem:[#allocation8 + $0x18] sm:$0xff]  ;;  %v2498_v10 = vld [vmem:[#allocation6 + $0x10] sm:$0xff]  ;;  %s2065_s4 = sshll.u32 %s2923_s20, 4  ;;  %s2067_s25 = sshll.u32 %s3599_s15, 4  ;;  %s2066_s4 = int_to_ptr.vmem [resolvable:$true] %s2065_s4  ;;  %s2068_s25 = int_to_ptr.hbm [resolvable:$true] %s2067_s25 }
  0x29   :  { %v2506_v11 = vld [vmem:[#allocation8 + $0x10] sm:$0xff]  ;;  %v2497_v12 = vld [vmem:[#allocation6 + $0x8] sm:$0xff]  ;;  %v2496_v14 = vld [vmem:[#allocation6] sm:$0xff] }
  0x2a   :  { %247 = vmatpush.bf16.msra.mxu0 %v2502_v2  ;;  %v2505_v13 = vld [vmem:[#allocation8 + $0x8] sm:$0xff]  ;;  %v2504_v15 = vld [vmem:[#allocation8] sm:$0xff]  ;;  %v3046_v16 = vld [vmem:[#allocation3] sm:$0xff] }
  0x2b   :  { %331 = vmatpush.bf16.msra.mxu1 %v2510_v3  ;;  %v3048_v17 = vld [vmem:[#allocation3 + $0x8] sm:$0xff]  ;;  %v2612_v19 = vld [vmem:[%s3590_s6] ss:$0 sm:$0xff]  ;;  %s2920_s6 = smov 96   ;;  %v2518_v37 = vld [vmem:[#allocation9 + $0x30] sm:$0xff] }
  0x2c   :  { %v3052_v18 = vpack.c.bf16 %v3048_v17, %v3046_v16  ;;  %v2611_v20 = vld [vmem:[%s3589_s5] ss:$0 sm:$0xff]  ;;  %v2519_v33 = vld [vmem:[#allocation9 + $0x38] sm:$0xff]  ;;  %v2516_v45 = vld [vmem:[#allocation9 + $0x20] sm:$0xff]  ;;  %s2921_s5 = smov 32  }
  0x2d   :  { %414 = vmatpush.bf16.msra.mxu2 %v2519_v33  ;;  %v2517_v43 = vld [vmem:[#allocation9 + $0x28] sm:$0xff]  ;;  %v2515_v47 = vld [vmem:[#allocation9 + $0x18] sm:$0xff]  ;;  %v2514_v48 = vld [vmem:[#allocation9 + $0x10] sm:$0xff] }
  0x2e   :  { %248 = vmatpush.bf16.msra.mxu0 %v2501_v4  ;;  %v2513_v49 = vld [vmem:[#allocation9 + $0x8] sm:$0xff]  ;;  %v2512_v50 = vld [vmem:[#allocation9] sm:$0xff] }
  0x2f   :  { %332 = vmatpush.bf16.msra.mxu1 %v2509_v5 }
  0x31   :  { %415 = vmatpush.bf16.msra.mxu2 %v2518_v37 }
  0x32   :  { %249 = vmatpush.bf16.msra.mxu0 %v2500_v6 }
  0x33   :  { %333 = vmatpush.bf16.msra.mxu1 %v2508_v7 }
  0x35   :  { %416 = vmatpush.bf16.msra.mxu2 %v2517_v43 }
  0x36   :  { %250 = vmatpush.bf16.msra.mxu0 %v2499_v8 }
  0x37   :  { %334 = vmatpush.bf16.msra.mxu1 %v2507_v9 }
  0x39   :  { %417 = vmatpush.bf16.msra.mxu2 %v2516_v45 }
  0x3a   :  { %251 = vmatpush.bf16.msra.mxu0 %v2498_v10 }
  0x3b   :  { %335 = vmatpush.bf16.msra.mxu1 %v2506_v11  ;;  %v2613_v11 = vld [vmem:[%s3591_s7] ss:$0 sm:$0xff] }
  0x3d   :  { %418 = vmatpush.bf16.msra.mxu2 %v2515_v47 }
  0x3e   :  { %252 = vmatpush.bf16.msra.mxu0 %v2497_v12 }
  0x3f   :  { %336 = vmatpush.bf16.msra.mxu1 %v2505_v13 }
  0x41   :  { %419 = vmatpush.bf16.msra.mxu2 %v2514_v48 }
  0x42   :  { %253 = vmatpush.bf16.msra.mxu0 %v2496_v14 }
  0x43   :  { %337 = vmatpush.bf16.msra.mxu1 %v2504_v15 }
  0x45   :  { %254 = vmatmul.bf16.vlgmr.msra.gmra.mxu0 %v3052_v18  ;;  %420 = vmatpush.bf16.msra.mxu2 %v2513_v49 }
  0x46   :  { %338 = vmatmul.bf16.vlgmr.msra.gmra.mxu1 %v3052_v18 }
  0x49   :  { %421 = vmatpush.bf16.msra.mxu2 %v2512_v50 }
  0x4c   :  { %422 = vmatmul.bf16.vlgmr.msra.gmra.mxu2 %v3052_v18 }
  0xc2   :  { %v255_v21 = vpop.f32.mrf.mxu0 }
  0xc3   :  { %v339_v22 = vpop.f32.mrf.mxu1  ;;  %v256_v24 = vadd.f32 %v2611_v20, %v255_v21 }
  0xc4   :  { %v340_v23 = vadd.f32 %v2612_v19, %v339_v22 }
  0xc5   :  { %v260_v28 = vpack.c.bf16 %v256_v24, %v256_v24 }
  0xc6   :  { %v344_v25 = vpack.c.bf16 %v340_v23, %v340_v23 }
  0xc7   :  { %v539_v34 = vunpack.c.l.b16 %v260_v28 }
  0xc8   :  { %v544_v26 = vunpack.c.l.b16 %v344_v25  ;;  %v435_v27 = vsel %vm430_vm0, %v344_v25, 0 }
  0xc9   :  { %444 = vmatpush.bf16.xpose.msra.mxu3 %v435_v27  ;;  %v540_v40 = vpack.c.b16 %v539_v34, %v539_v34 }
  0xca   :  { %v545_v29 = vpack.c.b16 %v544_v26, %v544_v26  ;;  %v257_v30 = vpop.f32.mrf.mxu0 }
  0xcb   :  { %v341_v31 = vpop.f32.mrf.mxu1  ;;  %v258_v35 = vadd.f32 %v2611_v20, %v257_v30 }
  0xcc   :  { %v342_v32 = vadd.f32 %v2612_v19, %v341_v31  ;;  %683 = vrot.lane.b32.xlu2 %v545_v29, %s2907_s26  ;;  %546 = vrot.lane.b32.xlu0 %v545_v29, %s2920_s6 }
  0xcd   :  { %v261_v41 = vpack.c.bf16 %v258_v35, %v258_v35 }
  0xce   :  { %v345_v36 = vpack.c.bf16 %v342_v32, %v342_v32 }
  0xcf   :  { %v568_v44 = vunpack.c.l.b16 %v261_v41  ;;  %v423_v12 = vpop.f32.mrf.mxu2 }
  0xd0   :  { %v573_v38 = vunpack.c.l.b16 %v345_v36  ;;  %2180 = vmatmul.msk.bf16.vlgmr.msra.gmra.mxu3 %vm430_vm0, %v260_v28  ;;  %v454_v39 = vsel %vm430_vm0, %v345_v36, 0  ;;  %v424_v13 = vadd.f32 %v2613_v11, %v423_v12 }
  0xd1   :  { %463 = vmatpush.bf16.xpose.msrb.mxu3 %v454_v39  ;;  %v569_v46 = vpack.c.b16 %v568_v44, %v568_v44 }
  0xd2   :  { %v574_v42 = vpack.c.b16 %v573_v38, %v573_v38  ;;  %v428_v14 = vpack.c.bf16 %v424_v13, %v424_v13 }
  0xd4   :  { %575 = vrot.lane.b32.xlu1 %v574_v42, %s2920_s6  ;;  %706 = vrot.lane.b32.xlu2 %v574_v42, %s2907_s26  ;;  %v499_v15 = vsel %vm497_vm2, %v428_v14, 0  ;;  %v621_v18 = vunpack.c.l.b16 %v428_v14 }
  0xd5   :  { %541 = vrot.lane.b32.xlu0 %v540_v40, %s2920_s6 }
  0xd6   :  { %v3097_v19 = vpack.c.b16 %v621_v18, %v621_v18 }
  0xd7   :  { %v425_v20 = vpop.f32.mrf.mxu2 }
  0xd8   :  { %v426_v21 = vadd.f32 %v2613_v11, %v425_v20 }
  0xd9   :  { %508 = vmatpush.bf16.msra.mxu3 %v499_v15 }
  0xda   :  { %v429_v22 = vpack.c.bf16 %v426_v21, %v426_v21 }
  0xdc   :  { %808 = vrot.lane.b32.xlu2 %v545_v29, %s2921_s5  ;;  %570 = vrot.lane.b32.xlu1 %v569_v46, %s2920_s6  ;;  %v518_v23 = vsel %vm497_vm2, %v429_v22, 0  ;;  %v645_v43 = vunpack.c.l.b16 %v429_v22 }
  0xdd   :  { %681 = vrot.lane.b32.xlu0 %v540_v40, %s2907_s26  ;;  %527 = vmatpush.bf16.msrb.mxu0 %v518_v23 }
  0xe0   :  { %2181 = vmatmul.msk.bf16.vlgmr.msrb.gmra.mxu3 %vm430_vm0, %v261_v41 }
  0xe4   :  { %829 = vrot.lane.b32.xlu2 %v569_v46, %s2921_s5  ;;  %704 = vrot.lane.b32.xlu1 %v569_v46, %s2907_s26  ;;  %v3107_v46 = vpack.c.b16 %v645_v43, %v645_v43 }
  0xe5   :  { %831 = vrot.lane.b32.xlu0 %v574_v42, %s2921_s5 }
  0xec   :  { %806 = vrot.lane.b32.xlu1 %v540_v40, %s2921_s5 }
 0x126   :  { %v684_v51 = vpop.permute.xlu2 %683 }
 0x127   :  { %v689_v52 = vsel %vm430_vm0, %v684_v51, 0 }
 0x128   :  { %698 = vmatpush.bf16.xpose.msrb.mxu1 %v689_v52 }
 0x12e   :  { %v707_v53 = vpop.permute.xlu2 %706 }
 0x12f   :  { %v712_v61 = vsel %vm430_vm0, %v707_v53, 0 }
 0x136   :  { %v809_v54 = vpop.permute.xlu2 %808 }
 0x137   :  { %v814_v55 = vsel %vm430_vm0, %v809_v54, 0 }
 0x138   :  { %823 = vmatpush.bf16.xpose.msra.mxu1 %v814_v55 }
 0x13e   :  { %v547_v56 = vpop.permute.xlu0 %546  ;;  %v830_v10 = vpop.permute.xlu2 %829 }
 0x13f   :  { %v552_v57 = vsel %vm430_vm0, %v547_v56, 0 }
 0x140   :  { %561 = vmatpush.bf16.xpose.msrb.mxu2 %v552_v57 }
 0x146   :  { %v576_v58 = vpop.permute.xlu1 %575 }
 0x147   :  { %v581_v59 = vsel %vm430_vm0, %v576_v58, 0  ;;  %v542_v60 = vpop.permute.xlu0 %541 }
 0x148   :  { %2184 = vmatmul.msk.bf16.vlgmr.msrb.gmra.mxu2 %vm430_vm0, %v542_v60 }
 0x149   :  { %590 = vmatpush.bf16.xpose.msra.mxu2 %v581_v59 }
 0x14e   :  { %v571_v62 = vpop.permute.xlu1 %570 }
 0x14f   :  { %v682_v63 = vpop.permute.xlu0 %681 }
 0x150   :  { %2188 = vmatmul.msk.bf16.vlgmr.msrb.gmra.mxu1 %vm430_vm0, %v682_v63 }
 0x151   :  { %721 = vmatpush.bf16.xpose.msrb.mxu2 %v712_v61 }
 0x153   :  { %v446_v0 = vpop.f32.mrf.mxu3 }
 0x154   :  { %v470_v1 = vsel %vm469_vm1, %v446_v0, -inf }
 0x155   :  { %471 = vmax.xlane.f32.xlu0 %v470_v1 }
 0x156   :  { %v705_v2 = vpop.permute.xlu1 %704 }
 0x157   :  { %v832_v3 = vpop.permute.xlu0 %831 }
 0x158   :  { %v837_v4 = vsel %vm430_vm0, %v832_v3, 0  ;;  %2185 = vmatmul.msk.bf16.vlgmr.msra.gmra.mxu2 %vm430_vm0, %v571_v62 }
 0x159   :  { %846 = vmatpush.bf16.xpose.msra.mxu2 %v837_v4 }
 0x15b   :  { %v448_v5 = vpop.f32.mrf.mxu3 }
 0x15e   :  { %v807_v6 = vpop.permute.xlu1 %806 }
 0x160   :  { %2192 = vmatmul.msk.bf16.vlgmr.msra.gmra.mxu1 %vm430_vm0, %v807_v6 }
 0x163   :  { %v465_v7 = vpop.f32.mrf.mxu3 }
 0x164   :  { %v473_v8 = vsel %vm469_vm1, %v465_v7, -inf }
 0x165   :  { %474 = vmax.xlane.f32.xlu1 %v473_v8 }
 0x168   :  { %2189 = vmatmul.msk.bf16.vlgmr.msrb.gmra.mxu2 %vm430_vm0, %v705_v2 }
 0x16b   :  { %v467_v9 = vpop.f32.mrf.mxu3 }
 0x178   :  { %2193 = vmatmul.msk.bf16.vlgmr.msra.gmra.mxu2 %vm430_vm0, %v830_v10 }
 0x17e   :  { %751 = vrot.lane.b32.xlu1 %v3097_v19, %s2907_s26 }
 0x1c8   :  { %v472_v24 = vpop.xlane.xlu0 %471 }
 0x1c9   :  { %v476_v25 = vsub.f32 %v446_v0, %v472_v24 }
 0x1cb   :  { %v478_v26 = vmul.f32 1.442695, %v476_v25  ;;  %v563_v27 = vpop.f32.mrf.mxu2 }
 0x1cc   :  { %v596_v28 = vsel %vm469_vm1, %v563_v27, -inf }
 0x1cd   :  { %2618 = vpow2.f32 %v478_v26  ;;  %597 = vmax.xlane.f32.xlu2 %v596_v28  ;;  %v700_v29 = vpop.f32.mrf.mxu1 }
 0x1ce   :  { %v727_v30 = vsel %vm469_vm1, %v700_v29, -inf }
 0x1cf   :  { %728 = vmax.xlane.f32.xlu0 %v727_v30 }
 0x1d3   :  { %v2619_v31 = vpop.eup %2618  ;;  %v565_v32 = vpop.f32.mrf.mxu2 }
 0x1d4   :  { %v482_v33 = vsel %vm469_vm1, %v2619_v31, 0.0 }
 0x1d5   :  { %v702_v34 = vpop.f32.mrf.mxu1 }
 0x1d7   :  { %483 = vadd.xlane.f32.xlu0 %v482_v33 }
 0x1d8   :  { %v475_v35 = vpop.xlane.xlu1 %474 }
 0x1d9   :  { %v477_v36 = vsub.f32 %v465_v7, %v475_v35 }
 0x1db   :  { %v592_v37 = vpop.f32.mrf.mxu2  ;;  %v480_v40 = vmul.f32 1.442695, %v477_v36 }
 0x1dc   :  { %v599_v38 = vsel %vm469_vm1, %v592_v37, -inf }
 0x1dd   :  { %600 = vmax.xlane.f32.xlu2 %v599_v38  ;;  %v825_v39 = vpop.f32.mrf.mxu1  ;;  %2620 = vpow2.f32 %v480_v40 }
 0x1de   :  { %v852_v42 = vsel %vm469_vm1, %v825_v39, -inf }
 0x1e3   :  { %v594_v41 = vpop.f32.mrf.mxu2  ;;  %v2621_v45 = vpop.eup %2620 }
 0x1e4   :  { %v485_v49 = vsel %vm469_vm1, %v2621_v45, 0.0 }
 0x1e5   :  { %853 = vmax.xlane.f32.xlu2 %v852_v42  ;;  %v827_v44 = vpop.f32.mrf.mxu1 }
 0x1eb   :  { %v723_v47 = vpop.f32.mrf.mxu2  ;;  %647 = vrot.lane.b32.xlu0 %v3107_v46, %s2920_s6 }
 0x1ec   :  { %v730_v48 = vsel %vm469_vm1, %v723_v47, -inf }
 0x1ed   :  { %731 = vmax.xlane.f32.xlu1 %v730_v48  ;;  %486 = vadd.xlane.f32.xlu2 %v485_v49 }
 0x1f0   :  { %v752_v7 = vpop.permute.xlu1 %751 }
 0x1f1   :  { %v757_v28 = vsel %vm497_vm2, %v752_v7, 0 }
 0x1f3   :  { %v725_v50 = vpop.f32.mrf.mxu2 }
 0x1fb   :  { %v3113_v51 = vpop.f32.mrf.mxu2 }
 0x1fc   :  { %v855_v52 = vsel %vm469_vm1, %v3113_v51, -inf }
 0x1fd   :  { %856 = vmax.xlane.f32.xlu1 %v855_v52 }
 0x203   :  { %v850_v53 = vpop.f32.mrf.mxu2 }
 0x205   :  { %623 = vrot.lane.b32.xlu2 %v3097_v19, %s2920_s6 }
 0x240   :  { %v598_v54 = vpop.xlane.xlu2 %597 }
 0x241   :  { %v602_v55 = vsub.f32 %v563_v27, %v598_v54 }
 0x242   :  { %v729_v56 = vpop.xlane.xlu0 %728 }
 0x243   :  { %v604_v57 = vmul.f32 1.442695, %v602_v55  ;;  %v733_v58 = vsub.f32 %v700_v29, %v729_v56 }
 0x245   :  { %2622 = vpow2.f32 %v604_v57  ;;  %v735_v59 = vmul.f32 1.442695, %v733_v58 }
 0x247   :  { %2624 = vpow2.f32 %v735_v59 }
 0x24a   :  { %v484_v60 = vpop.xlane.xlu0 %483 }
 0x24b   :  { %v2623_v61 = vpop.eup %2622  ;;  %2626 = vrcp.f32 %v484_v60 }
 0x24c   :  { %v608_v62 = vsel %vm469_vm1, %v2623_v61, 0.0 }
 0x24d   :  { %v3120_v63 = vpop.eup %2624  ;;  %609 = vadd.xlane.f32.xlu0 %v608_v62 }
 0x24e   :  { %v739_v0 = vsel %vm469_vm1, %v3120_v63, 0.0 }
 0x24f   :  { %740 = vadd.xlane.f32.xlu1 %v739_v0 }
 0x250   :  { %v601_v1 = vpop.xlane.xlu2 %600 }
 0x251   :  { %v2627_v2 = vpop.eup %2626  ;;  %v603_v3 = vsub.f32 %v592_v37, %v601_v1 }
 0x252   :  { %v490_v4 = vmul.f32 %v2627_v2, %v2619_v31 }
 0x253   :  { %v606_v5 = vmul.f32 1.442695, %v603_v3 }
 0x254   :  { %v492_v6 = vpack.c.bf16 %v490_v4, %v490_v4 }
 0x255   :  { %2628 = vpow2.f32 %v606_v5 }
 0x256   :  { %2182 = vmatmul.msk.bf16.vlgmr.msra.gmra.mxu3 %vm469_vm1, %v492_v6 }
 0x258   :  { %v854_v8 = vpop.xlane.xlu2 %853 }
 0x259   :  { %v858_v9 = vsub.f32 %v825_v39, %v854_v8 }
 0x25b   :  { %v2629_v10 = vpop.eup %2628  ;;  %v860_v11 = vmul.f32 1.442695, %v858_v9 }
 0x25c   :  { %v611_v12 = vsel %vm469_vm1, %v2629_v10, 0.0 }
 0x25d   :  { %2630 = vpow2.f32 %v860_v11  ;;  %v648_v13 = vpop.permute.xlu0 %647  ;;  %612 = vadd.xlane.f32.xlu1 %v611_v12 }
 0x25e   :  { %v653_v14 = vsel %vm497_vm2, %v648_v13, 0 }
 0x25f   :  { %662 = vmatpush.bf16.msra.mxu0 %v653_v14 }
 0x260   :  { %v487_v15 = vpop.xlane.xlu2 %486  ;;  %v732_v18 = vpop.xlane.xlu1 %731 }
 0x261   :  { %2632 = vrcp.f32 %v487_v15  ;;  %v734_v20 = vsub.f32 %v723_v47, %v732_v18  ;;  %772 = vrot.lane.b32.xlu0 %v3107_v46, %s2907_s26 }
 0x263   :  { %v3129_v21 = vpop.eup %2630  ;;  %v737_v22 = vmul.f32 1.442695, %v734_v20 }
 0x264   :  { %v864_v23 = vsel %vm469_vm1, %v3129_v21, 0.0 }
 0x265   :  { %2634 = vpow2.f32 %v737_v22  ;;  %865 = vadd.xlane.f32.xlu2 %v864_v23 }
 0x267   :  { %v2633_v24 = vpop.eup %2632 }
 0x268   :  { %v491_v25 = vmul.f32 %v2633_v24, %v2621_v45  ;;  %v624_v26 = vpop.permute.xlu2 %623 }
 0x269   :  { %v629_v27 = vsel %vm497_vm2, %v624_v26, 0 }
 0x26a   :  { %638 = vmatpush.bf16.msrb.mxu3 %v629_v27  ;;  %v493_v29 = vpack.c.bf16 %v491_v25, %v491_v25 }
 0x26b   :  { %v2635_v30 = vpop.eup %2634 }
 0x26c   :  { %2183 = vmatmul.msk.bf16.vlgmr.msrb.gmra.mxu0 %vm469_vm1, %v493_v29  ;;  %v742_v31 = vsel %vm469_vm1, %v2635_v30, 0.0 }
 0x26d   :  { %743 = vadd.xlane.f32.xlu1 %v742_v31  ;;  %v2527_v31 = vld [vmem:[#allocation11 + $0x30] sm:$0xff] }
 0x26e   :  { %766 = vmatpush.bf16.msra.mxu3 %v757_v28 }
 0x270   :  { %v857_v32 = vpop.xlane.xlu1 %856 }
 0x271   :  { %v859_v33 = vsub.f32 %v3113_v51, %v857_v32 }
 0x273   :  { %v862_v34 = vmul.f32 1.442695, %v859_v33  ;;  %v2526_v33 = vld [vmem:[#allocation11 + $0x28] sm:$0xff] }
 0x275   :  { %2636 = vpow2.f32 %v862_v34  ;;  %v2525_v34 = vld [vmem:[#allocation11 + $0x20] sm:$0xff] }
 0x27b   :  { %v2637_v35 = vpop.eup %2636 }
 0x27c   :  { %v867_v36 = vsel %vm469_vm1, %v2637_v35, 0.0 }
 0x286   :  { %876 = vrot.lane.b32.xlu1 %v3097_v19, %s2921_s5 }
 0x28b   :  { %868 = vadd.xlane.f32.xlu0 %v867_v36  ;;  %v2524_v36 = vld [vmem:[#allocation11 + $0x18] sm:$0xff] }
 0x28e   :  { %897 = vrot.lane.b32.xlu1 %v3107_v46, %s2921_s5 }
 0x2c0   :  { %v610_v37 = vpop.xlane.xlu0 %609 }
 0x2c1   :  { %2638 = vrcp.f32 %v610_v37  ;;  %v2523_v37 = vld [vmem:[#allocation11 + $0x10] sm:$0xff] }
 0x2c2   :  { %v741_v40 = vpop.xlane.xlu1 %740 }
 0x2c3   :  { %2640 = vrcp.f32 %v741_v40  ;;  %v2521_v40 = vld [vmem:[#allocation11] sm:$0xff] }
 0x2c7   :  { %v2639_v38 = vpop.eup %2638 }
 0x2c8   :  { %v616_v39 = vmul.f32 %v2639_v38, %v2623_v61 }
 0x2c9   :  { %v2641_v43 = vpop.eup %2640 }
 0x2ca   :  { %v618_v41 = vpack.c.bf16 %v616_v39, %v616_v39  ;;  %v747_v45 = vmul.f32 %v2641_v43, %v3120_v63  ;;  %v2522_v39 = vld [vmem:[#allocation11 + $0x8] sm:$0xff] }
 0x2cc   :  { %2186 = vmatmul.msk.bf16.vlgmr.msrb.gmra.mxu3 %vm469_vm1, %v618_v41  ;;  %v749_v49 = vpack.c.bf16 %v747_v45, %v747_v45 }
 0x2d0   :  { %v613_v42 = vpop.xlane.xlu1 %612 }
 0x2d1   :  { %2642 = vrcp.f32 %v613_v42 }
 0x2d3   :  { %v773_v19 = vpop.permute.xlu0 %772 }
 0x2d4   :  { %v778_v44 = vsel %vm497_vm2, %v773_v19, 0  ;;  %v2614_v19 = vld [vmem:[#allocation12] ss:$0 sm:$0xff] }
 0x2d5   :  { %787 = vmatpush.bf16.msrb.mxu0 %v778_v44 }
 0x2d7   :  { %v2643_v47 = vpop.eup %2642 }
 0x2d8   :  { %v617_v46 = vmul.f32 %v2643_v47, %v2629_v10  ;;  %v866_v59 = vpop.xlane.xlu2 %865 }
 0x2d9   :  { %v510_v48 = vpop.f32.mrf.mxu3 }
 0x2da   :  { %v619_v50 = vpack.c.bf16 %v617_v46, %v617_v46  ;;  %v533_v51 = vpack.c.bf16 %v510_v48, %v510_v48 }
 0x2dc   :  { %536 = vst.msk [vmem:[#allocation2] sm:$0xf] %vm535_vm3, %v533_v51  ;;  %2187 = vmatmul.msk.bf16.vlgmr.msra.gmra.mxu0 %vm469_vm1, %v619_v50  ;;  %2190 = vmatmul.msk.bf16.vlgmr.msra.gmra.mxu3 %vm469_vm1, %v749_v49  ;;  %v2922_v50 = vmov 128.0  }
 0x2e0   :  { %v744_v52 = vpop.xlane.xlu1 %743 }
 0x2e1   :  { %2644 = vrcp.f32 %v744_v52  ;;  %v512_v53 = vpop.f32.mrf.mxu3 }
 0x2e2   :  { %2646 = vrcp.f32 %v866_v59 }
 0x2e7   :  { %v2645_v54 = vpop.eup %2644 }
 0x2e8   :  { %v748_v55 = vmul.f32 %v2645_v54, %v2635_v30  ;;  %v2647_v61 = vpop.eup %2646  ;;  %v2528_v30 = vld [vmem:[#allocation11 + $0x38] sm:$0xff] }
 0x2e9   :  { %v529_v56 = vpop.f32.mrf.mxu0  ;;  %v872_v62 = vmul.f32 %v2647_v61, %v3129_v21  ;;  %1007 = vmatpush.bf16.msrb.mxu1 %v2528_v30  ;;  %v2316_v30 = vld [vmem:[#allocation14 + $0xb0] sm:$0xf0] }
 0x2ea   :  { %v750_v57 = vpack.c.bf16 %v748_v55, %v748_v55  ;;  %v534_v58 = vpack.c.bf16 %v529_v56, %v529_v56 }
 0x2eb   :  { %v874_v1 = vpack.c.bf16 %v872_v62, %v872_v62 }
 0x2ec   :  { %537 = vst.msk [vmem:[#allocation2 + $0x4] sm:$0xf] %vm535_vm3, %v534_v58  ;;  %2191 = vmatmul.msk.bf16.vlgmr.msrb.gmra.mxu0 %vm469_vm1, %v750_v57 }
 0x2ed   :  { %1008 = vmatpush.bf16.msrb.mxu1 %v2527_v31  ;;  %v2322_v31 = vld [vmem:[#allocation14 + $0xa8] sm:$0xf] }
 0x2f1   :  { %v531_v60 = vpop.f32.mrf.mxu0  ;;  %1009 = vmatpush.bf16.msrb.mxu1 %v2526_v33 }
 0x2f5   :  { %1010 = vmatpush.bf16.msrb.mxu1 %v2525_v34 }
 0x2f8   :  { %v877_v63 = vpop.permute.xlu1 %876 }
 0x2f9   :  { %v882_v0 = vsel %vm497_vm2, %v877_v63, 0  ;;  %1011 = vmatpush.bf16.msrb.mxu1 %v2524_v36  ;;  %v2346_v63 = vld [vmem:[#allocation14 + $0xe0] sm:$0xf]  ;;  %v2324_v36 = vld [vmem:[#allocation14 + $0xb8] sm:$0xf0] }
 0x2fa   :  { %891 = vmatpush.bf16.msrb.mxu3 %v882_v0  ;;  %v2559_v0 = vld [vmem:[#allocation14 + $0xec] sm:$0xf0] }
 0x2fd   :  { %2194 = vmatmul.msk.bf16.vlgmr.msrb.gmra.mxu3 %vm469_vm1, %v874_v1  ;;  %1012 = vmatpush.bf16.msrb.mxu1 %v2523_v37  ;;  %v2557_v1 = vld [vmem:[#allocation14 + $0xe4] sm:$0xf] }
 0x2fe   :  { %v869_v2 = vpop.xlane.xlu0 %868 }
 0x2ff   :  { %2648 = vrcp.f32 %v869_v2  ;;  %v2347_v2 = vor.u32 %v2559_v0, %v2346_v63  ;;  %v2539_v63 = vld [vmem:[#allocation14 + $0x4c] sm:$0xf0]  ;;  %v2537_v0 = vld [vmem:[#allocation14 + $0x44] sm:$0xf] }
 0x300   :  { %v898_v3 = vpop.permute.xlu1 %897  ;;  %2650 = vrcp.f32 %v2922_v50  ;;  %v2543_v50 = vld [vmem:[#allocation14 + $0x6c] sm:$0xf0] }
 0x301   :  { %v903_v4 = vsel %vm497_vm2, %v898_v3, 0  ;;  %1013 = vmatpush.bf16.msrb.mxu1 %v2522_v39  ;;  %v2348_v3 = vld [vmem:[#allocation14 + $0xf0] sm:$0xf0]  ;;  %1285 = vmatpush.bf16.msrb.mxu2 %v2347_v2  ;;  %v2547_v39 = vld [vmem:[#allocation14 + $0x8c] sm:$0xf0] }
 0x302   :  { %912 = vmatpush.bf16.msra.mxu0 %v903_v4  ;;  %v2354_v4 = vld [vmem:[#allocation14 + $0xe8] sm:$0xf]  ;;  %v2268_v2 = vld [vmem:[#allocation14 + $0x50] sm:$0xf0] }
 0x305   :  { %v2649_v5 = vpop.eup %2648  ;;  %1014 = vmatpush.bf16.msrb.mxu1 %v2521_v40  ;;  %v2545_v40 = vld [vmem:[#allocation14 + $0x84] sm:$0xf] }
 0x306   :  { %v873_v6 = vmul.f32 %v2649_v5, %v2637_v35  ;;  %v2651_v51 = vpop.eup %2650  ;;  %v2560_v5 = vld [vmem:[#allocation14 + $0xf4] sm:$0xf0] }
 0x307   :  { %v1030_v52 = vmul.f32 128.0, %v2651_v51  ;;  %vm1034_vm7 = vweird.f32 %v2651_v51 }
 0x308   :  { %v875_v7 = vpack.c.bf16 %v873_v6, %v873_v6  ;;  %v2351_v6 = vor.u32 %v2557_v1, %v2348_v3  ;;  %v2274_v3 = vld [vmem:[#allocation14 + $0x48] sm:$0xf] }
 0x309   :  { %v1031_v53 = vsub.f32 1.0, %v1030_v52 }
 0x30a   :  { %2195 = vmatmul.msk.bf16.vlgmr.msra.gmra.mxu0 %vm469_vm1, %v875_v7  ;;  %v2355_v7 = vor.u32 %v2560_v5, %v2354_v4  ;;  %1299 = vmatpush.bf16.msra.mxu3 %v2351_v6  ;;  %v2540_v4 = vld [vmem:[#allocation14 + $0x54] sm:$0xf0]  ;;  %v2271_v5 = vor.u32 %v2537_v0, %v2268_v2 }
 0x30b   :  { %v1032_v54 = vmul.f32 %v2651_v51, %v1031_v53  ;;  %v2284_v53 = vld [vmem:[#allocation14 + $0x70] sm:$0xf0]  ;;  %v2275_v6 = vor.u32 %v2540_v4, %v2274_v3 }
 0x30c   :  { %1313 = vmatpush.bf16.msrb.mxu0 %v2355_v7  ;;  %v2538_v7 = vld [vmem:[#allocation14 + $0x4c] sm:$0xf] }
 0x30d   :  { %v1033_v55 = vadd.f32 %v2651_v51, %v1032_v54  ;;  %v2290_v54 = vld [vmem:[#allocation14 + $0x68] sm:$0xf] }
 0x30f   :  { %v3164_v56 = vsel %vm1034_vm7, %v2651_v51, %v1033_v55  ;;  %v2541_v51 = vld [vmem:[#allocation14 + $0x64] sm:$0xf]  ;;  %v2544_v55 = vld [vmem:[#allocation14 + $0x74] sm:$0xf0] }
 0x34f   :  { %v640_v8 = vpop.f32.mrf.mxu3 }
 0x350   :  { %v668_v9 = vpack.c.bf16 %v640_v8, %v640_v8  ;;  %v2558_v8 = vld [vmem:[#allocation14 + $0xec] sm:$0xf] }
 0x352   :  { %672 = vrot.lane.b32.xlu1 %v668_v9, %s2921_s5  ;;  %v2356_v9 = vld [vmem:[#allocation14 + $0xf8] sm:$0xf0] }
 0x357   :  { %v642_v10 = vpop.f32.mrf.mxu3 }
 0x358   :  { %v2359_v10 = vor.u32 %v2558_v8, %v2356_v9  ;;  %v2276_v8 = vld [vmem:[#allocation14 + $0x58] sm:$0xf0] }
 0x359   :  { %v664_v11 = vpop.f32.mrf.mxu0  ;;  %v2279_v9 = vor.u32 %v2538_v7, %v2276_v8 }
 0x35a   :  { %v669_v12 = vpack.c.bf16 %v664_v11, %v664_v11  ;;  %v2330_v11 = vld [vmem:[#allocation14 + $0xc0] sm:$0xf]  ;;  %1327 = vmatpush.bf16.msra.mxu1 %v2359_v10 }
 0x35b   :  { %v2250_v10 = vld [vmem:[#allocation14 + $0x20] sm:$0xf] }
 0x35c   :  { %674 = vrot.lane.b32.xlu2 %v669_v12, %s2921_s5  ;;  %v2555_v12 = vld [vmem:[#allocation14 + $0xcc] sm:$0xf0] }
 0x35f   :  { %v768_v13 = vpop.f32.mrf.mxu3 }
 0x360   :  { %v793_v14 = vpack.c.bf16 %v768_v13, %v768_v13  ;;  %v2553_v13 = vld [vmem:[#allocation14 + $0xc4] sm:$0xf] }
 0x361   :  { %v666_v15 = vpop.f32.mrf.mxu0 }
 0x362   :  { %797 = vrot.lane.b32.xlu1 %v793_v14, %s2907_s26  ;;  %v2331_v14 = vor.u32 %v2555_v12, %v2330_v11  ;;  %v2332_v15 = vld [vmem:[#allocation14 + $0xd0] sm:$0xf0]  ;;  %v2535_v11 = vld [vmem:[#allocation14 + $0x2c] sm:$0xf0]  ;;  %v2533_v12 = vld [vmem:[#allocation14 + $0x24] sm:$0xf] }
 0x364   :  { %1286 = vmatpush.bf16.msrb.mxu2 %v2331_v14  ;;  %v2252_v14 = vld [vmem:[#allocation14 + $0x30] sm:$0xf0] }
 0x367   :  { %v770_v18 = vpop.f32.mrf.mxu3 }
 0x368   :  { %v2338_v18 = vld [vmem:[#allocation14 + $0xc8] sm:$0xf] }
 0x369   :  { %v789_v20 = vpop.f32.mrf.mxu0 }
 0x36a   :  { %v794_v21 = vpack.c.bf16 %v789_v20, %v789_v20  ;;  %v2556_v20 = vld [vmem:[#allocation14 + $0xd4] sm:$0xf0] }
 0x36c   :  { %799 = vrot.lane.b32.xlu0 %v794_v21, %s2907_s26  ;;  %v2335_v21 = vor.u32 %v2553_v13, %v2332_v15  ;;  %v2251_v13 = vor.u32 %v2535_v11, %v2250_v10  ;;  %v2258_v15 = vld [vmem:[#allocation14 + $0x28] sm:$0xf] }
 0x36e   :  { %1300 = vmatpush.bf16.msra.mxu3 %v2335_v21 }
 0x371   :  { %v791_v22 = vpop.f32.mrf.mxu0 }
 0x372   :  { %v2339_v22 = vor.u32 %v2556_v20, %v2338_v18  ;;  %v2536_v18 = vld [vmem:[#allocation14 + $0x34] sm:$0xf0]  ;;  %v2255_v20 = vor.u32 %v2533_v12, %v2252_v14 }
 0x373   :  { %v2259_v21 = vor.u32 %v2536_v18, %v2258_v15 }
 0x374   :  { %1314 = vmatpush.bf16.msrb.mxu0 %v2339_v22  ;;  %v2534_v22 = vld [vmem:[#allocation14 + $0x2c] sm:$0xf] }
 0x380   :  { %v893_v23 = vpop.f32.mrf.mxu3 }
 0x381   :  { %v918_v24 = vpack.c.bf16 %v893_v23, %v893_v23  ;;  %v2554_v23 = vld [vmem:[#allocation14 + $0xcc] sm:$0xf] }
 0x383   :  { %922 = vrot.lane.b32.xlu1 %v918_v24, %s2920_s6  ;;  %v2340_v24 = vld [vmem:[#allocation14 + $0xd8] sm:$0xf0] }
 0x387   :  { %v914_v25 = vpop.f32.mrf.mxu0 }
 0x388   :  { %v919_v26 = vpack.c.bf16 %v914_v25, %v914_v25  ;;  %v895_v27 = vpop.f32.mrf.mxu3  ;;  %v2343_v25 = vor.u32 %v2554_v23, %v2340_v24  ;;  %v2260_v23 = vld [vmem:[#allocation14 + $0x38] sm:$0xf0]  ;;  %v2234_v24 = vld [vmem:[#allocation14] sm:$0xf] }
 0x389   :  { %v2551_v27 = vld [vmem:[#allocation14 + $0xac] sm:$0xf0] }
 0x38a   :  { %1328 = vmatpush.bf16.msra.mxu1 %v2343_v25 }
 0x38b   :  { %924 = vrot.lane.b32.xlu1 %v919_v26, %s2920_s6  ;;  %v2314_v26 = vld [vmem:[#allocation14 + $0xa0] sm:$0xf] }
 0x38f   :  { %v916_v28 = vpop.f32.mrf.mxu0 }
 0x390   :  { %v2549_v28 = vld [vmem:[#allocation14 + $0xa4] sm:$0xf] }
 0x391   :  { %v2319_v33 = vor.u32 %v2549_v28, %v2316_v30  ;;  %v2529_v28 = vld [vmem:[#allocation14 + $0x4] sm:$0xf] }
 0x393   :  { %1301 = vmatpush.bf16.msra.mxu3 %v2319_v33  ;;  %v2242_v33 = vld [vmem:[#allocation14 + $0x8] sm:$0xf] }
 0x3b6   :  { %v675_v29 = vpop.permute.xlu2 %674 }
 0x3b7   :  { %680 = vst.msk [vmem:[#allocation2 + $0x4] sm:$0xf] %vm678_vm4, %v675_v29  ;;  %v2315_v29 = vor.u32 %v2551_v27, %v2314_v26  ;;  %v2263_v26 = vor.u32 %v2534_v22, %v2260_v23  ;;  %v2531_v27 = vld [vmem:[#allocation14 + $0xc] sm:$0xf0] }
 0x3b9   :  { %1287 = vmatpush.bf16.msrb.mxu2 %v2315_v29  ;;  %v2236_v29 = vld [vmem:[#allocation14 + $0x10] sm:$0xf0] }
 0x3c4   :  { %v673_v32 = vpop.permute.xlu1 %672 }
 0x3c5   :  { %679 = vst.msk [vmem:[#allocation2] sm:$0xf] %vm678_vm4, %v673_v32  ;;  %v2552_v32 = vld [vmem:[#allocation14 + $0xb4] sm:$0xf0] }
 0x3c6   :  { %v2323_v34 = vor.u32 %v2552_v32, %v2322_v31  ;;  %v2235_v31 = vor.u32 %v2531_v27, %v2234_v24  ;;  %v2239_v32 = vor.u32 %v2529_v28, %v2236_v29 }
 0x3c8   :  { %1315 = vmatpush.bf16.msrb.mxu0 %v2323_v34  ;;  %v2532_v34 = vld [vmem:[#allocation14 + $0x14] sm:$0xf0] }
 0x3d4   :  { %v798_v35 = vpop.permute.xlu1 %797 }
 0x3d5   :  { %804 = vst.msk [vmem:[#allocation2] sm:$0xf] %vm803_vm5, %v798_v35  ;;  %v2550_v35 = vld [vmem:[#allocation14 + $0xac] sm:$0xf] }
 0x3d6   :  { %v2327_v37 = vor.u32 %v2550_v35, %v2324_v36  ;;  %v2530_v35 = vld [vmem:[#allocation14 + $0xc] sm:$0xf]  ;;  %v2243_v36 = vor.u32 %v2532_v34, %v2242_v33 }
 0x3d8   :  { %1329 = vmatpush.bf16.msra.mxu1 %v2327_v37  ;;  %v2244_v37 = vld [vmem:[#allocation14 + $0x18] sm:$0xf0] }
 0x3de   :  { %v800_v38 = vpop.permute.xlu0 %799 }
 0x3df   :  { %805 = vst.msk [vmem:[#allocation2 + $0x4] sm:$0xf] %vm803_vm5, %v800_v38  ;;  %v2298_v38 = vld [vmem:[#allocation14 + $0x80] sm:$0xf] }
 0x3f5   :  { %v923_v41 = vpop.permute.xlu1 %922 }
 0x3f6   :  { %929 = vst.msk [vmem:[#allocation2] sm:$0xf] %vm928_vm6, %v923_v41  ;;  %v2299_v41 = vor.u32 %v2547_v39, %v2298_v38  ;;  %v2247_v39 = vor.u32 %v2530_v35, %v2244_v37 }
 0x3f8   :  { %1288 = vmatpush.bf16.msrb.mxu2 %v2299_v41 }
 0x3fd   :  { %v925_v42 = vpop.permute.xlu1 %924 }
 0x3fe   :  { %930 = vst.msk [vmem:[#allocation2 + $0x4] sm:$0xf] %vm928_vm6, %v925_v42  ;;  %v2300_v42 = vld [vmem:[#allocation14 + $0x90] sm:$0xf0] }
 0x405   :  { %v2520_v43 = vld [vmem:[#allocation2] sm:$0xff] }
 0x406   :  { %1015 = vmatmul.bf16.vlgmr.msrb.gmra.mxu1 %v2520_v43  ;;  %v2306_v43 = vld [vmem:[#allocation14 + $0x88] sm:$0xf] }
 0x483   :  { %v1016_v44 = vpop.f32.mrf.mxu1 }
 0x484   :  { %v1017_v45 = vadd.f32 %v2614_v19, %v1016_v44  ;;  %v2303_v44 = vor.u32 %v2545_v40, %v2300_v42 }
 0x486   :  { %v1023_v47 = vadd.f32 %v1017_v45, %v3046_v16  ;;  %1302 = vmatpush.bf16.msra.mxu3 %v2303_v44 }
 0x488   :  { %1025 = vadd.xlane.f32.xlu2 %v1023_v47 }
 0x48b   :  { %v1018_v46 = vpop.f32.mrf.mxu1 }
 0x48c   :  { %v1019_v48 = vadd.f32 %v2614_v19, %v1018_v46  ;;  %v2548_v19 = vld [vmem:[#allocation14 + $0x94] sm:$0xf0]  ;;  %v2308_v46 = vld [vmem:[#allocation14 + $0x98] sm:$0xf0] }
 0x48d   :  { %v2307_v45 = vor.u32 %v2548_v19, %v2306_v43 }
 0x48e   :  { %v1024_v49 = vadd.f32 %v1019_v48, %v3048_v17 }
 0x48f   :  { %1316 = vmatpush.bf16.msrb.mxu0 %v2307_v45 }
 0x490   :  { %1027 = vadd.xlane.f32.xlu1 %v1024_v49 }
 0x4fb   :  { %v1026_v57 = vpop.xlane.xlu2 %1025 }
 0x4fc   :  { %v1036_v58 = vmul.f32 %v3164_v56, %v1026_v57  ;;  %v2287_v57 = vor.u32 %v2541_v51, %v2284_v53 }
 0x4fe   :  { %v3167_v16 = vsub.f32 %v1023_v47, %v1036_v58  ;;  %v2546_v47 = vld [vmem:[#allocation14 + $0x8c] sm:$0xf]  ;;  %v2291_v58 = vor.u32 %v2544_v55, %v2290_v54  ;;  %1303 = vmatpush.bf16.msra.mxu3 %v2287_v57  ;;  %v2615_v55 = vld [vmem:[%s3597_s13] ss:$0 sm:$0xff] }
 0x4ff   :  { %v2311_v48 = vor.u32 %v2546_v47, %v2308_v46 }
 0x500   :  { %v1040_v59 = vmul.f32 %v3167_v16, %v3167_v16  ;;  %1317 = vmatpush.bf16.msrb.mxu0 %v2291_v58 }
 0x501   :  { %1330 = vmatpush.bf16.msra.mxu1 %v2311_v48 }
 0x502   :  { %1042 = vadd.xlane.f32.xlu0 %v1040_v59  ;;  %v2542_v59 = vld [vmem:[#allocation14 + $0x6c] sm:$0xf]  ;;  %1304 = vmatpush.bf16.msra.mxu3 %v2271_v5 }
 0x503   :  { %v1028_v17 = vpop.xlane.xlu1 %1027 }
 0x504   :  { %v1037_v60 = vmul.f32 %v3164_v56, %v1028_v17  ;;  %v2292_v17 = vld [vmem:[#allocation14 + $0x78] sm:$0xf0]  ;;  %1318 = vmatpush.bf16.msrb.mxu0 %v2275_v6 }
 0x506   :  { %v3172_v61 = vsub.f32 %v1024_v49, %v1037_v60  ;;  %v2282_v49 = vld [vmem:[#allocation14 + $0x60] sm:$0xf]  ;;  %v2295_v60 = vor.u32 %v2542_v59, %v2292_v17  ;;  %1305 = vmatpush.bf16.msra.mxu3 %v2255_v20 }
 0x507   :  { %v2283_v52 = vor.u32 %v2543_v50, %v2282_v49 }
 0x508   :  { %v1041_v62 = vmul.f32 %v3172_v61, %v3172_v61  ;;  %1331 = vmatpush.bf16.msra.mxu1 %v2295_v60  ;;  %1319 = vmatpush.bf16.msrb.mxu0 %v2259_v21  ;;  %v3186_v60 = vld [vmem:[%s3598_s14] ss:$0 sm:$0xff] }
 0x509   :  { %1289 = vmatpush.bf16.msrb.mxu2 %v2283_v52 }
 0x50a   :  { %1044 = vadd.xlane.f32.xlu2 %v1041_v62  ;;  %v2266_v62 = vld [vmem:[#allocation14 + $0x40] sm:$0xf]  ;;  %1306 = vmatpush.bf16.msra.mxu3 %v2239_v32 }
 0x50b   :  { %v2267_v1 = vor.u32 %v2539_v63, %v2266_v62 }
 0x50c   :  { %1332 = vmatpush.bf16.msra.mxu1 %v2279_v9  ;;  %1320 = vmatpush.bf16.msrb.mxu0 %v2243_v36 }
 0x50d   :  { %1290 = vmatpush.bf16.msrb.mxu2 %v2267_v1 }
 0x510   :  { %1333 = vmatpush.bf16.msra.mxu1 %v2263_v26 }
 0x511   :  { %1291 = vmatpush.bf16.msrb.mxu2 %v2251_v13 }
 0x514   :  { %1334 = vmatpush.bf16.msra.mxu1 %v2247_v39 }
 0x515   :  { %1292 = vmatpush.bf16.msrb.mxu2 %v2235_v31 }
 0x575   :  { %v1043_v25 = vpop.xlane.xlu0 %1042 }
 0x576   :  { %v1046_v30 = vmul.f32 %v1043_v25, %v3164_v56 }
 0x578   :  { %v1048_v38 = vadd.f32 1e-05, %v1046_v30 }
 0x57a   :  { %2652 = vrsqrt.f32 %v1048_v38  ;;  %vm1056_vm9 = vweird.f32 %v1048_v38 }
 0x57d   :  { %v1045_v40 = vpop.xlane.xlu2 %1044 }
 0x57e   :  { %v1047_v41 = vmul.f32 %v1045_v40, %v3164_v56 }
 0x580   :  { %v2653_v42 = vpop.eup %2652  ;;  %v1049_v43 = vadd.f32 1e-05, %v1047_v41 }
 0x581   :  { %v1051_v19 = vmul.f32 %v2653_v42, %v1048_v38  ;;  %vm1057_vm8 = vweird.f32 %v2653_v42 }
 0x582   :  { %2654 = vrsqrt.f32 %v1049_v43  ;;  %vm1058_vm10 = vmor %vm1056_vm9, %vm1057_vm8  ;;  %vm1066_vm12 = vweird.f32 %v1049_v43 }
 0x583   :  { %v1052_v44 = vmul.f32 %v2653_v42, %v1051_v19 }
 0x585   :  { %v1053_v45 = vmul.f32 0.5, %v1052_v44 }
 0x587   :  { %v1054_v47 = vsub.f32 1.5, %v1053_v45 }
 0x588   :  { %v2655_v46 = vpop.eup %2654 }
 0x589   :  { %v1055_v48 = vmul.f32 %v2653_v42, %v1054_v47  ;;  %v1061_v49 = vmul.f32 %v2655_v46, %v1049_v43  ;;  %vm1067_vm11 = vweird.f32 %v2655_v46 }
 0x58a   :  { %vm1068_vm13 = vmor %vm1066_vm12, %vm1067_vm11 }
 0x58b   :  { %v1062_v50 = vmul.f32 %v2655_v46, %v1061_v49  ;;  %v1059_v51 = vsel %vm1058_vm10, %v2653_v42, %v1055_v48 }
 0x58c   :  { %v1070_v54 = vmul.f32 %v1059_v51, %v3167_v16 }
 0x58d   :  { %v1063_v52 = vmul.f32 0.5, %v1062_v50 }
 0x58e   :  { %v1075_v17 = vmul.f32 %v2615_v55, %v1070_v54 }
 0x58f   :  { %v1064_v53 = vsub.f32 1.5, %v1063_v52 }
 0x590   :  { %v3189_v63 = vadd.f32 %v3186_v60, %v1075_v17 }
 0x591   :  { %v1065_v57 = vmul.f32 %v2655_v46, %v1064_v53 }
 0x593   :  { %v1069_v58 = vsel %vm1068_vm13, %v2655_v46, %v1065_v57 }
 0x594   :  { %v1071_v59 = vmul.f32 %v1069_v58, %v3172_v61  ;;  %v3199_v61 = vld [vmem:[%s3594_s10] sm:$0xf] }
 0x595   :  { %v1119_v1 = vperm.slane %v3199_v61, 2  ;;  %v1120_v2 = vperm.slane %v3199_v61, 3  ;;  %v1117_v7 = vperm.slane %v3199_v61, 0  ;;  %v1118_v10 = vperm.slane %v3199_v61, 1 }
 0x596   :  { %v1076_v62 = vmul.f32 %v2615_v55, %v1071_v59 }
 0x598   :  { %v3192_v16 = vadd.f32 %v3186_v60, %v1076_v62 }
 0x59a   :  { %v1082_v0 = vpack.c.bf16 %v3192_v16, %v3189_v63 }
 0x59c   :  { %1293 = vmatmul.bf16.vlgmr.msrb.gmra.mxu2 %v1082_v0  ;;  %1307 = vmatmul.bf16.vlgmr.msra.gmra.mxu3 %v1082_v0 }
 0x59d   :  { %1321 = vmatmul.bf16.vlgmr.msrb.gmra.mxu0 %v1082_v0  ;;  %1335 = vmatmul.bf16.vlgmr.msra.gmra.mxu1 %v1082_v0 }
 0x61a   :  { %v1322_v3 = vpop.f32.mrf.mxu0  ;;  %v1336_v4 = vpop.f32.mrf.mxu1 }
 0x61b   :  { %v3203_v5 = vadd.f32 %v1322_v3, %v1119_v1  ;;  %v3207_v6 = vadd.f32 %v1336_v4, %v1120_v2 }
 0x61d   :  { %v3211_v8 = vmul.f32 0.70710677, %v3203_v5  ;;  %v3214_v9 = vmul.f32 0.70710677, %v3207_v6 }
 0x61f   :  { %v1437_v11 = vmul.f32 %v3211_v8, %v3211_v8  ;;  %v1477_v12 = vmul.f32 %v3214_v9, %v3214_v9  ;;  %v1294_v13 = vpop.f32.mrf.mxu2  ;;  %v1308_v14 = vpop.f32.mrf.mxu3 }
 0x620   :  { %v3223_v15 = vadd.f32 %v1294_v13, %v1117_v7  ;;  %v3231_v21 = vadd.f32 %v1308_v14, %v1118_v10 }
 0x621   :  { %v3225_v18 = vmin.f32 %v1437_v11, 16.0  ;;  %v3227_v20 = vmin.f32 %v1477_v12, 16.0 }
 0x622   :  { %v3234_v22 = vmul.f32 0.70710677, %v3223_v15  ;;  %v3243_v29 = vmul.f32 0.70710677, %v3231_v21  ;;  %v1324_v45 = vpop.f32.mrf.mxu0 }
 0x623   :  { %v1450_v23 = vmul.f32 3.8918573e-05, %v3225_v18  ;;  %v1439_v24 = vmul.f32 2.1237322e-06, %v3225_v18  ;;  %v1479_v25 = vmul.f32 2.1237322e-06, %v3227_v20  ;;  %v3261_v52 = vadd.f32 %v1324_v45, %v1119_v1 }
 0x624   :  { %v1490_v26 = vmul.f32 3.8918573e-05, %v3227_v20  ;;  %v1357_v27 = vmul.f32 %v3234_v22, %v3234_v22  ;;  %v1397_v38 = vmul.f32 %v3243_v29, %v3243_v29 }
 0x625   :  { %v1451_v28 = vadd.f32 0.001143296, %v1450_v23  ;;  %v1440_v33 = vadd.f32 0.00028619796, %v1439_v24  ;;  %v1480_v34 = vadd.f32 0.00028619796, %v1479_v25  ;;  %v1338_v25 = vpop.f32.mrf.mxu1 }
 0x626   :  { %v1491_v30 = vadd.f32 0.001143296, %v1490_v26  ;;  %v3245_v31 = vmin.f32 %v1357_v27, 16.0  ;;  %v3257_v46 = vmin.f32 %v1397_v38, 16.0  ;;  %v3268_v0 = vmul.f32 0.70710677, %v3261_v52 }
 0x627   :  { %v1452_v32 = vmul.f32 %v1451_v28, %v3225_v18  ;;  %v1441_v42 = vmul.f32 %v1440_v33, %v3225_v18  ;;  %v1481_v43 = vmul.f32 %v1480_v34, %v3227_v20  ;;  %v3284_v34 = vadd.f32 %v1338_v25, %v1120_v2 }
 0x628   :  { %v1492_v35 = vmul.f32 %v1491_v30, %v3227_v20  ;;  %v1370_v36 = vmul.f32 3.8918573e-05, %v3245_v31  ;;  %v1359_v51 = vmul.f32 2.1237322e-06, %v3245_v31  ;;  %v1399_v58 = vmul.f32 2.1237322e-06, %v3257_v46 }
 0x629   :  { %v1453_v37 = vadd.f32 0.014752088, %v1452_v32  ;;  %v1442_v53 = vadd.f32 0.0036580483, %v1441_v42  ;;  %v1482_v54 = vadd.f32 0.0036580483, %v1481_v43  ;;  %v1597_v24 = vmul.f32 %v3268_v0, %v3268_v0  ;;  %v1296_v43 = vpop.f32.mrf.mxu2 }
 0x62a   :  { %v1493_v39 = vadd.f32 0.014752088, %v1492_v35  ;;  %v1371_v40 = vadd.f32 0.001143296, %v1370_v36  ;;  %v1360_v62 = vadd.f32 0.00028619796, %v1359_v51 }
 0x62b   :  { %v1454_v41 = vmul.f32 %v1453_v37, %v3225_v18  ;;  %v1443_v3 = vmul.f32 %v1442_v53, %v3225_v18  ;;  %v1483_v1 = vmul.f32 %v1482_v54, %v3227_v20  ;;  %v1400_v11 = vadd.f32 0.00028619796, %v1399_v58 }
 0x62c   :  { %v1494_v19 = vmul.f32 %v1493_v39, %v3227_v20  ;;  %v1372_v44 = vmul.f32 %v1371_v40, %v3245_v31  ;;  %v1410_v12 = vmul.f32 3.8918573e-05, %v3257_v46  ;;  %v1361_v23 = vmul.f32 %v1360_v62, %v3245_v31 }
 0x62d   :  { %v1455_v47 = vadd.f32 0.112945676, %v1454_v41  ;;  %v1444_v26 = vadd.f32 0.05243302, %v1443_v3  ;;  %v1484_v27 = vadd.f32 0.05243302, %v1483_v1  ;;  %v1401_v30 = vmul.f32 %v1400_v11, %v3257_v46 }
 0x62e   :  { %v1495_v48 = vadd.f32 0.112945676, %v1494_v19  ;;  %v1373_v49 = vadd.f32 0.014752088, %v1372_v44  ;;  %v1411_v32 = vadd.f32 0.001143296, %v1410_v12 }
 0x62f   :  { %v1456_v50 = vmul.f32 %v1455_v47, %v3225_v18  ;;  %v1362_v35 = vadd.f32 0.0036580483, %v1361_v23  ;;  %v3286_v36 = vmin.f32 %v1597_v24, 16.0  ;;  %v1445_v37 = vmul.f32 %v1444_v26, %v3225_v18 }
 0x630   :  { %v1496_v57 = vmul.f32 %v1495_v48, %v3227_v20  ;;  %v1374_v59 = vmul.f32 %v1373_v49, %v3245_v31  ;;  %v1485_v38 = vmul.f32 %v1484_v27, %v3227_v20  ;;  %v1402_v40 = vadd.f32 0.0036580483, %v1401_v30 }
 0x631   :  { %v1457_v55 = vadd.f32 0.4994258, %v1456_v50  ;;  %v1412_v41 = vmul.f32 %v1411_v32, %v3257_v46  ;;  %v1599_v42 = vmul.f32 2.1237322e-06, %v3286_v36  ;;  %v1610_v44 = vmul.f32 3.8918573e-05, %v3286_v36 }
 0x632   :  { %v1497_v4 = vadd.f32 0.4994258, %v1496_v57  ;;  %v1375_v14 = vadd.f32 0.112945676, %v1374_v59  ;;  %v3296_v2 = vmul.f32 0.70710677, %v3284_v34  ;;  %v1363_v45 = vmul.f32 %v1362_v35, %v3245_v31 }
 0x633   :  { %v1458_v17 = vmul.f32 %v1457_v55, %v3225_v18  ;;  %v1446_v48 = vadd.f32 0.18741608, %v1445_v37  ;;  %v3303_v49 = vadd.f32 %v1296_v43, %v1117_v7  ;;  %v1486_v50 = vadd.f32 0.18741608, %v1485_v38 }
 0x634   :  { %v1498_v28 = vmul.f32 %v1497_v4, %v3227_v20  ;;  %v1376_v33 = vmul.f32 %v1375_v14, %v3245_v31  ;;  %v1403_v51 = vmul.f32 %v1402_v40, %v3257_v46  ;;  %v1413_v53 = vadd.f32 0.014752088, %v1412_v41 }
 0x635   :  { %v3273_v13 = vadd.f32 1.0, %v1458_v17  ;;  %v1600_v54 = vadd.f32 0.00028619796, %v1599_v42  ;;  %v1611_v57 = vadd.f32 0.001143296, %v1610_v44  ;;  %v1637_v58 = vmul.f32 %v3296_v2, %v3296_v2 }
 0x636   :  { %v3290_v39 = vadd.f32 1.0, %v1498_v28  ;;  %v1377_v19 = vadd.f32 0.4994258, %v1376_v33  ;;  %v1364_v17 = vadd.f32 0.05243302, %v1363_v45  ;;  %v1447_v7 = vmul.f32 %v1446_v48, %v3225_v18 }
 0x637   :  { %2656 = vrcp.f32 %v3273_v13  ;;  %v1601_v62 = vmul.f32 %v1600_v54, %v3286_v36  ;;  %v1487_v3 = vmul.f32 %v1486_v50, %v3227_v20  ;;  %v1404_v1 = vadd.f32 0.05243302, %v1403_v51  ;;  %v2592_v54 = vld [vmem:[#allocation15 + $0xf8] sm:$0xff] }
 0x638   :  { %2658 = vrcp.f32 %v3290_v39  ;;  %v1378_v55 = vmul.f32 %v1377_v19, %v3245_v31  ;;  %v1612_v4 = vmul.f32 %v1611_v57, %v3286_v36  ;;  %v1414_v12 = vmul.f32 %v1413_v53, %v3257_v46  ;;  %v2584_v53 = vld [vmem:[#allocation15 + $0xb8] sm:$0xff]  ;;  %1999 = vmatpush.bf16.msrb.mxu1 %v2592_v54 }
 0x639   :  { %v3319_v14 = vmin.f32 %v1637_v58, 16.0  ;;  %v3322_v23 = vmul.f32 0.70710677, %v3303_v49  ;;  %v3325_v24 = vmul.f32 0.5, %v3203_v5  ;;  %v1365_v25 = vmul.f32 %v1364_v17, %v3245_v31  ;;  %1985 = vmatpush.bf16.msra.mxu0 %v2584_v53 }
 0x63a   :  { %v3316_v11 = vadd.f32 1.0, %v1378_v55  ;;  %v1448_v20 = vadd.f32 1.1283791, %v1447_v7  ;;  %v3331_v27 = vmul.f32 0.5, %v3207_v6  ;;  %v3334_v28 = vmul.f32 0.5, %v3261_v52 }
 0x63b   :  { %v1602_v30 = vadd.f32 0.0036580483, %v1601_v62  ;;  %v1469_v32 = vand.u32 2147483647, %v3273_v13  ;;  %v1488_v33 = vadd.f32 1.1283791, %v1487_v3  ;;  %v3338_v35 = vmul.f32 %v1404_v1, %v3257_v46 }
 0x63c   :  { %v1613_v5 = vadd.f32 0.014752088, %v1612_v4  ;;  %2660 = vrcp.f32 %v3316_v11  ;;  %v1415_v37 = vadd.f32 0.112945676, %v1414_v12  ;;  %v1639_v38 = vmul.f32 2.1237322e-06, %v3319_v14 }
 0x63d   :  { %v3299_v47 = vpop.eup %2656  ;;  %v1517_v6 = vmul.f32 %v3322_v23, %v3322_v23  ;;  %v1366_v41 = vadd.f32 0.18741608, %v1365_v25  ;;  %v3349_v43 = vmul.f32 %v1448_v20, %v3211_v8  ;;  %v1603_v19 = vmul.f32 %v1602_v30, %v3286_v36  ;;  %v2583_v30 = vld [vmem:[#allocation15 + $0xb0] sm:$0xff] }
 0x63e   :  { %v1461_v59 = vmul.f32 %v3299_v47, %v3273_v13  ;;  %v3328_v26 = vpop.eup %2658  ;;  %v1614_v42 = vmul.f32 %v1613_v5, %v3286_v36  ;;  %v1650_v44 = vmul.f32 3.8918573e-05, %v3319_v14  ;;  %vm1465_vm14 = vweird.f32 %v3273_v13  ;;  %1986 = vmatpush.bf16.msra.mxu0 %v2583_v30  ;;  %v2567_v30 = vld [vmem:[#allocation15 + $0x30] sm:$0xff] }
 0x63f   :  { %v1501_v52 = vmul.f32 %v3328_v26, %v3290_v39  ;;  %v3353_v45 = vmin.f32 %v1517_v6, 16.0  ;;  %v1471_v48 = vand.u32 2147483648, %v3273_v13  ;;  %v3358_v50 = vmul.f32 %v1488_v33, %v3214_v9  ;;  %v2591_v13 = vld [vmem:[#allocation15 + $0xf0] sm:$0xff] }
 0x640   :  { %v1462_v18 = vsub.f32 1.0, %v1461_v59  ;;  %v1640_v51 = vadd.f32 0.00028619796, %v1639_v38  ;;  %vm3360_vm15 = vcmp.eq.f32.partialorder %v1469_v32, 8.507059e+37  ;;  %v1509_v8 = vand.u32 2147483647, %v3290_v39  ;;  %2000 = vmatpush.bf16.msrb.mxu1 %v2591_v13 }
 0x641   :  { %v1416_v57 = vmul.f32 %v1415_v37, %v3257_v46  ;;  %v1615_v58 = vadd.f32 0.112945676, %v1614_v42  ;;  %vm1466_vm0 = vweird.f32 %v3299_v47  ;;  %v1502_v17 = vsub.f32 1.0, %v1501_v52  ;;  %v2576_v42 = vld [vmem:[#allocation15 + $0x78] sm:$0xff]  ;;  %v2575_v32 = vld [vmem:[#allocation15 + $0x70] sm:$0xff] }
 0x642   :  { %v1463_v40 = vmul.f32 %v3299_v47, %v1462_v18  ;;  %v1511_v9 = vand.u32 2147483648, %v3290_v39  ;;  %v3369_v7 = vpop.eup %2660  ;;  %v1604_v62 = vadd.f32 0.05243302, %v1603_v19  ;;  %v1651_v1 = vadd.f32 0.001143296, %v1650_v44  ;;  %vm3381_vm2 = vmor %vm1465_vm14, %vm1466_vm0  ;;  %1971 = vmatpush.bf16.msrb.mxu3 %v2576_v42 }
 0x643   :  { %v1616_v3 = vmul.f32 %v1615_v58, %v3286_v36  ;;  %v1519_v4 = vmul.f32 2.1237322e-06, %v3353_v45  ;;  %v1472_v12 = vor.u32 1.1754944e-38, %v1471_v48  ;;  %vm1505_vm1 = vweird.f32 %v3290_v39  ;;  %v2582_v58 = vld [vmem:[#allocation15 + $0xa8] sm:$0xff] }
 0x644   :  { %v1464_v59 = vadd.f32 %v3299_v47, %v1463_v40  ;;  %v1367_v18 = vmul.f32 %v1366_v41, %v3245_v31  ;;  %v1641_v25 = vmul.f32 %v1640_v51, %v3319_v14  ;;  %v1530_v20 = vmul.f32 3.8918573e-05, %v3353_v45  ;;  %v2568_v41 = vld [vmem:[#allocation15 + $0x38] sm:$0xff]  ;;  %1987 = vmatpush.bf16.msra.mxu0 %v2582_v58 }
 0x645   :  { %v1417_v33 = vadd.f32 0.4994258, %v1416_v57  ;;  %v1617_v5 = vadd.f32 0.4994258, %v1616_v3  ;;  %v1652_v37 = vmul.f32 %v1651_v1, %v3319_v14  ;;  %v1520_v38 = vadd.f32 0.00028619796, %v1519_v4  ;;  %v1310_v57 = vpop.f32.mrf.mxu3  ;;  %1957 = vmatpush.bf16.msra.mxu2 %v2568_v41 }
 0x646   :  { %v1468_v31 = vsel %vm3381_vm2, %v3299_v47, %v1464_v59  ;;  %v1503_v6 = vmul.f32 %v3328_v26, %v1502_v17  ;;  %v1381_v40 = vmul.f32 %v3369_v7, %v3316_v11  ;;  %v1531_v52 = vadd.f32 0.001143296, %v1530_v20  ;;  %v2590_v59 = vld [vmem:[#allocation15 + $0xe8] sm:$0xff]  ;;  %1972 = vmatpush.bf16.msrb.mxu3 %v2575_v32  ;;  %v2588_v58 = vld [vmem:[#allocation15 + $0xd8] sm:$0xff] }
 0x647   :  { %v1605_v19 = vmul.f32 %v1604_v62, %v3286_v36  ;;  %v1618_v44 = vmul.f32 %v1617_v5, %v3286_v36  ;;  %v1653_v48 = vadd.f32 0.014752088, %v1652_v37  ;;  %v1521_v51 = vmul.f32 %v1520_v38, %v3353_v45  ;;  %2001 = vmatpush.bf16.msrb.mxu1 %v2590_v59 }
 0x648   :  { %vm1506_vm3 = vweird.f32 %v3328_v26  ;;  %vm3396_vm4 = vcmp.eq.f32.partialorder %v1509_v8, 8.507059e+37  ;;  %v1642_v53 = vadd.f32 0.0036580483, %v1641_v25  ;;  %v1532_v54 = vmul.f32 %v1531_v52, %v3353_v45 }
 0x649   :  { %v1391_v17 = vand.u32 2147483648, %v3316_v11  ;;  %v1418_v62 = vmul.f32 %v1417_v33, %v3257_v46  ;;  %v3403_v3 = vadd.f32 1.0, %v1618_v44  ;;  %v1654_v1 = vmul.f32 %v1653_v48, %v3319_v14  ;;  %1958 = vmatpush.bf16.msra.mxu2 %v2567_v30  ;;  %vm3421_vm5 = vmor %vm1505_vm1, %vm1506_vm3  ;;  %v2574_v44 = vld [vmem:[#allocation15 + $0x68] sm:$0xff]  ;;  %v2573_v30 = vld [vmem:[#allocation15 + $0x60] sm:$0xff] }
 0x64a   :  { %v1473_v8 = vsel %vm3360_vm15, %v1472_v12, %v1468_v31  ;;  %v1504_v4 = vadd.f32 %v3328_v26, %v1503_v6  ;;  %v1522_v25 = vadd.f32 0.0036580483, %v1521_v51  ;;  %v1533_v20 = vadd.f32 0.014752088, %v1532_v54  ;;  %v2581_v31 = vld [vmem:[#allocation15 + $0xa0] sm:$0xff]  ;;  %1973 = vmatpush.bf16.msrb.mxu3 %v2574_v44 }
 0x64b   :  { %v1382_v5 = vsub.f32 1.0, %v1381_v40  ;;  %v1606_v37 = vadd.f32 0.18741608, %v1605_v19  ;;  %2662 = vrcp.f32 %v3403_v3  ;;  %v3412_v33 = vadd.f32 %v1310_v57, %v1118_v10  ;;  %v2589_v40 = vld [vmem:[#allocation15 + $0xe0] sm:$0xff]  ;;  %1988 = vmatpush.bf16.msra.mxu0 %v2581_v31  ;;  %v2566_v19 = vld [vmem:[#allocation15 + $0x28] sm:$0xff]  ;;  %v2580_v57 = vld [vmem:[#allocation15 + $0x98] sm:$0xff] }
 0x64c   :  { %v1512_v38 = vor.u32 1.1754944e-38, %v1511_v9  ;;  %v3414_v52 = vadd.f32 1.1283791, %v1367_v18  ;;  %v1643_v55 = vmul.f32 %v1642_v53, %v3319_v14  ;;  %v1655_v12 = vadd.f32 0.112945676, %v1654_v1  ;;  %2002 = vmatpush.bf16.msrb.mxu1 %v2589_v40 }
 0x64d   :  { %v1389_v61 = vand.u32 2147483647, %v3316_v11  ;;  %v3426_v10 = vor.u32 1.1754944e-38, %v1391_v17  ;;  %v3428_v9 = vadd.f32 1.0, %v1418_v62  ;;  %v1534_v18 = vmul.f32 %v1533_v20, %v3353_v45  ;;  %1959 = vmatpush.bf16.msra.mxu2 %v2566_v19  ;;  %v2565_v20 = vld [vmem:[#allocation15 + $0x20] sm:$0xff] }
 0x64e   :  { %v3432_v13 = vmul.f32 %v1473_v8, %v3349_v43  ;;  %v1508_v39 = vsel %vm3421_vm5, %v3328_v26, %v1504_v4  ;;  %v1656_v41 = vmul.f32 %v1655_v12, %v3319_v14  ;;  %v1523_v42 = vmul.f32 %v1522_v25, %v3353_v45  ;;  %1974 = vmatpush.bf16.msrb.mxu3 %v2573_v30  ;;  %v2563_v30 = vld [vmem:[#allocation15 + $0x10] sm:$0xff]  ;;  %v2585_v8 = vld [vmem:[#allocation15 + $0xc0] sm:$0xff] }
 0x64f   :  { %v1383_v48 = vmul.f32 %v3369_v7, %v1382_v5  ;;  %v1607_v51 = vmul.f32 %v1606_v37, %v3286_v36  ;;  %v1535_v53 = vadd.f32 0.112945676, %v1534_v18  ;;  %v3442_v54 = vmul.f32 0.70710677, %v3412_v33  ;;  %1989 = vmatpush.bf16.msra.mxu0 %v2580_v57  ;;  %v2587_v18 = vld [vmem:[#allocation15 + $0xd0] sm:$0xff] }
 0x650   :  { %vm1385_vm6 = vweird.f32 %v3316_v11  ;;  %vm1386_vm7 = vweird.f32 %v3369_v7  ;;  %v1644_v26 = vadd.f32 0.05243302, %v1643_v55  ;;  %v1657_v43 = vadd.f32 0.4994258, %v1656_v41  ;;  %2003 = vmatpush.bf16.msrb.mxu1 %v2588_v58 }
 0x651   :  { %v3446_v59 = vpop.eup %2662  ;;  %v1513_v17 = vsel %vm3396_vm4, %v1512_v38, %v1508_v39  ;;  %2664 = vrcp.f32 %v3428_v9  ;;  %v1536_v36 = vmul.f32 %v1535_v53, %v3353_v45  ;;  %v1557_v62 = vmul.f32 %v3442_v54, %v3442_v54  ;;  %1960 = vmatpush.bf16.msra.mxu2 %v2565_v20  ;;  %vm3477_vm9 = vmor %vm1385_vm6, %vm1386_vm7 }
 0x652   :  { %v2362_v1 = vclamps-f32 %v3432_v13, 1.0  ;;  %vm3455_vm8 = vcmp.eq.f32.partialorder %v1389_v61, 8.507059e+37  ;;  %v1621_v4 = vmul.f32 %v3446_v59, %v3403_v3  ;;  %v1658_v47 = vmul.f32 %v1657_v43, %v3319_v14  ;;  %v2579_v61 = vld [vmem:[#allocation15 + $0x90] sm:$0xff] }
 0x653   :  { %v1524_v25 = vadd.f32 0.05243302, %v1523_v42  ;;  %v1384_v32 = vadd.f32 %v3369_v7, %v1383_v48  ;;  %v1608_v5 = vadd.f32 1.1283791, %v1607_v51  ;;  %v1537_v37 = vadd.f32 0.4994258, %v1536_v36  ;;  %1990 = vmatpush.bf16.msra.mxu0 %v2579_v61 }
 0x654   :  { %v3463_v38 = vmin.f32 %v1557_v62, 16.0  ;;  %v1622_v55 = vsub.f32 1.0, %v1621_v4  ;;  %v1629_v12 = vand.u32 2147483647, %v3403_v3  ;;  %v1645_v31 = vmul.f32 %v1644_v26, %v3319_v14  ;;  %v2564_v48 = vld [vmem:[#allocation15 + $0x18] sm:$0xff]  ;;  %2004 = vmatpush.bf16.msrb.mxu1 %v2587_v18  ;;  %v2578_v4 = vld [vmem:[#allocation15 + $0x88] sm:$0xff] }
 0x655   :  { %v3467_v6 = vadd.f32 1.0, %v1658_v47  ;;  %v1631_v40 = vand.u32 2147483648, %v3403_v3  ;;  %v1538_v13 = vmul.f32 %v1537_v37, %v3353_v45  ;;  %vm1626_vm10 = vweird.f32 %v3446_v59  ;;  %v2572_v51 = vld [vmem:[#allocation15 + $0x58] sm:$0xff]  ;;  %1961 = vmatpush.bf16.msra.mxu2 %v2564_v48  ;;  %v2586_v47 = vld [vmem:[#allocation15 + $0xc8] sm:$0xff] }
 0x656   :  { %v1559_v39 = vmul.f32 2.1237322e-06, %v3463_v38  ;;  %v1570_v41 = vmul.f32 3.8918573e-05, %v3463_v38  ;;  %v1623_v19 = vmul.f32 %v3446_v59, %v1622_v55  ;;  %v1525_v44 = vmul.f32 %v1524_v25, %v3353_v45  ;;  %1975 = vmatpush.bf16.msrb.mxu3 %v2572_v51  ;;  %v2570_v42 = vld [vmem:[#allocation15 + $0x48] sm:$0xff] }
 0x657   :  { %2666 = vrcp.f32 %v3467_v6  ;;  %v3485_v53 = vpop.eup %2664  ;;  %v3488_v26 = vmul.f32 %v1513_v17, %v3358_v50  ;;  %v1388_v11 = vsel %vm3477_vm9, %v3369_v7, %v1384_v32  ;;  %v3493_v43 = vadd.f32 1.0, %v1538_v13  ;;  %1991 = vmatpush.bf16.msra.mxu0 %v2578_v4  ;;  %v2571_v32 = vld [vmem:[#allocation15 + $0x50] sm:$0xff] }
 0x658   :  { %v1560_v57 = vadd.f32 0.00028619796, %v1559_v39  ;;  %v1624_v58 = vadd.f32 %v3446_v59, %v1623_v19  ;;  %vm1625_vm11 = vweird.f32 %v3403_v3  ;;  %v1646_v36 = vadd.f32 0.18741608, %v1645_v31  ;;  %2005 = vmatpush.bf16.msrb.mxu1 %v2586_v47 }
 0x659   :  { %v1571_v62 = vadd.f32 0.001143296, %v1570_v41  ;;  %v1679_v25 = vadd.f32 1.0, %v2362_v1  ;;  %v1609_v50 = vmul.f32 %v1608_v5, %v3268_v0  ;;  %vm1627_vm12 = vmor %vm1625_vm11, %vm1626_vm10  ;;  %v1632_v7 = vor.u32 1.1754944e-38, %v1631_v40  ;;  %1962 = vmatpush.bf16.msra.mxu2 %v2563_v30 }
 0x65a   :  { %2668 = vrcp.f32 %v3493_v43  ;;  %v1628_v17 = vsel %vm1627_vm12, %v3446_v59, %v1624_v58  ;;  %vm1630_vm13 = vcmp.eq.f32.partialorder %v1629_v12, 8.507059e+37  ;;  %v1526_v3 = vadd.f32 0.18741608, %v1525_v44  ;;  %1976 = vmatpush.bf16.msrb.mxu3 %v2571_v32 }
 0x65b   :  { %v1561_v20 = vmul.f32 %v1560_v57, %v3463_v38  ;;  %v1393_v0 = vsel %vm3455_vm8, %v3426_v10, %v1388_v11  ;;  %v3508_v1 = vmul.f32 %v3485_v53, %v3428_v9  ;;  %v1633_v5 = vsel %vm1630_vm13, %v1632_v7, %v1628_v17  ;;  %v2577_v10 = vld [vmem:[#allocation15 + $0x80] sm:$0xff] }
 0x65c   :  { %v1572_v37 = vmul.f32 %v1571_v62, %v3463_v38  ;;  %v1369_v59 = vmul.f32 %v3414_v52, %v3234_v22  ;;  %v3514_v12 = vadd.f32 0.18741608, %v3338_v35  ;;  %v1634_v31 = vmul.f32 %v1633_v5, %v1609_v50  ;;  %1992 = vmatpush.bf16.msra.mxu0 %v2577_v10  ;;  %2006 = vmatpush.bf16.msrb.mxu1 %v2585_v8  ;;  %v2561_v50 = vld [vmem:[#allocation15] sm:$0xff] }
 0x65d   :  { %v2667_v55 = vpop.eup %2666  ;;  %v1647_v61 = vmul.f32 %v1646_v36, %v3319_v14  ;;  %v1687_v18 = vmul.f32 %v1679_v25, %v3325_v24  ;;  %v2363_v40 = vclamps-f32 %v3488_v26, 1.0  ;;  %v1527_v35 = vmul.f32 %v1526_v3, %v3353_v45  ;;  %v2562_v14 = vld [vmem:[#allocation15 + $0x8] sm:$0xff]  ;;  %v2569_v7 = vld [vmem:[#allocation15 + $0x40] sm:$0xff] }
 0x65e   :  { %v1661_v13 = vmul.f32 %v2667_v55, %v3467_v6  ;;  %v1573_v39 = vadd.f32 0.014752088, %v1572_v37  ;;  %v3520_v41 = vmul.f32 %v1393_v0, %v1369_v59  ;;  %v2366_v22 = vclamps-f32 %v1634_v31, 1.0  ;;  %1963 = vmatpush.bf16.msra.mxu2 %v2562_v14  ;;  %1977 = vmatpush.bf16.msrb.mxu3 %v2570_v42 }
 0x65f   :  { %v1562_v52 = vadd.f32 0.0036580483, %v1561_v20  ;;  %v1422_v44 = vsub.f32 1.0, %v3508_v1  ;;  %v1671_v24 = vand.u32 2147483648, %v3467_v6  ;;  %v1648_v11 = vadd.f32 1.1283791, %v1647_v61 }
 0x660   :  { %v2669_v19 = vpop.eup %2668  ;;  %v1662_v48 = vsub.f32 1.0, %v1661_v13  ;;  %v1574_v51 = vmul.f32 %v1573_v39, %v3463_v38  ;;  %v1683_v26 = vadd.f32 1.0, %v2366_v22  ;;  %vm1665_vm14 = vweird.f32 %v3467_v6 }
 0x661   :  { %v1541_v57 = vmul.f32 %v2669_v19, %v3493_v43  ;;  %vm1666_vm15 = vweird.f32 %v2667_v55  ;;  %v1669_v58 = vand.u32 2147483647, %v3467_v6  ;;  %v1528_v4 = vadd.f32 1.1283791, %v1527_v35 }
 0x662   :  { %v1663_v45 = vmul.f32 %v2667_v55, %v1662_v48  ;;  %v1575_v36 = vadd.f32 0.112945676, %v1574_v51  ;;  %v1691_v62 = vmul.f32 %v1683_v26, %v3334_v28  ;;  %v1563_v25 = vmul.f32 %v1562_v52, %v3463_v38  ;;  %vm1667_vm0 = vmor %vm1665_vm14, %vm1666_vm15  ;;  %1964 = vmatpush.bf16.msra.mxu2 %v2561_v50  ;;  %1978 = vmatpush.bf16.msrb.mxu3 %v2569_v7 }
 0x663   :  { %v1542_v47 = vsub.f32 1.0, %v1541_v57  ;;  %v1672_v3 = vor.u32 1.1754944e-38, %v1671_v24  ;;  %v1551_v20 = vand.u32 2147483648, %v3493_v43  ;;  %vm1546_vm1 = vweird.f32 %v2669_v19 }
 0x664   :  { %v1664_v17 = vadd.f32 %v2667_v55, %v1663_v45  ;;  %v1576_v30 = vmul.f32 %v1575_v36, %v3463_v38  ;;  %v1695_v32 = vpack.c.bf16 %v1691_v62, %v1687_v18  ;;  %v1549_v28 = vand.u32 2147483647, %v3493_v43 }
 0x665   :  { %v1543_v0 = vmul.f32 %v2669_v19, %v1542_v47  ;;  %v1649_v1 = vmul.f32 %v1648_v11, %v3296_v2  ;;  %vm1670_vm2 = vcmp.eq.f32.partialorder %v1669_v58, 8.507059e+37  ;;  %vm1545_vm3 = vweird.f32 %v3493_v43 }
 0x666   :  { %v1668_v5 = vsel %vm1667_vm0, %v2667_v55, %v1664_v17  ;;  %v1577_v37 = vadd.f32 0.4994258, %v1576_v30  ;;  %v1564_v61 = vadd.f32 0.05243302, %v1563_v25  ;;  %1993 = vmatmul.bf16.vlgmr.msra.gmra.mxu0 %v1695_v32  ;;  %v1423_v6 = vmul.f32 %v3485_v53, %v1422_v44  ;;  %vm1547_vm4 = vmor %vm1545_vm3, %vm1546_vm1 }
 0x667   :  { %v1673_v59 = vsel %vm1670_vm2, %v1672_v3, %v1668_v5  ;;  %v1544_v31 = vadd.f32 %v2669_v19, %v1543_v0  ;;  %v1552_v8 = vor.u32 1.1754944e-38, %v1551_v20  ;;  %v2360_v2 = vclamps-f32 %v3520_v41, 1.0 }
 0x668   :  { %v1674_v10 = vmul.f32 %v1673_v59, %v1649_v1  ;;  %v1578_v18 = vmul.f32 %v1577_v37, %v3463_v38  ;;  %v1529_v55 = vmul.f32 %v1528_v4, %v3322_v23  ;;  %vm1550_vm5 = vcmp.eq.f32.partialorder %v1549_v28, 8.507059e+37 }
 0x669   :  { %v1548_v13 = vsel %vm1547_vm4, %v2669_v19, %v1544_v31  ;;  %v1680_v39 = vadd.f32 1.0, %v2363_v40  ;;  %v1407_v52 = vmul.f32 %v3514_v12, %v3257_v46  ;;  %v1348_v14 = vmul.f32 0.5, %v3284_v34 }
 0x66a   :  { %v2367_v22 = vclamps-f32 %v1674_v10, 1.0  ;;  %v1553_v35 = vsel %vm1550_vm5, %v1552_v8, %v1548_v13  ;;  %v1579_v43 = vadd.f32 1.0, %v1578_v18  ;;  %v1565_v44 = vmul.f32 %v1564_v61, %v3463_v38 }
 0x66b   :  { %v1554_v42 = vmul.f32 %v1553_v35, %v1529_v55  ;;  %v1424_v48 = vadd.f32 %v3485_v53, %v1423_v6  ;;  %vm1426_vm6 = vweird.f32 %v3485_v53  ;;  %v1677_v23 = vadd.f32 1.0, %v2360_v2 }
 0x66c   :  { %v1684_v41 = vadd.f32 1.0, %v2367_v22  ;;  %2670 = vrcp.f32 %v1579_v43  ;;  %v1431_v40 = vand.u32 2147483648, %v3428_v9  ;;  %v1688_v24 = vmul.f32 %v1680_v39, %v3331_v27 }
 0x66d   :  { %v2364_v19 = vclamps-f32 %v1554_v42, 1.0  ;;  %vm1425_vm7 = vweird.f32 %v3428_v9  ;;  %v1429_v46 = vand.u32 2147483647, %v3428_v9  ;;  %v1341_v12 = vmul.f32 0.5, %v3223_v15 }
 0x66e   :  { %v1692_v34 = vmul.f32 %v1684_v41, %v1348_v14  ;;  %vm1427_vm8 = vmor %vm1425_vm7, %vm1426_vm6  ;;  %v1345_v51 = vmul.f32 0.5, %v3303_v49  ;;  %v1566_v11 = vadd.f32 0.18741608, %v1565_v44  ;;  %v1408_v57 = vadd.f32 1.1283791, %v1407_v52 }
 0x66f   :  { %v1681_v26 = vadd.f32 1.0, %v2364_v19  ;;  %v1428_v45 = vsel %vm1427_vm8, %v3485_v53, %v1424_v48  ;;  %v1685_v36 = vmul.f32 %v1677_v23, %v1341_v12  ;;  %v1432_v62 = vor.u32 1.1754944e-38, %v1431_v40 }
 0x670   :  { %v1696_v58 = vpack.c.bf16 %v1692_v34, %v1688_v24  ;;  %vm1430_vm9 = vcmp.eq.f32.partialorder %v1429_v46, 8.507059e+37  ;;  %v1567_v25 = vmul.f32 %v1566_v11, %v3463_v38  ;;  %v1409_v50 = vmul.f32 %v1408_v57, %v3243_v29 }
 0x671   :  { %v1689_v4 = vmul.f32 %v1681_v26, %v1345_v51  ;;  %v1433_v47 = vsel %vm1430_vm9, %v1432_v62, %v1428_v45  ;;  %v1591_v17 = vand.u32 2147483648, %v1579_v43  ;;  %v1589_v20 = vand.u32 2147483647, %v1579_v43 }
 0x672   :  { %v2671_v27 = vpop.eup %2670  ;;  %2007 = vmatmul.bf16.vlgmr.msrb.gmra.mxu1 %v1696_v58  ;;  %v1434_v7 = vmul.f32 %v1433_v47, %v1409_v50  ;;  %v1568_v3 = vadd.f32 1.1283791, %v1567_v25  ;;  %vm1585_vm11 = vweird.f32 %v1579_v43  ;;  %v1342_v59 = vmul.f32 0.5, %v3231_v21 }
 0x673   :  { %v1693_v9 = vpack.c.bf16 %v1689_v4, %v1685_v36  ;;  %v1581_v15 = vmul.f32 %v2671_v27, %v1579_v43  ;;  %vm1586_vm10 = vweird.f32 %v2671_v27  ;;  %v1592_v32 = vor.u32 1.1754944e-38, %v1591_v17 }
 0x674   :  { %vm1587_vm12 = vmor %vm1585_vm11, %vm1586_vm10  ;;  %v2361_v0 = vclamps-f32 %v1434_v7, 1.0  ;;  %v1569_v28 = vmul.f32 %v1568_v3, %v3442_v54  ;;  %vm1590_vm13 = vcmp.eq.f32.partialorder %v1589_v20, 8.507059e+37  ;;  %v1346_v31 = vmul.f32 0.5, %v3412_v33  ;;  %v2617_v54 = vld [vmem:[%s3596_s12] ss:$0 sm:$0xff] }
 0x675   :  { %v1582_v49 = vsub.f32 1.0, %v1581_v15  ;;  %1965 = vmatmul.bf16.vlgmr.msra.gmra.mxu2 %v1693_v9 }
 0x676   :  { %v1678_v29 = vadd.f32 1.0, %v2361_v0 }
 0x677   :  { %v1583_v53 = vmul.f32 %v2671_v27, %v1582_v49 }
 0x678   :  { %v1686_v6 = vmul.f32 %v1678_v29, %v1342_v59 }
 0x679   :  { %v1584_v30 = vadd.f32 %v2671_v27, %v1583_v53 }
 0x67b   :  { %v1588_v1 = vsel %vm1587_vm12, %v2671_v27, %v1584_v30 }
 0x67c   :  { %v1593_v38 = vsel %vm1590_vm13, %v1592_v32, %v1588_v1 }
 0x67d   :  { %v1594_v5 = vmul.f32 %v1593_v38, %v1569_v28  ;;  %v2677_v38 = vld [vmem:[%s3598_s14] ss:$0 sm:$0xff] }
 0x67f   :  { %v2365_v37 = vclamps-f32 %v1594_v5, 1.0 }
 0x681   :  { %v1682_v61 = vadd.f32 1.0, %v2365_v37 }
 0x683   :  { %v1690_v10 = vmul.f32 %v1682_v61, %v1346_v31 }
 0x685   :  { %v1694_v8 = vpack.c.bf16 %v1690_v10, %v1686_v6 }
 0x687   :  { %1979 = vmatmul.bf16.vlgmr.msrb.gmra.mxu3 %v1694_v8 }
 0x6e3   :  { %v1994_v55 = vpop.f32.mrf.mxu0 }
 0x6eb   :  { %v1996_v44 = vpop.f32.mrf.mxu0 }
 0x6ef   :  { %v2008_v22 = vpop.f32.mrf.mxu1 }
 0x6f7   :  { %v2010_v41 = vpop.f32.mrf.mxu1 }
 0x6f8   :  { %v1966_v18 = vpop.f32.mrf.mxu2 }
 0x6f9   :  { %v1967_v2 = vadd.f32 %v2617_v54, %v1966_v18 }
 0x700   :  { %v1968_v35 = vpop.f32.mrf.mxu2 }
 0x701   :  { %v1969_v21 = vadd.f32 %v2617_v54, %v1968_v35 }
 0x70a   :  { %v1980_v13 = vpop.f32.mrf.mxu3 }
 0x70b   :  { %v1981_v39 = vadd.f32 %v1980_v13, %v1967_v2 }
 0x70d   :  { %v1995_v43 = vadd.f32 %v1994_v55, %v1981_v39 }
 0x70f   :  { %v2009_v52 = vadd.f32 %v2008_v22, %v1995_v43 }
 0x711   :  { %v2013_v33 = vadd.f32 %v2009_v52, %v3189_v63 }
 0x712   :  { %v1982_v14 = vpop.f32.mrf.mxu3 }
 0x713   :  { %v1983_v42 = vadd.f32 %v1982_v14, %v1969_v21  ;;  %2015 = vadd.xlane.f32.xlu1 %v2013_v33 }
 0x715   :  { %v1997_v48 = vadd.f32 %v1996_v44, %v1983_v42 }
 0x717   :  { %v2011_v23 = vadd.f32 %v2010_v41, %v1997_v48 }
 0x719   :  { %v2014_v40 = vadd.f32 %v2011_v23, %v3192_v16 }
 0x71b   :  { %2017 = vadd.xlane.f32.xlu0 %v2014_v40 }
 0x786   :  { %v2016_v19 = vpop.xlane.xlu1 %2015 }
 0x787   :  { %v2019_v24 = vmul.f32 %v2016_v19, %v3164_v56 }
 0x789   :  { %v2021_v46 = vsub.f32 %v2013_v33, %v2019_v24 }
 0x78b   :  { %v2023_v34 = vmul.f32 %v2021_v46, %v2021_v46 }
 0x78d   :  { %2025 = vadd.xlane.f32.xlu2 %v2023_v34 }
 0x78e   :  { %v2018_v12 = vpop.xlane.xlu0 %2017 }
 0x78f   :  { %v2020_v51 = vmul.f32 %v2018_v12, %v3164_v56 }
 0x791   :  { %v2022_v63 = vsub.f32 %v2014_v40, %v2020_v51 }
 0x793   :  { %v2024_v26 = vmul.f32 %v2022_v63, %v2022_v63 }
 0x795   :  { %2027 = vadd.xlane.f32.xlu1 %v2024_v26 }
 0x800   :  { %v2026_v11 = vpop.xlane.xlu2 %2025 }
 0x801   :  { %v2029_v57 = vmul.f32 %v2026_v11, %v3164_v56 }
 0x803   :  { %v2031_v45 = vadd.f32 1e-05, %v2029_v57 }
 0x805   :  { %2672 = vrsqrt.f32 %v2031_v45  ;;  %vm2039_vm15 = vweird.f32 %v2031_v45 }
 0x808   :  { %v2028_v58 = vpop.xlane.xlu1 %2027 }
 0x809   :  { %v2030_v16 = vmul.f32 %v2028_v58, %v3164_v56  ;;  %v2676_v56 = vld [vmem:[%s3597_s13] ss:$0 sm:$0xff] }
 0x80b   :  { %v2673_v36 = vpop.eup %2672  ;;  %v2032_v62 = vadd.f32 1e-05, %v2030_v16 }
 0x80c   :  { %v2034_v4 = vmul.f32 %v2673_v36, %v2031_v45  ;;  %vm2040_vm14 = vweird.f32 %v2673_v36 }
 0x80d   :  { %2674 = vrsqrt.f32 %v2032_v62  ;;  %vm2041_vm0 = vmor %vm2039_vm15, %vm2040_vm14  ;;  %vm2049_vm2 = vweird.f32 %v2032_v62 }
 0x80e   :  { %v2035_v27 = vmul.f32 %v2673_v36, %v2034_v4 }
 0x810   :  { %v2036_v47 = vmul.f32 0.5, %v2035_v27 }
 0x812   :  { %v2037_v9 = vsub.f32 1.5, %v2036_v47 }
 0x813   :  { %v2675_v25 = vpop.eup %2674 }
 0x814   :  { %v2038_v15 = vmul.f32 %v2673_v36, %v2037_v9  ;;  %v2044_v50 = vmul.f32 %v2675_v25, %v2032_v62  ;;  %vm2050_vm1 = vweird.f32 %v2675_v25 }
 0x815   :  { %vm2051_vm3 = vmor %vm2049_vm2, %vm2050_vm1 }
 0x816   :  { %v2042_v49 = vsel %vm2041_vm0, %v2673_v36, %v2038_v15  ;;  %v2045_v7 = vmul.f32 %v2675_v25, %v2044_v50 }
 0x817   :  { %v2053_v17 = vmul.f32 %v2042_v49, %v2021_v46 }
 0x818   :  { %v2046_v3 = vmul.f32 0.5, %v2045_v7 }
 0x819   :  { %v2055_v53 = vmul.f32 %v2676_v56, %v2053_v17 }
 0x81a   :  { %v2047_v20 = vsub.f32 1.5, %v2046_v3 }
 0x81b   :  { %v2057_v30 = vadd.f32 %v3186_v60, %v2055_v53 }
 0x81c   :  { %v2048_v32 = vmul.f32 %v2675_v25, %v2047_v20 }
 0x81d   :  { %2059 = vst [vmem:[#allocation17] sm:$0xff] %v2057_v30 }
 0x81e   :  { %v2052_v0 = vsel %vm2051_vm3, %v2675_v25, %v2048_v32 }
 0x81f   :  { %v2054_v28 = vmul.f32 %v2052_v0, %v2022_v63 }
 0x821   :  { %v2056_v1 = vmul.f32 %v2676_v56, %v2054_v28 }
 0x823   :  { %v2058_v5 = vadd.f32 %v2677_v38, %v2056_v1 }
 0x825   :  { %2060 = vst [vmem:[#allocation17 + $0x8] sm:$0xff] %v2058_v5 }
 0x826   :  { %2073 = dma.vmem_to_hbm [thread:$0]  %s2066_s4, 256, %s2068_s25, [#allocation5], %s2912_s23, %s2912_s23, %s2913_s8  }
 0x827   :  { %2904 = dma.done.wait [#allocation5], 256  }
 0x828   :  { %2905 = vsyncadd [#allocation5], 4294967040 }
 0x829   :  { %2078 = vsyncpa [#allocation4], 1 }
 0x82a   :  { %2079 = vsyncpa [#allocation7], 1 }
 0x82b   :  { %2080 = vsyncpa [#allocation10], 1 }
 0x82c   :  { %2081 = vsyncpa [#allocation13], 1 }
 0x82d   :  { %2082 = vsyncpa [#allocation16], 1 }
 0x82e   :  { %2083 = vsyncpa [#allocation5], 1 }

// kernel: tpu_custom_call.1
= control target key start
LH: loop header
LB: loop body
LE: loop exit
PB: predicated region body
PF: predicated region fallthrough
CT: control target
= control target key end

     0   :  { %20 = vsyncpa [#allocation4], 0  ;;  %s3584_s0 = inlined_call_operand.hbm [shape: f32[2,8,128], index: 0, kind: input, shape index: {}]   ;;  %s3585_s1 = inlined_call_operand.hbm [shape: bf16[128,128], index: 1, kind: input, shape index: {}]   ;;  %s3586_s2 = inlined_call_operand.hbm [shape: bf16[128,128], index: 2, kind: input, shape index: {}]   ;;  %s3587_s3 = inlined_call_operand.hbm [shape: bf16[128,128], index: 3, kind: input, shape index: {}]   ;;  %s3588_s4 = inlined_call_operand.hbm [shape: bf16[128,128], index: 4, kind: input, shape index: {}]   ;;  %s3589_s5 = inlined_call_operand.vmem [shape: f32[1,128], index: 5, kind: input, shape index: {}]   ;;  %s3590_s6 = inlined_call_operand.vmem [shape: f32[1,128], index: 6, kind: input, shape index: {}]   ;;  %s3591_s7 = inlined_call_operand.vmem [shape: f32[1,128], index: 7, kind: input, shape index: {}]   ;;  %s3592_s8 = inlined_call_operand.hbm [shape: f32[1,128], index: 8, kind: input, shape index: {}]   ;;  %s3593_s9 = inlined_call_operand.hbm [shape: bf16[128,512], index: 9, kind: input, shape index: {}]   ;;  %s3594_s10 = inlined_call_operand.vmem [shape: f32[1,512], index: 10, kind: input, shape index: {}]   ;;  %s3595_s11 = inlined_call_operand.hbm [shape: bf16[512,128], index: 11, kind: input, shape index: {}]   ;;  %s3596_s12 = inlined_call_operand.vmem [shape: f32[1,128], index: 12, kind: input, shape index: {}]   ;;  %s3597_s13 = inlined_call_operand.vmem [shape: f32[1,128], index: 13, kind: input, shape index: {}]   ;;  %s3598_s14 = inlined_call_operand.vmem [shape: f32[1,128], index: 14, kind: input, shape index: {}]   ;;  %s3599_s15 = inlined_call_operand.hbm [shape: f32[2,8,128], index: 15, kind: output, shape index: {}]  }
   0x1   :  { %21 = vsyncpa [#allocation7], 0 }
   0x2   :  { %22 = vsyncpa [#allocation10], 0 }
   0x3   :  { %23 = vsyncpa [#allocation13], 0 }
   0x4   :  { %24 = vsyncpa [#allocation16], 0  ;;  %s43_s20 = sshll.u32 %s3585_s1, 4  ;;  %s44_s20 = int_to_ptr.hbm [resolvable:$true] %s43_s20 }
   0x5   :  { %25 = vsyncpa [#allocation5], 0  ;;  %s2906_s21 = smov [#allocation6]   ;;  %s69_s25 = sshll.u32 %s3587_s3, 4  ;;  %s70_s25 = int_to_ptr.hbm [resolvable:$true] %s69_s25 }
   0x6   :  { %s45_s22 = sshll.u32 %s2906_s21, 4  ;;  %s2907_s26 = smov 64   ;;  %s46_s22 = int_to_ptr.vmem [resolvable:$true] %s45_s22 }
   0x7   :  { %s2908_s27 = smov 4   ;;  %s2909_s28 = smov [#allocation9]  }
   0x8   :  { %51 = dma.hbm_to_vmem [thread:$0]  %s44_s20, 1024, %s46_s22, [#allocation7], %s2907_s26, %s2907_s26, %s2908_s27  }
   0x9   :  { %s71_s29 = sshll.u32 %s2909_s28, 4  ;;  %s102_s16 = sshll.u32 %s3592_s8, 4  ;;  %s72_s29 = int_to_ptr.vmem [resolvable:$true] %s71_s29  ;;  %s103_s16 = int_to_ptr.hbm [resolvable:$true] %s102_s16 }
   0xa   :  { %77 = dma.hbm_to_vmem [thread:$0]  %s70_s25, 1024, %s72_s29, [#allocation10], %s2907_s26, %s2907_s26, %s2908_s27  }
   0xb   :  { %s30_s18 = sshll.u32 %s3584_s0, 4  ;;  %s2910_s19 = smov [#allocation12]   ;;  %s31_s18 = int_to_ptr.hbm [resolvable:$true] %s30_s18 }
   0xc   :  { %s104_s21 = sshll.u32 %s2910_s19, 4  ;;  %s2911_s20 = smov [#allocation3]   ;;  %s105_s21 = int_to_ptr.vmem [resolvable:$true] %s104_s21 }
   0xd   :  { %107 = dma.hbm_to_vmem [thread:$0]  %s103_s16, 16, %s105_s21, [#allocation13]  }
   0xe   :  { %s32_s22 = sshll.u32 %s2911_s20, 4  ;;  %s2912_s23 = smov 128   ;;  %s33_s22 = int_to_ptr.vmem [resolvable:$true] %s32_s22 }
   0xf   :  { %s2913_s8 = smov 8   ;;  %s56_s28 = sshll.u32 %s3586_s2, 4  ;;  %s57_s28 = int_to_ptr.hbm [resolvable:$true] %s56_s28 }
  0x10   :  { %38 = dma.hbm_to_vmem [thread:$0]  %s31_s18, 256, %s33_s22, [#allocation4], %s2912_s23, %s2912_s23, %s2913_s8  }
  0x11   :  { %s2914_s0 = smov [#allocation8]   ;;  %s82_s16 = sshll.u32 %s3588_s4, 4  ;;  %s83_s16 = int_to_ptr.hbm [resolvable:$true] %s82_s16 }
  0x12   :  { %s58_s29 = sshll.u32 %s2914_s0, 4  ;;  %s2915_s3 = smov [#allocation11]   ;;  %s59_s29 = int_to_ptr.vmem [resolvable:$true] %s58_s29 }
  0x13   :  { %64 = dma.hbm_to_vmem [thread:$0]  %s57_s28, 1024, %s59_s29, [#allocation7], %s2907_s26, %s2907_s26, %s2908_s27  }
  0x14   :  { %s84_s17 = sshll.u32 %s2915_s3, 4  ;;  %s112_s21 = sshll.u32 %s3593_s9, 4  ;;  %s85_s17 = int_to_ptr.vmem [resolvable:$true] %s84_s17  ;;  %s113_s21 = int_to_ptr.hbm [resolvable:$true] %s112_s21 }
  0x15   :  { %90 = dma.hbm_to_vmem [thread:$0]  %s83_s16, 1024, %s85_s17, [#allocation10], %s2907_s26, %s2907_s26, %s2908_s27  }
  0x16   :  { %s2916_s2 = smov [#allocation14]   ;;  %s127_s24 = sshll.u32 %s3595_s11, 4  ;;  %s128_s24 = int_to_ptr.hbm [resolvable:$true] %s127_s24 }
  0x17   :  { %s114_s20 = sshll.u32 %s2916_s2, 4  ;;  %s2917_s25 = smov 256   ;;  %s115_s20 = int_to_ptr.vmem [resolvable:$true] %s114_s20 }
  0x18   :  { %s2918_s28 = smov 16   ;;  %s2919_s0 = smov [#allocation15]  }
  0x19   :  { %120 = dma.hbm_to_vmem [thread:$0]  %s113_s21, 4096, %s115_s20, [#allocation13], %s2917_s25, %s2917_s25, %s2918_s28  }
  0x1a   :  { %s129_s29 = sshll.u32 %s2919_s0, 4  ;;  %s130_s29 = int_to_ptr.vmem [resolvable:$true] %s129_s29 }
  0x1b   :  { %135 = dma.hbm_to_vmem [thread:$0]  %s128_s24, 4096, %s130_s29, [#allocation16], %s2907_s26, %s2907_s26, %s2908_s27  }
  0x1c   :  { %2894 = dma.done.wait [#allocation4], 256  }
  0x1d   :  { %2895 = vsyncadd [#allocation4], 4294967040 }
  0x1e   :  { %2896 = dma.done.wait [#allocation7], 2048  }
  0x1f   :  { %2897 = vsyncadd [#allocation7], 4294965248 }
  0x20   :  { %2898 = dma.done.wait [#allocation10], 2048  }
  0x21   :  { %2899 = vsyncadd [#allocation10], 4294965248 }
  0x22   :  { %2900 = dma.done.wait [#allocation13], 4112  }
  0x23   :  { %2901 = vsyncadd [#allocation13], 4294963184 }
  0x24   :  { %2902 = dma.done.wait [#allocation16], 4096  }
  0x25   :  { %2903 = vsyncadd [#allocation16], 4294963200  ;;  %v2503_v0 = vld [vmem:[#allocation6 + $0x38] sm:$0xff]  ;;  %v2502_v2 = vld [vmem:[#allocation6 + $0x30] sm:$0xff]  ;;  %vm430_vm0 = vcmask 261120   ;;  %vm469_vm1 = vcmask 64512  }
  0x26   :  { %v2511_v1 = vld [vmem:[#allocation8 + $0x38] sm:$0xff]  ;;  %246 = vmatpush.bf16.msra.mxu0 %v2503_v0  ;;  %v2510_v3 = vld [vmem:[#allocation8 + $0x30] sm:$0xff]  ;;  %v2501_v4 = vld [vmem:[#allocation6 + $0x28] sm:$0xff]  ;;  %vm497_vm2 = vcmask 1043456   ;;  %vm535_vm3 = vcmask 257024   ;;  %vm678_vm4 = vcmask 519424  }
  0x27   :  { %330 = vmatpush.bf16.msra.mxu1 %v2511_v1  ;;  %v2509_v5 = vld [vmem:[#allocation8 + $0x28] sm:$0xff]  ;;  %v2500_v6 = vld [vmem:[#allocation6 + $0x20] sm:$0xff]  ;;  %v2499_v8 = vld [vmem:[#allocation6 + $0x18] sm:$0xff]  ;;  %vm803_vm5 = vcmask 781824   ;;  %vm928_vm6 = vcmask 1044224   ;;  %s2923_s20 = smov [#allocation17]  }
  0x28   :  { %v2508_v7 = vld [vmem:[#allocation8 + $0x20] sm:$0xff]  ;;  %v2507_v9 = vld [vmem:[#allocation8 + $0x18] sm:$0xff]  ;;  %v2498_v10 = vld [vmem:[#allocation6 + $0x10] sm:$0xff]  ;;  %s2065_s4 = sshll.u32 %s2923_s20, 4  ;;  %s2067_s25 = sshll.u32 %s3599_s15, 4  ;;  %s2066_s4 = int_to_ptr.vmem [resolvable:$true] %s2065_s4  ;;  %s2068_s25 = int_to_ptr.hbm [resolvable:$true] %s2067_s25 }
  0x29   :  { %v2506_v11 = vld [vmem:[#allocation8 + $0x10] sm:$0xff]  ;;  %v2497_v12 = vld [vmem:[#allocation6 + $0x8] sm:$0xff]  ;;  %v2496_v14 = vld [vmem:[#allocation6] sm:$0xff] }
  0x2a   :  { %247 = vmatpush.bf16.msra.mxu0 %v2502_v2  ;;  %v2505_v13 = vld [vmem:[#allocation8 + $0x8] sm:$0xff]  ;;  %v2504_v15 = vld [vmem:[#allocation8] sm:$0xff]  ;;  %v3046_v16 = vld [vmem:[#allocation3] sm:$0xff] }
  0x2b   :  { %331 = vmatpush.bf16.msra.mxu1 %v2510_v3  ;;  %v3048_v17 = vld [vmem:[#allocation3 + $0x8] sm:$0xff]  ;;  %v2612_v19 = vld [vmem:[%s3590_s6] ss:$0 sm:$0xff]  ;;  %s2920_s6 = smov 96   ;;  %v2518_v37 = vld [vmem:[#allocation9 + $0x30] sm:$0xff] }
  0x2c   :  { %v3052_v18 = vpack.c.bf16 %v3048_v17, %v3046_v16  ;;  %v2611_v20 = vld [vmem:[%s3589_s5] ss:$0 sm:$0xff]  ;;  %v2519_v33 = vld [vmem:[#allocation9 + $0x38] sm:$0xff]  ;;  %v2516_v45 = vld [vmem:[#allocation9 + $0x20] sm:$0xff]  ;;  %s2921_s5 = smov 32  }
  0x2d   :  { %414 = vmatpush.bf16.msra.mxu2 %v2519_v33  ;;  %v2517_v43 = vld [vmem:[#allocation9 + $0x28] sm:$0xff]  ;;  %v2515_v47 = vld [vmem:[#allocation9 + $0x18] sm:$0xff]  ;;  %v2514_v48 = vld [vmem:[#allocation9 + $0x10] sm:$0xff] }
  0x2e   :  { %248 = vmatpush.bf16.msra.mxu0 %v2501_v4  ;;  %v2513_v49 = vld [vmem:[#allocation9 + $0x8] sm:$0xff]  ;;  %v2512_v50 = vld [vmem:[#allocation9] sm:$0xff] }
  0x2f   :  { %332 = vmatpush.bf16.msra.mxu1 %v2509_v5 }
  0x31   :  { %415 = vmatpush.bf16.msra.mxu2 %v2518_v37 }
  0x32   :  { %249 = vmatpush.bf16.msra.mxu0 %v2500_v6 }
  0x33   :  { %333 = vmatpush.bf16.msra.mxu1 %v2508_v7 }
  0x35   :  { %416 = vmatpush.bf16.msra.mxu2 %v2517_v43 }
  0x36   :  { %250 = vmatpush.bf16.msra.mxu0 %v2499_v8 }
  0x37   :  { %334 = vmatpush.bf16.msra.mxu1 %v2507_v9 }
  0x39   :  { %417 = vmatpush.bf16.msra.mxu2 %v2516_v45 }
  0x3a   :  { %251 = vmatpush.bf16.msra.mxu0 %v2498_v10 }
  0x3b   :  { %335 = vmatpush.bf16.msra.mxu1 %v2506_v11  ;;  %v2613_v11 = vld [vmem:[%s3591_s7] ss:$0 sm:$0xff] }
  0x3d   :  { %418 = vmatpush.bf16.msra.mxu2 %v2515_v47 }
  0x3e   :  { %252 = vmatpush.bf16.msra.mxu0 %v2497_v12 }
  0x3f   :  { %336 = vmatpush.bf16.msra.mxu1 %v2505_v13 }
  0x41   :  { %419 = vmatpush.bf16.msra.mxu2 %v2514_v48 }
  0x42   :  { %253 = vmatpush.bf16.msra.mxu0 %v2496_v14 }
  0x43   :  { %337 = vmatpush.bf16.msra.mxu1 %v2504_v15 }
  0x45   :  { %254 = vmatmul.bf16.vlgmr.msra.gmra.mxu0 %v3052_v18  ;;  %420 = vmatpush.bf16.msra.mxu2 %v2513_v49 }
  0x46   :  { %338 = vmatmul.bf16.vlgmr.msra.gmra.mxu1 %v3052_v18 }
  0x49   :  { %421 = vmatpush.bf16.msra.mxu2 %v2512_v50 }
  0x4c   :  { %422 = vmatmul.bf16.vlgmr.msra.gmra.mxu2 %v3052_v18 }
  0xc2   :  { %v255_v21 = vpop.f32.mrf.mxu0 }
  0xc3   :  { %v339_v22 = vpop.f32.mrf.mxu1  ;;  %v256_v24 = vadd.f32 %v2611_v20, %v255_v21 }
  0xc4   :  { %v340_v23 = vadd.f32 %v2612_v19, %v339_v22 }
  0xc5   :  { %v260_v28 = vpack.c.bf16 %v256_v24, %v256_v24 }
  0xc6   :  { %v344_v25 = vpack.c.bf16 %v340_v23, %v340_v23 }
  0xc7   :  { %v539_v34 = vunpack.c.l.b16 %v260_v28 }
  0xc8   :  { %v544_v26 = vunpack.c.l.b16 %v344_v25  ;;  %v435_v27 = vsel %vm430_vm0, %v344_v25, 0 }
  0xc9   :  { %444 = vmatpush.bf16.xpose.msra.mxu3 %v435_v27  ;;  %v540_v40 = vpack.c.b16 %v539_v34, %v539_v34 }
  0xca   :  { %v545_v29 = vpack.c.b16 %v544_v26, %v544_v26  ;;  %v257_v30 = vpop.f32.mrf.mxu0 }
  0xcb   :  { %v341_v31 = vpop.f32.mrf.mxu1  ;;  %v258_v35 = vadd.f32 %v2611_v20, %v257_v30 }
  0xcc   :  { %v342_v32 = vadd.f32 %v2612_v19, %v341_v31  ;;  %683 = vrot.lane.b32.xlu2 %v545_v29, %s2907_s26  ;;  %546 = vrot.lane.b32.xlu0 %v545_v29, %s2920_s6 }
  0xcd   :  { %v261_v41 = vpack.c.bf16 %v258_v35, %v258_v35 }
  0xce   :  { %v345_v36 = vpack.c.bf16 %v342_v32, %v342_v32 }
  0xcf   :  { %v568_v44 = vunpack.c.l.b16 %v261_v41  ;;  %v423_v12 = vpop.f32.mrf.mxu2 }
  0xd0   :  { %v573_v38 = vunpack.c.l.b16 %v345_v36  ;;  %2180 = vmatmul.msk.bf16.vlgmr.msra.gmra.mxu3 %vm430_vm0, %v260_v28  ;;  %v454_v39 = vsel %vm430_vm0, %v345_v36, 0  ;;  %v424_v13 = vadd.f32 %v2613_v11, %v423_v12 }
  0xd1   :  { %463 = vmatpush.bf16.xpose.msrb.mxu3 %v454_v39  ;;  %v569_v46 = vpack.c.b16 %v568_v44, %v568_v44 }
  0xd2   :  { %v574_v42 = vpack.c.b16 %v573_v38, %v573_v38  ;;  %v428_v14 = vpack.c.bf16 %v424_v13, %v424_v13 }
  0xd4   :  { %575 = vrot.lane.b32.xlu1 %v574_v42, %s2920_s6  ;;  %706 = vrot.lane.b32.xlu2 %v574_v42, %s2907_s26  ;;  %v499_v15 = vsel %vm497_vm2, %v428_v14, 0  ;;  %v621_v18 = vunpack.c.l.b16 %v428_v14 }
  0xd5   :  { %541 = vrot.lane.b32.xlu0 %v540_v40, %s2920_s6 }
  0xd6   :  { %v3097_v19 = vpack.c.b16 %v621_v18, %v621_v18 }
  0xd7   :  { %v425_v20 = vpop.f32.mrf.mxu2 }
  0xd8   :  { %v426_v21 = vadd.f32 %v2613_v11, %v425_v20 }
  0xd9   :  { %508 = vmatpush.bf16.msra.mxu3 %v499_v15 }
  0xda   :  { %v429_v22 = vpack.c.bf16 %v426_v21, %v426_v21 }
  0xdc   :  { %808 = vrot.lane.b32.xlu2 %v545_v29, %s2921_s5  ;;  %570 = vrot.lane.b32.xlu1 %v569_v46, %s2920_s6  ;;  %v518_v23 = vsel %vm497_vm2, %v429_v22, 0  ;;  %v645_v43 = vunpack.c.l.b16 %v429_v22 }
  0xdd   :  { %681 = vrot.lane.b32.xlu0 %v540_v40, %s2907_s26  ;;  %527 = vmatpush.bf16.msrb.mxu0 %v518_v23 }
  0xe0   :  { %2181 = vmatmul.msk.bf16.vlgmr.msrb.gmra.mxu3 %vm430_vm0, %v261_v41 }
  0xe4   :  { %829 = vrot.lane.b32.xlu2 %v569_v46, %s2921_s5  ;;  %704 = vrot.lane.b32.xlu1 %v569_v46, %s2907_s26  ;;  %v3107_v46 = vpack.c.b16 %v645_v43, %v645_v43 }
  0xe5   :  { %831 = vrot.lane.b32.xlu0 %v574_v42, %s2921_s5 }
  0xec   :  { %806 = vrot.lane.b32.xlu1 %v540_v40, %s2921_s5 }
 0x126   :  { %v684_v51 = vpop.permute.xlu2 %683 }
 0x127   :  { %v689_v52 = vsel %vm430_vm0, %v684_v51, 0 }
 0x128   :  { %698 = vmatpush.bf16.xpose.msrb.mxu1 %v689_v52 }
 0x12e   :  { %v707_v53 = vpop.permute.xlu2 %706 }
 0x12f   :  { %v712_v61 = vsel %vm430_vm0, %v707_v53, 0 }
 0x136   :  { %v809_v54 = vpop.permute.xlu2 %808 }
 0x137   :  { %v814_v55 = vsel %vm430_vm0, %v809_v54, 0 }
 0x138   :  { %823 = vmatpush.bf16.xpose.msra.mxu1 %v814_v55 }
 0x13e   :  { %v547_v56 = vpop.permute.xlu0 %546  ;;  %v830_v10 = vpop.permute.xlu2 %829 }
 0x13f   :  { %v552_v57 = vsel %vm430_vm0, %v547_v56, 0 }
 0x140   :  { %561 = vmatpush.bf16.xpose.msrb.mxu2 %v552_v57 }
 0x146   :  { %v576_v58 = vpop.permute.xlu1 %575 }
 0x147   :  { %v581_v59 = vsel %vm430_vm0, %v576_v58, 0  ;;  %v542_v60 = vpop.permute.xlu0 %541 }
 0x148   :  { %2184 = vmatmul.msk.bf16.vlgmr.msrb.gmra.mxu2 %vm430_vm0, %v542_v60 }
 0x149   :  { %590 = vmatpush.bf16.xpose.msra.mxu2 %v581_v59 }
 0x14e   :  { %v571_v62 = vpop.permute.xlu1 %570 }
 0x14f   :  { %v682_v63 = vpop.permute.xlu0 %681 }
 0x150   :  { %2188 = vmatmul.msk.bf16.vlgmr.msrb.gmra.mxu1 %vm430_vm0, %v682_v63 }
 0x151   :  { %721 = vmatpush.bf16.xpose.msrb.mxu2 %v712_v61 }
 0x153   :  { %v446_v0 = vpop.f32.mrf.mxu3 }
 0x154   :  { %v470_v1 = vsel %vm469_vm1, %v446_v0, -inf }
 0x155   :  { %471 = vmax.xlane.f32.xlu0 %v470_v1 }
 0x156   :  { %v705_v2 = vpop.permute.xlu1 %704 }
 0x157   :  { %v832_v3 = vpop.permute.xlu0 %831 }
 0x158   :  { %v837_v4 = vsel %vm430_vm0, %v832_v3, 0  ;;  %2185 = vmatmul.msk.bf16.vlgmr.msra.gmra.mxu2 %vm430_vm0, %v571_v62 }
 0x159   :  { %846 = vmatpush.bf16.xpose.msra.mxu2 %v837_v4 }
 0x15b   :  { %v448_v5 = vpop.f32.mrf.mxu3 }
 0x15e   :  { %v807_v6 = vpop.permute.xlu1 %806 }
 0x160   :  { %2192 = vmatmul.msk.bf16.vlgmr.msra.gmra.mxu1 %vm430_vm0, %v807_v6 }
 0x163   :  { %v465_v7 = vpop.f32.mrf.mxu3 }
 0x164   :  { %v473_v8 = vsel %vm469_vm1, %v465_v7, -inf }
 0x165   :  { %474 = vmax.xlane.f32.xlu1 %v473_v8 }
 0x168   :  { %2189 = vmatmul.msk.bf16.vlgmr.msrb.gmra.mxu2 %vm430_vm0, %v705_v2 }
 0x16b   :  { %v467_v9 = vpop.f32.mrf.mxu3 }
 0x178   :  { %2193 = vmatmul.msk.bf16.vlgmr.msra.gmra.mxu2 %vm430_vm0, %v830_v10 }
 0x17e   :  { %751 = vrot.lane.b32.xlu1 %v3097_v19, %s2907_s26 }
 0x1c8   :  { %v472_v24 = vpop.xlane.xlu0 %471 }
 0x1c9   :  { %v476_v25 = vsub.f32 %v446_v0, %v472_v24 }
 0x1cb   :  { %v478_v26 = vmul.f32 1.442695, %v476_v25  ;;  %v563_v27 = vpop.f32.mrf.mxu2 }
 0x1cc   :  { %v596_v28 = vsel %vm469_vm1, %v563_v27, -inf }
 0x1cd   :  { %2618 = vpow2.f32 %v478_v26  ;;  %597 = vmax.xlane.f32.xlu2 %v596_v28  ;;  %v700_v29 = vpop.f32.mrf.mxu1 }
 0x1ce   :  { %v727_v30 = vsel %vm469_vm1, %v700_v29, -inf }
 0x1cf   :  { %728 = vmax.xlane.f32.xlu0 %v727_v30 }
 0x1d3   :  { %v2619_v31 = vpop.eup %2618  ;;  %v565_v32 = vpop.f32.mrf.mxu2 }
 0x1d4   :  { %v482_v33 = vsel %vm469_vm1, %v2619_v31, 0.0 }
 0x1d5   :  { %v702_v34 = vpop.f32.mrf.mxu1 }
 0x1d7   :  { %483 = vadd.xlane.f32.xlu0 %v482_v33 }
 0x1d8   :  { %v475_v35 = vpop.xlane.xlu1 %474 }
 0x1d9   :  { %v477_v36 = vsub.f32 %v465_v7, %v475_v35 }
 0x1db   :  { %v592_v37 = vpop.f32.mrf.mxu2  ;;  %v480_v40 = vmul.f32 1.442695, %v477_v36 }
 0x1dc   :  { %v599_v38 = vsel %vm469_vm1, %v592_v37, -inf }
 0x1dd   :  { %600 = vmax.xlane.f32.xlu2 %v599_v38  ;;  %v825_v39 = vpop.f32.mrf.mxu1  ;;  %2620 = vpow2.f32 %v480_v40 }
 0x1de   :  { %v852_v42 = vsel %vm469_vm1, %v825_v39, -inf }
 0x1e3   :  { %v594_v41 = vpop.f32.mrf.mxu2  ;;  %v2621_v45 = vpop.eup %2620 }
 0x1e4   :  { %v485_v49 = vsel %vm469_vm1, %v2621_v45, 0.0 }
 0x1e5   :  { %853 = vmax.xlane.f32.xlu2 %v852_v42  ;;  %v827_v44 = vpop.f32.mrf.mxu1 }
 0x1eb   :  { %v723_v47 = vpop.f32.mrf.mxu2  ;;  %647 = vrot.lane.b32.xlu0 %v3107_v46, %s2920_s6 }
 0x1ec   :  { %v730_v48 = vsel %vm469_vm1, %v723_v47, -inf }
 0x1ed   :  { %731 = vmax.xlane.f32.xlu1 %v730_v48  ;;  %486 = vadd.xlane.f32.xlu2 %v485_v49 }
 0x1f0   :  { %v752_v7 = vpop.permute.xlu1 %751 }
 0x1f1   :  { %v757_v28 = vsel %vm497_vm2, %v752_v7, 0 }
 0x1f3   :  { %v725_v50 = vpop.f32.mrf.mxu2 }
 0x1fb   :  { %v3113_v51 = vpop.f32.mrf.mxu2 }
 0x1fc   :  { %v855_v52 = vsel %vm469_vm1, %v3113_v51, -inf }
 0x1fd   :  { %856 = vmax.xlane.f32.xlu1 %v855_v52 }
 0x203   :  { %v850_v53 = vpop.f32.mrf.mxu2 }
 0x205   :  { %623 = vrot.lane.b32.xlu2 %v3097_v19, %s2920_s6 }
 0x240   :  { %v598_v54 = vpop.xlane.xlu2 %597 }
 0x241   :  { %v602_v55 = vsub.f32 %v563_v27, %v598_v54 }
 0x242   :  { %v729_v56 = vpop.xlane.xlu0 %728 }
 0x243   :  { %v604_v57 = vmul.f32 1.442695, %v602_v55  ;;  %v733_v58 = vsub.f32 %v700_v29, %v729_v56 }
 0x245   :  { %2622 = vpow2.f32 %v604_v57  ;;  %v735_v59 = vmul.f32 1.442695, %v733_v58 }
 0x247   :  { %2624 = vpow2.f32 %v735_v59 }
 0x24a   :  { %v484_v60 = vpop.xlane.xlu0 %483 }
 0x24b   :  { %v2623_v61 = vpop.eup %2622  ;;  %2626 = vrcp.f32 %v484_v60 }
 0x24c   :  { %v608_v62 = vsel %vm469_vm1, %v2623_v61, 0.0 }
 0x24d   :  { %v3120_v63 = vpop.eup %2624  ;;  %609 = vadd.xlane.f32.xlu0 %v608_v62 }
 0x24e   :  { %v739_v0 = vsel %vm469_vm1, %v3120_v63, 0.0 }
 0x24f   :  { %740 = vadd.xlane.f32.xlu1 %v739_v0 }
 0x250   :  { %v601_v1 = vpop.xlane.xlu2 %600 }
 0x251   :  { %v2627_v2 = vpop.eup %2626  ;;  %v603_v3 = vsub.f32 %v592_v37, %v601_v1 }
 0x252   :  { %v490_v4 = vmul.f32 %v2627_v2, %v2619_v31 }
 0x253   :  { %v606_v5 = vmul.f32 1.442695, %v603_v3 }
 0x254   :  { %v492_v6 = vpack.c.bf16 %v490_v4, %v490_v4 }
 0x255   :  { %2628 = vpow2.f32 %v606_v5 }
 0x256   :  { %2182 = vmatmul.msk.bf16.vlgmr.msra.gmra.mxu3 %vm469_vm1, %v492_v6 }
 0x258   :  { %v854_v8 = vpop.xlane.xlu2 %853 }
 0x259   :  { %v858_v9 = vsub.f32 %v825_v39, %v854_v8 }
 0x25b   :  { %v2629_v10 = vpop.eup %2628  ;;  %v860_v11 = vmul.f32 1.442695, %v858_v9 }
 0x25c   :  { %v611_v12 = vsel %vm469_vm1, %v2629_v10, 0.0 }
 0x25d   :  { %2630 = vpow2.f32 %v860_v11  ;;  %v648_v13 = vpop.permute.xlu0 %647  ;;  %612 = vadd.xlane.f32.xlu1 %v611_v12 }
 0x25e   :  { %v653_v14 = vsel %vm497_vm2, %v648_v13, 0 }
 0x25f   :  { %662 = vmatpush.bf16.msra.mxu0 %v653_v14 }
 0x260   :  { %v487_v15 = vpop.xlane.xlu2 %486  ;;  %v732_v18 = vpop.xlane.xlu1 %731 }
 0x261   :  { %2632 = vrcp.f32 %v487_v15  ;;  %v734_v20 = vsub.f32 %v723_v47, %v732_v18  ;;  %772 = vrot.lane.b32.xlu0 %v3107_v46, %s2907_s26 }
 0x263   :  { %v3129_v21 = vpop.eup %2630  ;;  %v737_v22 = vmul.f32 1.442695, %v734_v20 }
 0x264   :  { %v864_v23 = vsel %vm469_vm1, %v3129_v21, 0.0 }
 0x265   :  { %2634 = vpow2.f32 %v737_v22  ;;  %865 = vadd.xlane.f32.xlu2 %v864_v23 }
 0x267   :  { %v2633_v24 = vpop.eup %2632 }
 0x268   :  { %v491_v25 = vmul.f32 %v2633_v24, %v2621_v45  ;;  %v624_v26 = vpop.permute.xlu2 %623 }
 0x269   :  { %v629_v27 = vsel %vm497_vm2, %v624_v26, 0 }
 0x26a   :  { %638 = vmatpush.bf16.msrb.mxu3 %v629_v27  ;;  %v493_v29 = vpack.c.bf16 %v491_v25, %v491_v25 }
 0x26b   :  { %v2635_v30 = vpop.eup %2634 }
 0x26c   :  { %2183 = vmatmul.msk.bf16.vlgmr.msrb.gmra.mxu0 %vm469_vm1, %v493_v29  ;;  %v742_v31 = vsel %vm469_vm1, %v2635_v30, 0.0 }
 0x26d   :  { %743 = vadd.xlane.f32.xlu1 %v742_v31  ;;  %v2527_v31 = vld [vmem:[#allocation11 + $0x30] sm:$0xff] }
 0x26e   :  { %766 = vmatpush.bf16.msra.mxu3 %v757_v28 }
 0x270   :  { %v857_v32 = vpop.xlane.xlu1 %856 }
 0x271   :  { %v859_v33 = vsub.f32 %v3113_v51, %v857_v32 }
 0x273   :  { %v862_v34 = vmul.f32 1.442695, %v859_v33  ;;  %v2526_v33 = vld [vmem:[#allocation11 + $0x28] sm:$0xff] }
 0x275   :  { %2636 = vpow2.f32 %v862_v34  ;;  %v2525_v34 = vld [vmem:[#allocation11 + $0x20] sm:$0xff] }
 0x27b   :  { %v2637_v35 = vpop.eup %2636 }
 0x27c   :  { %v867_v36 = vsel %vm469_vm1, %v2637_v35, 0.0 }
 0x286   :  { %876 = vrot.lane.b32.xlu1 %v3097_v19, %s2921_s5 }
 0x28b   :  { %868 = vadd.xlane.f32.xlu0 %v867_v36  ;;  %v2524_v36 = vld [vmem:[#allocation11 + $0x18] sm:$0xff] }
 0x28e   :  { %897 = vrot.lane.b32.xlu1 %v3107_v46, %s2921_s5 }
 0x2c0   :  { %v610_v37 = vpop.xlane.xlu0 %609 }
 0x2c1   :  { %2638 = vrcp.f32 %v610_v37  ;;  %v2523_v37 = vld [vmem:[#allocation11 + $0x10] sm:$0xff] }
 0x2c2   :  { %v741_v40 = vpop.xlane.xlu1 %740 }
 0x2c3   :  { %2640 = vrcp.f32 %v741_v40  ;;  %v2521_v40 = vld [vmem:[#allocation11] sm:$0xff] }
 0x2c7   :  { %v2639_v38 = vpop.eup %2638 }
 0x2c8   :  { %v616_v39 = vmul.f32 %v2639_v38, %v2623_v61 }
 0x2c9   :  { %v2641_v43 = vpop.eup %2640 }
 0x2ca   :  { %v618_v41 = vpack.c.bf16 %v616_v39, %v616_v39  ;;  %v747_v45 = vmul.f32 %v2641_v43, %v3120_v63  ;;  %v2522_v39 = vld [vmem:[#allocation11 + $0x8] sm:$0xff] }
 0x2cc   :  { %2186 = vmatmul.msk.bf16.vlgmr.msrb.gmra.mxu3 %vm469_vm1, %v618_v41  ;;  %v749_v49 = vpack.c.bf16 %v747_v45, %v747_v45 }
 0x2d0   :  { %v613_v42 = vpop.xlane.xlu1 %612 }
 0x2d1   :  { %2642 = vrcp.f32 %v613_v42 }
 0x2d3   :  { %v773_v19 = vpop.permute.xlu0 %772 }
 0x2d4   :  { %v778_v44 = vsel %vm497_vm2, %v773_v19, 0  ;;  %v2614_v19 = vld [vmem:[#allocation12] ss:$0 sm:$0xff] }
 0x2d5   :  { %787 = vmatpush.bf16.msrb.mxu0 %v778_v44 }
 0x2d7   :  { %v2643_v47 = vpop.eup %2642 }
 0x2d8   :  { %v617_v46 = vmul.f32 %v2643_v47, %v2629_v10  ;;  %v866_v59 = vpop.xlane.xlu2 %865 }
 0x2d9   :  { %v510_v48 = vpop.f32.mrf.mxu3 }
 0x2da   :  { %v619_v50 = vpack.c.bf16 %v617_v46, %v617_v46  ;;  %v533_v51 = vpack.c.bf16 %v510_v48, %v510_v48 }
 0x2dc   :  { %536 = vst.msk [vmem:[#allocation2] sm:$0xf] %vm535_vm3, %v533_v51  ;;  %2187 = vmatmul.msk.bf16.vlgmr.msra.gmra.mxu0 %vm469_vm1, %v619_v50  ;;  %2190 = vmatmul.msk.bf16.vlgmr.msra.gmra.mxu3 %vm469_vm1, %v749_v49  ;;  %v2922_v50 = vmov 128.0  }
 0x2e0   :  { %v744_v52 = vpop.xlane.xlu1 %743 }
 0x2e1   :  { %2644 = vrcp.f32 %v744_v52  ;;  %v512_v53 = vpop.f32.mrf.mxu3 }
 0x2e2   :  { %2646 = vrcp.f32 %v866_v59 }
 0x2e7   :  { %v2645_v54 = vpop.eup %2644 }
 0x2e8   :  { %v748_v55 = vmul.f32 %v2645_v54, %v2635_v30  ;;  %v2647_v61 = vpop.eup %2646  ;;  %v2528_v30 = vld [vmem:[#allocation11 + $0x38] sm:$0xff] }
 0x2e9   :  { %v529_v56 = vpop.f32.mrf.mxu0  ;;  %v872_v62 = vmul.f32 %v2647_v61, %v3129_v21  ;;  %1007 = vmatpush.bf16.msrb.mxu1 %v2528_v30  ;;  %v2316_v30 = vld [vmem:[#allocation14 + $0xb0] sm:$0xf0] }
 0x2ea   :  { %v750_v57 = vpack.c.bf16 %v748_v55, %v748_v55  ;;  %v534_v58 = vpack.c.bf16 %v529_v56, %v529_v56 }
 0x2eb   :  { %v874_v1 = vpack.c.bf16 %v872_v62, %v872_v62 }
 0x2ec   :  { %537 = vst.msk [vmem:[#allocation2 + $0x4] sm:$0xf] %vm535_vm3, %v534_v58  ;;  %2191 = vmatmul.msk.bf16.vlgmr.msrb.gmra.mxu0 %vm469_vm1, %v750_v57 }
 0x2ed   :  { %1008 = vmatpush.bf16.msrb.mxu1 %v2527_v31  ;;  %v2322_v31 = vld [vmem:[#allocation14 + $0xa8] sm:$0xf] }
 0x2f1   :  { %v531_v60 = vpop.f32.mrf.mxu0  ;;  %1009 = vmatpush.bf16.msrb.mxu1 %v2526_v33 }
 0x2f5   :  { %1010 = vmatpush.bf16.msrb.mxu1 %v2525_v34 }
 0x2f8   :  { %v877_v63 = vpop.permute.xlu1 %876 }
 0x2f9   :  { %v882_v0 = vsel %vm497_vm2, %v877_v63, 0  ;;  %1011 = vmatpush.bf16.msrb.mxu1 %v2524_v36  ;;  %v2346_v63 = vld [vmem:[#allocation14 + $0xe0] sm:$0xf]  ;;  %v2324_v36 = vld [vmem:[#allocation14 + $0xb8] sm:$0xf0] }
 0x2fa   :  { %891 = vmatpush.bf16.msrb.mxu3 %v882_v0  ;;  %v2559_v0 = vld [vmem:[#allocation14 + $0xec] sm:$0xf0] }
 0x2fd   :  { %2194 = vmatmul.msk.bf16.vlgmr.msrb.gmra.mxu3 %vm469_vm1, %v874_v1  ;;  %1012 = vmatpush.bf16.msrb.mxu1 %v2523_v37  ;;  %v2557_v1 = vld [vmem:[#allocation14 + $0xe4] sm:$0xf] }
 0x2fe   :  { %v869_v2 = vpop.xlane.xlu0 %868 }
 0x2ff   :  { %2648 = vrcp.f32 %v869_v2  ;;  %v2347_v2 = vor.u32 %v2559_v0, %v2346_v63  ;;  %v2539_v63 = vld [vmem:[#allocation14 + $0x4c] sm:$0xf0]  ;;  %v2537_v0 = vld [vmem:[#allocation14 + $0x44] sm:$0xf] }
 0x300   :  { %v898_v3 = vpop.permute.xlu1 %897  ;;  %2650 = vrcp.f32 %v2922_v50  ;;  %v2543_v50 = vld [vmem:[#allocation14 + $0x6c] sm:$0xf0] }
 0x301   :  { %v903_v4 = vsel %vm497_vm2, %v898_v3, 0  ;;  %1013 = vmatpush.bf16.msrb.mxu1 %v2522_v39  ;;  %v2348_v3 = vld [vmem:[#allocation14 + $0xf0] sm:$0xf0]  ;;  %1285 = vmatpush.bf16.msrb.mxu2 %v2347_v2  ;;  %v2547_v39 = vld [vmem:[#allocation14 + $0x8c] sm:$0xf0] }
 0x302   :  { %912 = vmatpush.bf16.msra.mxu0 %v903_v4  ;;  %v2354_v4 = vld [vmem:[#allocation14 + $0xe8] sm:$0xf]  ;;  %v2268_v2 = vld [vmem:[#allocation14 + $0x50] sm:$0xf0] }
 0x305   :  { %v2649_v5 = vpop.eup %2648  ;;  %1014 = vmatpush.bf16.msrb.mxu1 %v2521_v40  ;;  %v2545_v40 = vld [vmem:[#allocation14 + $0x84] sm:$0xf] }
 0x306   :  { %v873_v6 = vmul.f32 %v2649_v5, %v2637_v35  ;;  %v2651_v51 = vpop.eup %2650  ;;  %v2560_v5 = vld [vmem:[#allocation14 + $0xf4] sm:$0xf0] }
 0x307   :  { %v1030_v52 = vmul.f32 128.0, %v2651_v51  ;;  %vm1034_vm7 = vweird.f32 %v2651_v51 }
 0x308   :  { %v875_v7 = vpack.c.bf16 %v873_v6, %v873_v6  ;;  %v2351_v6 = vor.u32 %v2557_v1, %v2348_v3  ;;  %v2274_v3 = vld [vmem:[#allocation14 + $0x48] sm:$0xf] }
 0x309   :  { %v1031_v53 = vsub.f32 1.0, %v1030_v52 }
 0x30a   :  { %2195 = vmatmul.msk.bf16.vlgmr.msra.gmra.mxu0 %vm469_vm1, %v875_v7  ;;  %v2355_v7 = vor.u32 %v2560_v5, %v2354_v4  ;;  %1299 = vmatpush.bf16.msra.mxu3 %v2351_v6  ;;  %v2540_v4 = vld [vmem:[#allocation14 + $0x54] sm:$0xf0]  ;;  %v2271_v5 = vor.u32 %v2537_v0, %v2268_v2 }
 0x30b   :  { %v1032_v54 = vmul.f32 %v2651_v51, %v1031_v53  ;;  %v2284_v53 = vld [vmem:[#allocation14 + $0x70] sm:$0xf0]  ;;  %v2275_v6 = vor.u32 %v2540_v4, %v2274_v3 }
 0x30c   :  { %1313 = vmatpush.bf16.msrb.mxu0 %v2355_v7  ;;  %v2538_v7 = vld [vmem:[#allocation14 + $0x4c] sm:$0xf] }
 0x30d   :  { %v1033_v55 = vadd.f32 %v2651_v51, %v1032_v54  ;;  %v2290_v54 = vld [vmem:[#allocation14 + $0x68] sm:$0xf] }
 0x30f   :  { %v3164_v56 = vsel %vm1034_vm7, %v2651_v51, %v1033_v55  ;;  %v2541_v51 = vld [vmem:[#allocation14 + $0x64] sm:$0xf]  ;;  %v2544_v55 = vld [vmem:[#allocation14 + $0x74] sm:$0xf0] }
 0x34f   :  { %v640_v8 = vpop.f32.mrf.mxu3 }
 0x350   :  { %v668_v9 = vpack.c.bf16 %v640_v8, %v640_v8  ;;  %v2558_v8 = vld [vmem:[#allocation14 + $0xec] sm:$0xf] }
 0x352   :  { %672 = vrot.lane.b32.xlu1 %v668_v9, %s2921_s5  ;;  %v2356_v9 = vld [vmem:[#allocation14 + $0xf8] sm:$0xf0] }
 0x357   :  { %v642_v10 = vpop.f32.mrf.mxu3 }
 0x358   :  { %v2359_v10 = vor.u32 %v2558_v8, %v2356_v9  ;;  %v2276_v8 = vld [vmem:[#allocation14 + $0x58] sm:$0xf0] }
 0x359   :  { %v664_v11 = vpop.f32.mrf.mxu0  ;;  %v2279_v9 = vor.u32 %v2538_v7, %v2276_v8 }
 0x35a   :  { %v669_v12 = vpack.c.bf16 %v664_v11, %v664_v11  ;;  %v2330_v11 = vld [vmem:[#allocation14 + $0xc0] sm:$0xf]  ;;  %1327 = vmatpush.bf16.msra.mxu1 %v2359_v10 }
 0x35b   :  { %v2250_v10 = vld [vmem:[#allocation14 + $0x20] sm:$0xf] }
 0x35c   :  { %674 = vrot.lane.b32.xlu2 %v669_v12, %s2921_s5  ;;  %v2555_v12 = vld [vmem:[#allocation14 + $0xcc] sm:$0xf0] }
 0x35f   :  { %v768_v13 = vpop.f32.mrf.mxu3 }
 0x360   :  { %v793_v14 = vpack.c.bf16 %v768_v13, %v768_v13  ;;  %v2553_v13 = vld [vmem:[#allocation14 + $0xc4] sm:$0xf] }
 0x361   :  { %v666_v15 = vpop.f32.mrf.mxu0 }
 0x362   :  { %797 = vrot.lane.b32.xlu1 %v793_v14, %s2907_s26  ;;  %v2331_v14 = vor.u32 %v2555_v12, %v2330_v11  ;;  %v2332_v15 = vld [vmem:[#allocation14 + $0xd0] sm:$0xf0]  ;;  %v2535_v11 = vld [vmem:[#allocation14 + $0x2c] sm:$0xf0]  ;;  %v2533_v12 = vld [vmem:[#allocation14 + $0x24] sm:$0xf] }
 0x364   :  { %1286 = vmatpush.bf16.msrb.mxu2 %v2331_v14  ;;  %v2252_v14 = vld [vmem:[#allocation14 + $0x30] sm:$0xf0] }
 0x367   :  { %v770_v18 = vpop.f32.mrf.mxu3 }
 0x368   :  { %v2338_v18 = vld [vmem:[#allocation14 + $0xc8] sm:$0xf] }
 0x369   :  { %v789_v20 = vpop.f32.mrf.mxu0 }
 0x36a   :  { %v794_v21 = vpack.c.bf16 %v789_v20, %v789_v20  ;;  %v2556_v20 = vld [vmem:[#allocation14 + $0xd4] sm:$0xf0] }
 0x36c   :  { %799 = vrot.lane.b32.xlu0 %v794_v21, %s2907_s26  ;;  %v2335_v21 = vor.u32 %v2553_v13, %v2332_v15  ;;  %v2251_v13 = vor.u32 %v2535_v11, %v2250_v10  ;;  %v2258_v15 = vld [vmem:[#allocation14 + $0x28] sm:$0xf] }
 0x36e   :  { %1300 = vmatpush.bf16.msra.mxu3 %v2335_v21 }
 0x371   :  { %v791_v22 = vpop.f32.mrf.mxu0 }
 0x372   :  { %v2339_v22 = vor.u32 %v2556_v20, %v2338_v18  ;;  %v2536_v18 = vld [vmem:[#allocation14 + $0x34] sm:$0xf0]  ;;  %v2255_v20 = vor.u32 %v2533_v12, %v2252_v14 }
 0x373   :  { %v2259_v21 = vor.u32 %v2536_v18, %v2258_v15 }
 0x374   :  { %1314 = vmatpush.bf16.msrb.mxu0 %v2339_v22  ;;  %v2534_v22 = vld [vmem:[#allocation14 + $0x2c] sm:$0xf] }
 0x380   :  { %v893_v23 = vpop.f32.mrf.mxu3 }
 0x381   :  { %v918_v24 = vpack.c.bf16 %v893_v23, %v893_v23  ;;  %v2554_v23 = vld [vmem:[#allocation14 + $0xcc] sm:$0xf] }
 0x383   :  { %922 = vrot.lane.b32.xlu1 %v918_v24, %s2920_s6  ;;  %v2340_v24 = vld [vmem:[#allocation14 + $0xd8] sm:$0xf0] }
 0x387   :  { %v914_v25 = vpop.f32.mrf.mxu0 }
 0x388   :  { %v919_v26 = vpack.c.bf16 %v914_v25, %v914_v25  ;;  %v895_v27 = vpop.f32.mrf.mxu3  ;;  %v2343_v25 = vor.u32 %v2554_v23, %v2340_v24  ;;  %v2260_v23 = vld [vmem:[#allocation14 + $0x38] sm:$0xf0]  ;;  %v2234_v24 = vld [vmem:[#allocation14] sm:$0xf] }
 0x389   :  { %v2551_v27 = vld [vmem:[#allocation14 + $0xac] sm:$0xf0] }
 0x38a   :  { %1328 = vmatpush.bf16.msra.mxu1 %v2343_v25 }
 0x38b   :  { %924 = vrot.lane.b32.xlu1 %v919_v26, %s2920_s6  ;;  %v2314_v26 = vld [vmem:[#allocation14 + $0xa0] sm:$0xf] }
 0x38f   :  { %v916_v28 = vpop.f32.mrf.mxu0 }
 0x390   :  { %v2549_v28 = vld [vmem:[#allocation14 + $0xa4] sm:$0xf] }
 0x391   :  { %v2319_v33 = vor.u32 %v2549_v28, %v2316_v30  ;;  %v2529_v28 = vld [vmem:[#allocation14 + $0x4] sm:$0xf] }
 0x393   :  { %1301 = vmatpush.bf16.msra.mxu3 %v2319_v33  ;;  %v2242_v33 = vld [vmem:[#allocation14 + $0x8] sm:$0xf] }
 0x3b6   :  { %v675_v29 = vpop.permute.xlu2 %674 }
 0x3b7   :  { %680 = vst.msk [vmem:[#allocation2 + $0x4] sm:$0xf] %vm678_vm4, %v675_v29  ;;  %v2315_v29 = vor.u32 %v2551_v27, %v2314_v26  ;;  %v2263_v26 = vor.u32 %v2534_v22, %v2260_v23  ;;  %v2531_v27 = vld [vmem:[#allocation14 + $0xc] sm:$0xf0] }
 0x3b9   :  { %1287 = vmatpush.bf16.msrb.mxu2 %v2315_v29  ;;  %v2236_v29 = vld [vmem:[#allocation14 + $0x10] sm:$0xf0] }
 0x3c4   :  { %v673_v32 = vpop.permute.xlu1 %672 }
 0x3c5   :  { %679 = vst.msk [vmem:[#allocation2] sm:$0xf] %vm678_vm4, %v673_v32  ;;  %v2552_v32 = vld [vmem:[#allocation14 + $0xb4] sm:$0xf0] }
 0x3c6   :  { %v2323_v34 = vor.u32 %v2552_v32, %v2322_v31  ;;  %v2235_v31 = vor.u32 %v2531_v27, %v2234_v24  ;;  %v2239_v32 = vor.u32 %v2529_v28, %v2236_v29 }
 0x3c8   :  { %1315 = vmatpush.bf16.msrb.mxu0 %v2323_v34  ;;  %v2532_v34 = vld [vmem:[#allocation14 + $0x14] sm:$0xf0] }
 0x3d4   :  { %v798_v35 = vpop.permute.xlu1 %797 }
 0x3d5   :  { %804 = vst.msk [vmem:[#allocation2] sm:$0xf] %vm803_vm5, %v798_v35  ;;  %v2550_v35 = vld [vmem:[#allocation14 + $0xac] sm:$0xf] }
 0x3d6   :  { %v2327_v37 = vor.u32 %v2550_v35, %v2324_v36  ;;  %v2530_v35 = vld [vmem:[#allocation14 + $0xc] sm:$0xf]  ;;  %v2243_v36 = vor.u32 %v2532_v34, %v2242_v33 }
 0x3d8   :  { %1329 = vmatpush.bf16.msra.mxu1 %v2327_v37  ;;  %v2244_v37 = vld [vmem:[#allocation14 + $0x18] sm:$0xf0] }
 0x3de   :  { %v800_v38 = vpop.permute.xlu0 %799 }
 0x3df   :  { %805 = vst.msk [vmem:[#allocation2 + $0x4] sm:$0xf] %vm803_vm5, %v800_v38  ;;  %v2298_v38 = vld [vmem:[#allocation14 + $0x80] sm:$0xf] }
 0x3f5   :  { %v923_v41 = vpop.permute.xlu1 %922 }
 0x3f6   :  { %929 = vst.msk [vmem:[#allocation2] sm:$0xf] %vm928_vm6, %v923_v41  ;;  %v2299_v41 = vor.u32 %v2547_v39, %v2298_v38  ;;  %v2247_v39 = vor.u32 %v2530_v35, %v2244_v37 }
 0x3f8   :  { %1288 = vmatpush.bf16.msrb.mxu2 %v2299_v41 }
 0x3fd   :  { %v925_v42 = vpop.permute.xlu1 %924 }
 0x3fe   :  { %930 = vst.msk [vmem:[#allocation2 + $0x4] sm:$0xf] %vm928_vm6, %v925_v42  ;;  %v2300_v42 = vld [vmem:[#allocation14 + $0x90] sm:$0xf0] }
 0x405   :  { %v2520_v43 = vld [vmem:[#allocation2] sm:$0xff] }
 0x406   :  { %1015 = vmatmul.bf16.vlgmr.msrb.gmra.mxu1 %v2520_v43  ;;  %v2306_v43 = vld [vmem:[#allocation14 + $0x88] sm:$0xf] }
 0x483   :  { %v1016_v44 = vpop.f32.mrf.mxu1 }
 0x484   :  { %v1017_v45 = vadd.f32 %v2614_v19, %v1016_v44  ;;  %v2303_v44 = vor.u32 %v2545_v40, %v2300_v42 }
 0x486   :  { %v1023_v47 = vadd.f32 %v1017_v45, %v3046_v16  ;;  %1302 = vmatpush.bf16.msra.mxu3 %v2303_v44 }
 0x488   :  { %1025 = vadd.xlane.f32.xlu2 %v1023_v47 }
 0x48b   :  { %v1018_v46 = vpop.f32.mrf.mxu1 }
 0x48c   :  { %v1019_v48 = vadd.f32 %v2614_v19, %v1018_v46  ;;  %v2548_v19 = vld [vmem:[#allocation14 + $0x94] sm:$0xf0]  ;;  %v2308_v46 = vld [vmem:[#allocation14 + $0x98] sm:$0xf0] }
 0x48d   :  { %v2307_v45 = vor.u32 %v2548_v19, %v2306_v43 }
 0x48e   :  { %v1024_v49 = vadd.f32 %v1019_v48, %v3048_v17 }
 0x48f   :  { %1316 = vmatpush.bf16.msrb.mxu0 %v2307_v45 }
 0x490   :  { %1027 = vadd.xlane.f32.xlu1 %v1024_v49 }
 0x4fb   :  { %v1026_v57 = vpop.xlane.xlu2 %1025 }
 0x4fc   :  { %v1036_v58 = vmul.f32 %v3164_v56, %v1026_v57  ;;  %v2287_v57 = vor.u32 %v2541_v51, %v2284_v53 }
 0x4fe   :  { %v3167_v16 = vsub.f32 %v1023_v47, %v1036_v58  ;;  %v2546_v47 = vld [vmem:[#allocation14 + $0x8c] sm:$0xf]  ;;  %v2291_v58 = vor.u32 %v2544_v55, %v2290_v54  ;;  %1303 = vmatpush.bf16.msra.mxu3 %v2287_v57  ;;  %v2615_v55 = vld [vmem:[%s3597_s13] ss:$0 sm:$0xff] }
 0x4ff   :  { %v2311_v48 = vor.u32 %v2546_v47, %v2308_v46 }
 0x500   :  { %v1040_v59 = vmul.f32 %v3167_v16, %v3167_v16  ;;  %1317 = vmatpush.bf16.msrb.mxu0 %v2291_v58 }
 0x501   :  { %1330 = vmatpush.bf16.msra.mxu1 %v2311_v48 }
 0x502   :  { %1042 = vadd.xlane.f32.xlu0 %v1040_v59  ;;  %v2542_v59 = vld [vmem:[#allocation14 + $0x6c] sm:$0xf]  ;;  %1304 = vmatpush.bf16.msra.mxu3 %v2271_v5 }
 0x503   :  { %v1028_v17 = vpop.xlane.xlu1 %1027 }
 0x504   :  { %v1037_v60 = vmul.f32 %v3164_v56, %v1028_v17  ;;  %v2292_v17 = vld [vmem:[#allocation14 + $0x78] sm:$0xf0]  ;;  %1318 = vmatpush.bf16.msrb.mxu0 %v2275_v6 }
 0x506   :  { %v3172_v61 = vsub.f32 %v1024_v49, %v1037_v60  ;;  %v2282_v49 = vld [vmem:[#allocation14 + $0x60] sm:$0xf]  ;;  %v2295_v60 = vor.u32 %v2542_v59, %v2292_v17  ;;  %1305 = vmatpush.bf16.msra.mxu3 %v2255_v20 }
 0x507   :  { %v2283_v52 = vor.u32 %v2543_v50, %v2282_v49 }
 0x508   :  { %v1041_v62 = vmul.f32 %v3172_v61, %v3172_v61  ;;  %1331 = vmatpush.bf16.msra.mxu1 %v2295_v60  ;;  %1319 = vmatpush.bf16.msrb.mxu0 %v2259_v21  ;;  %v3186_v60 = vld [vmem:[%s3598_s14] ss:$0 sm:$0xff] }
 0x509   :  { %1289 = vmatpush.bf16.msrb.mxu2 %v2283_v52 }
 0x50a   :  { %1044 = vadd.xlane.f32.xlu2 %v1041_v62  ;;  %v2266_v62 = vld [vmem:[#allocation14 + $0x40] sm:$0xf]  ;;  %1306 = vmatpush.bf16.msra.mxu3 %v2239_v32 }
 0x50b   :  { %v2267_v1 = vor.u32 %v2539_v63, %v2266_v62 }
 0x50c   :  { %1332 = vmatpush.bf16.msra.mxu1 %v2279_v9  ;;  %1320 = vmatpush.bf16.msrb.mxu0 %v2243_v36 }
 0x50d   :  { %1290 = vmatpush.bf16.msrb.mxu2 %v2267_v1 }
 0x510   :  { %1333 = vmatpush.bf16.msra.mxu1 %v2263_v26 }
 0x511   :  { %1291 = vmatpush.bf16.msrb.mxu2 %v2251_v13 }
 0x514   :  { %1334 = vmatpush.bf16.msra.mxu1 %v2247_v39 }
 0x515   :  { %1292 = vmatpush.bf16.msrb.mxu2 %v2235_v31 }
 0x575   :  { %v1043_v25 = vpop.xlane.xlu0 %1042 }
 0x576   :  { %v1046_v30 = vmul.f32 %v1043_v25, %v3164_v56 }
 0x578   :  { %v1048_v38 = vadd.f32 1e-05, %v1046_v30 }
 0x57a   :  { %2652 = vrsqrt.f32 %v1048_v38  ;;  %vm1056_vm9 = vweird.f32 %v1048_v38 }
 0x57d   :  { %v1045_v40 = vpop.xlane.xlu2 %1044 }
 0x57e   :  { %v1047_v41 = vmul.f32 %v1045_v40, %v3164_v56 }
 0x580   :  { %v2653_v42 = vpop.eup %2652  ;;  %v1049_v43 = vadd.f32 1e-05, %v1047_v41 }
 0x581   :  { %v1051_v19 = vmul.f32 %v2653_v42, %v1048_v38  ;;  %vm1057_vm8 = vweird.f32 %v2653_v42 }
 0x582   :  { %2654 = vrsqrt.f32 %v1049_v43  ;;  %vm1058_vm10 = vmor %vm1056_vm9, %vm1057_vm8  ;;  %vm1066_vm12 = vweird.f32 %v1049_v43 }
 0x583   :  { %v1052_v44 = vmul.f32 %v2653_v42, %v1051_v19 }
 0x585   :  { %v1053_v45 = vmul.f32 0.5, %v1052_v44 }
 0x587   :  { %v1054_v47 = vsub.f32 1.5, %v1053_v45 }
 0x588   :  { %v2655_v46 = vpop.eup %2654 }
 0x589   :  { %v1055_v48 = vmul.f32 %v2653_v42, %v1054_v47  ;;  %v1061_v49 = vmul.f32 %v2655_v46, %v1049_v43  ;;  %vm1067_vm11 = vweird.f32 %v2655_v46 }
 0x58a   :  { %vm1068_vm13 = vmor %vm1066_vm12, %vm1067_vm11 }
 0x58b   :  { %v1062_v50 = vmul.f32 %v2655_v46, %v1061_v49  ;;  %v1059_v51 = vsel %vm1058_vm10, %v2653_v42, %v1055_v48 }
 0x58c   :  { %v1070_v54 = vmul.f32 %v1059_v51, %v3167_v16 }
 0x58d   :  { %v1063_v52 = vmul.f32 0.5, %v1062_v50 }
 0x58e   :  { %v1075_v17 = vmul.f32 %v2615_v55, %v1070_v54 }
 0x58f   :  { %v1064_v53 = vsub.f32 1.5, %v1063_v52 }
 0x590   :  { %v3189_v63 = vadd.f32 %v3186_v60, %v1075_v17 }
 0x591   :  { %v1065_v57 = vmul.f32 %v2655_v46, %v1064_v53 }
 0x593   :  { %v1069_v58 = vsel %vm1068_vm13, %v2655_v46, %v1065_v57 }
 0x594   :  { %v1071_v59 = vmul.f32 %v1069_v58, %v3172_v61  ;;  %v3199_v61 = vld [vmem:[%s3594_s10] sm:$0xf] }
 0x595   :  { %v1119_v1 = vperm.slane %v3199_v61, 2  ;;  %v1120_v2 = vperm.slane %v3199_v61, 3  ;;  %v1117_v7 = vperm.slane %v3199_v61, 0  ;;  %v1118_v10 = vperm.slane %v3199_v61, 1 }
 0x596   :  { %v1076_v62 = vmul.f32 %v2615_v55, %v1071_v59 }
 0x598   :  { %v3192_v16 = vadd.f32 %v3186_v60, %v1076_v62 }
 0x59a   :  { %v1082_v0 = vpack.c.bf16 %v3192_v16, %v3189_v63 }
 0x59c   :  { %1293 = vmatmul.bf16.vlgmr.msrb.gmra.mxu2 %v1082_v0  ;;  %1307 = vmatmul.bf16.vlgmr.msra.gmra.mxu3 %v1082_v0 }
 0x59d   :  { %1321 = vmatmul.bf16.vlgmr.msrb.gmra.mxu0 %v1082_v0  ;;  %1335 = vmatmul.bf16.vlgmr.msra.gmra.mxu1 %v1082_v0 }
 0x61a   :  { %v1322_v3 = vpop.f32.mrf.mxu0  ;;  %v1336_v4 = vpop.f32.mrf.mxu1 }
 0x61b   :  { %v3203_v5 = vadd.f32 %v1322_v3, %v1119_v1  ;;  %v3207_v6 = vadd.f32 %v1336_v4, %v1120_v2 }
 0x61d   :  { %v3211_v8 = vmul.f32 0.70710677, %v3203_v5  ;;  %v3214_v9 = vmul.f32 0.70710677, %v3207_v6 }
 0x61f   :  { %v1437_v11 = vmul.f32 %v3211_v8, %v3211_v8  ;;  %v1477_v12 = vmul.f32 %v3214_v9, %v3214_v9  ;;  %v1294_v13 = vpop.f32.mrf.mxu2  ;;  %v1308_v14 = vpop.f32.mrf.mxu3 }
 0x620   :  { %v3223_v15 = vadd.f32 %v1294_v13, %v1117_v7  ;;  %v3231_v21 = vadd.f32 %v1308_v14, %v1118_v10 }
 0x621   :  { %v3225_v18 = vmin.f32 %v1437_v11, 16.0  ;;  %v3227_v20 = vmin.f32 %v1477_v12, 16.0 }
 0x622   :  { %v3234_v22 = vmul.f32 0.70710677, %v3223_v15  ;;  %v3243_v29 = vmul.f32 0.70710677, %v3231_v21  ;;  %v1324_v45 = vpop.f32.mrf.mxu0 }
 0x623   :  { %v1450_v23 = vmul.f32 3.8918573e-05, %v3225_v18  ;;  %v1439_v24 = vmul.f32 2.1237322e-06, %v3225_v18  ;;  %v1479_v25 = vmul.f32 2.1237322e-06, %v3227_v20  ;;  %v3261_v52 = vadd.f32 %v1324_v45, %v1119_v1 }
 0x624   :  { %v1490_v26 = vmul.f32 3.8918573e-05, %v3227_v20  ;;  %v1357_v27 = vmul.f32 %v3234_v22, %v3234_v22  ;;  %v1397_v38 = vmul.f32 %v3243_v29, %v3243_v29 }
 0x625   :  { %v1451_v28 = vadd.f32 0.001143296, %v1450_v23  ;;  %v1440_v33 = vadd.f32 0.00028619796, %v1439_v24  ;;  %v1480_v34 = vadd.f32 0.00028619796, %v1479_v25  ;;  %v1338_v25 = vpop.f32.mrf.mxu1 }
 0x626   :  { %v1491_v30 = vadd.f32 0.001143296, %v1490_v26  ;;  %v3245_v31 = vmin.f32 %v1357_v27, 16.0  ;;  %v3257_v46 = vmin.f32 %v1397_v38, 16.0  ;;  %v3268_v0 = vmul.f32 0.70710677, %v3261_v52 }
 0x627   :  { %v1452_v32 = vmul.f32 %v1451_v28, %v3225_v18  ;;  %v1441_v42 = vmul.f32 %v1440_v33, %v3225_v18  ;;  %v1481_v43 = vmul.f32 %v1480_v34, %v3227_v20  ;;  %v3284_v34 = vadd.f32 %v1338_v25, %v1120_v2 }
 0x628   :  { %v1492_v35 = vmul.f32 %v1491_v30, %v3227_v20  ;;  %v1370_v36 = vmul.f32 3.8918573e-05, %v3245_v31  ;;  %v1359_v51 = vmul.f32 2.1237322e-06, %v3245_v31  ;;  %v1399_v58 = vmul.f32 2.1237322e-06, %v3257_v46 }
 0x629   :  { %v1453_v37 = vadd.f32 0.014752088, %v1452_v32  ;;  %v1442_v53 = vadd.f32 0.0036580483, %v1441_v42  ;;  %v1482_v54 = vadd.f32 0.0036580483, %v1481_v43  ;;  %v1597_v24 = vmul.f32 %v3268_v0, %v3268_v0  ;;  %v1296_v43 = vpop.f32.mrf.mxu2 }
 0x62a   :  { %v1493_v39 = vadd.f32 0.014752088, %v1492_v35  ;;  %v1371_v40 = vadd.f32 0.001143296, %v1370_v36  ;;  %v1360_v62 = vadd.f32 0.00028619796, %v1359_v51 }
 0x62b   :  { %v1454_v41 = vmul.f32 %v1453_v37, %v3225_v18  ;;  %v1443_v3 = vmul.f32 %v1442_v53, %v3225_v18  ;;  %v1483_v1 = vmul.f32 %v1482_v54, %v3227_v20  ;;  %v1400_v11 = vadd.f32 0.00028619796, %v1399_v58 }
 0x62c   :  { %v1494_v19 = vmul.f32 %v1493_v39, %v3227_v20  ;;  %v1372_v44 = vmul.f32 %v1371_v40, %v3245_v31  ;;  %v1410_v12 = vmul.f32 3.8918573e-05, %v3257_v46  ;;  %v1361_v23 = vmul.f32 %v1360_v62, %v3245_v31 }
 0x62d   :  { %v1455_v47 = vadd.f32 0.112945676, %v1454_v41  ;;  %v1444_v26 = vadd.f32 0.05243302, %v1443_v3  ;;  %v1484_v27 = vadd.f32 0.05243302, %v1483_v1  ;;  %v1401_v30 = vmul.f32 %v1400_v11, %v3257_v46 }
 0x62e   :  { %v1495_v48 = vadd.f32 0.112945676, %v1494_v19  ;;  %v1373_v49 = vadd.f32 0.014752088, %v1372_v44  ;;  %v1411_v32 = vadd.f32 0.001143296, %v1410_v12 }
 0x62f   :  { %v1456_v50 = vmul.f32 %v1455_v47, %v3225_v18  ;;  %v1362_v35 = vadd.f32 0.0036580483, %v1361_v23  ;;  %v3286_v36 = vmin.f32 %v1597_v24, 16.0  ;;  %v1445_v37 = vmul.f32 %v1444_v26, %v3225_v18 }
 0x630   :  { %v1496_v57 = vmul.f32 %v1495_v48, %v3227_v20  ;;  %v1374_v59 = vmul.f32 %v1373_v49, %v3245_v31  ;;  %v1485_v38 = vmul.f32 %v1484_v27, %v3227_v20  ;;  %v1402_v40 = vadd.f32 0.0036580483, %v1401_v30 }
 0x631   :  { %v1457_v55 = vadd.f32 0.4994258, %v1456_v50  ;;  %v1412_v41 = vmul.f32 %v1411_v32, %v3257_v46  ;;  %v1599_v42 = vmul.f32 2.1237322e-06, %v3286_v36  ;;  %v1610_v44 = vmul.f32 3.8918573e-05, %v3286_v36 }
 0x632   :  { %v1497_v4 = vadd.f32 0.4994258, %v1496_v57  ;;  %v1375_v14 = vadd.f32 0.112945676, %v1374_v59  ;;  %v3296_v2 = vmul.f32 0.70710677, %v3284_v34  ;;  %v1363_v45 = vmul.f32 %v1362_v35, %v3245_v31 }
 0x633   :  { %v1458_v17 = vmul.f32 %v1457_v55, %v3225_v18  ;;  %v1446_v48 = vadd.f32 0.18741608, %v1445_v37  ;;  %v3303_v49 = vadd.f32 %v1296_v43, %v1117_v7  ;;  %v1486_v50 = vadd.f32 0.18741608, %v1485_v38 }
 0x634   :  { %v1498_v28 = vmul.f32 %v1497_v4, %v3227_v20  ;;  %v1376_v33 = vmul.f32 %v1375_v14, %v3245_v31  ;;  %v1403_v51 = vmul.f32 %v1402_v40, %v3257_v46  ;;  %v1413_v53 = vadd.f32 0.014752088, %v1412_v41 }
 0x635   :  { %v3273_v13 = vadd.f32 1.0, %v1458_v17  ;;  %v1600_v54 = vadd.f32 0.00028619796, %v1599_v42  ;;  %v1611_v57 = vadd.f32 0.001143296, %v1610_v44  ;;  %v1637_v58 = vmul.f32 %v3296_v2, %v3296_v2 }
 0x636   :  { %v3290_v39 = vadd.f32 1.0, %v1498_v28  ;;  %v1377_v19 = vadd.f32 0.4994258, %v1376_v33  ;;  %v1364_v17 = vadd.f32 0.05243302, %v1363_v45  ;;  %v1447_v7 = vmul.f32 %v1446_v48, %v3225_v18 }
 0x637   :  { %2656 = vrcp.f32 %v3273_v13  ;;  %v1601_v62 = vmul.f32 %v1600_v54, %v3286_v36  ;;  %v1487_v3 = vmul.f32 %v1486_v50, %v3227_v20  ;;  %v1404_v1 = vadd.f32 0.05243302, %v1403_v51  ;;  %v2592_v54 = vld [vmem:[#allocation15 + $0xf8] sm:$0xff] }
 0x638   :  { %2658 = vrcp.f32 %v3290_v39  ;;  %v1378_v55 = vmul.f32 %v1377_v19, %v3245_v31  ;;  %v1612_v4 = vmul.f32 %v1611_v57, %v3286_v36  ;;  %v1414_v12 = vmul.f32 %v1413_v53, %v3257_v46  ;;  %v2584_v53 = vld [vmem:[#allocation15 + $0xb8] sm:$0xff]  ;;  %1999 = vmatpush.bf16.msrb.mxu1 %v2592_v54 }
 0x639   :  { %v3319_v14 = vmin.f32 %v1637_v58, 16.0  ;;  %v3322_v23 = vmul.f32 0.70710677, %v3303_v49  ;;  %v3325_v24 = vmul.f32 0.5, %v3203_v5  ;;  %v1365_v25 = vmul.f32 %v1364_v17, %v3245_v31  ;;  %1985 = vmatpush.bf16.msra.mxu0 %v2584_v53 }
 0x63a   :  { %v3316_v11 = vadd.f32 1.0, %v1378_v55  ;;  %v1448_v20 = vadd.f32 1.1283791, %v1447_v7  ;;  %v3331_v27 = vmul.f32 0.5, %v3207_v6  ;;  %v3334_v28 = vmul.f32 0.5, %v3261_v52 }
 0x63b   :  { %v1602_v30 = vadd.f32 0.0036580483, %v1601_v62  ;;  %v1469_v32 = vand.u32 2147483647, %v3273_v13  ;;  %v1488_v33 = vadd.f32 1.1283791, %v1487_v3  ;;  %v3338_v35 = vmul.f32 %v1404_v1, %v3257_v46 }
 0x63c   :  { %v1613_v5 = vadd.f32 0.014752088, %v1612_v4  ;;  %2660 = vrcp.f32 %v3316_v11  ;;  %v1415_v37 = vadd.f32 0.112945676, %v1414_v12  ;;  %v1639_v38 = vmul.f32 2.1237322e-06, %v3319_v14 }
 0x63d   :  { %v3299_v47 = vpop.eup %2656  ;;  %v1517_v6 = vmul.f32 %v3322_v23, %v3322_v23  ;;  %v1366_v41 = vadd.f32 0.18741608, %v1365_v25  ;;  %v3349_v43 = vmul.f32 %v1448_v20, %v3211_v8  ;;  %v1603_v19 = vmul.f32 %v1602_v30, %v3286_v36  ;;  %v2583_v30 = vld [vmem:[#allocation15 + $0xb0] sm:$0xff] }
 0x63e   :  { %v1461_v59 = vmul.f32 %v3299_v47, %v3273_v13  ;;  %v3328_v26 = vpop.eup %2658  ;;  %v1614_v42 = vmul.f32 %v1613_v5, %v3286_v36  ;;  %v1650_v44 = vmul.f32 3.8918573e-05, %v3319_v14  ;;  %vm1465_vm14 = vweird.f32 %v3273_v13  ;;  %1986 = vmatpush.bf16.msra.mxu0 %v2583_v30  ;;  %v2567_v30 = vld [vmem:[#allocation15 + $0x30] sm:$0xff] }
 0x63f   :  { %v1501_v52 = vmul.f32 %v3328_v26, %v3290_v39  ;;  %v3353_v45 = vmin.f32 %v1517_v6, 16.0  ;;  %v1471_v48 = vand.u32 2147483648, %v3273_v13  ;;  %v3358_v50 = vmul.f32 %v1488_v33, %v3214_v9  ;;  %v2591_v13 = vld [vmem:[#allocation15 + $0xf0] sm:$0xff] }
 0x640   :  { %v1462_v18 = vsub.f32 1.0, %v1461_v59  ;;  %v1640_v51 = vadd.f32 0.00028619796, %v1639_v38  ;;  %vm3360_vm15 = vcmp.eq.f32.partialorder %v1469_v32, 8.507059e+37  ;;  %v1509_v8 = vand.u32 2147483647, %v3290_v39  ;;  %2000 = vmatpush.bf16.msrb.mxu1 %v2591_v13 }
 0x641   :  { %v1416_v57 = vmul.f32 %v1415_v37, %v3257_v46  ;;  %v1615_v58 = vadd.f32 0.112945676, %v1614_v42  ;;  %vm1466_vm0 = vweird.f32 %v3299_v47  ;;  %v1502_v17 = vsub.f32 1.0, %v1501_v52  ;;  %v2576_v42 = vld [vmem:[#allocation15 + $0x78] sm:$0xff]  ;;  %v2575_v32 = vld [vmem:[#allocation15 + $0x70] sm:$0xff] }
 0x642   :  { %v1463_v40 = vmul.f32 %v3299_v47, %v1462_v18  ;;  %v1511_v9 = vand.u32 2147483648, %v3290_v39  ;;  %v3369_v7 = vpop.eup %2660  ;;  %v1604_v62 = vadd.f32 0.05243302, %v1603_v19  ;;  %v1651_v1 = vadd.f32 0.001143296, %v1650_v44  ;;  %vm3381_vm2 = vmor %vm1465_vm14, %vm1466_vm0  ;;  %1971 = vmatpush.bf16.msrb.mxu3 %v2576_v42 }
 0x643   :  { %v1616_v3 = vmul.f32 %v1615_v58, %v3286_v36  ;;  %v1519_v4 = vmul.f32 2.1237322e-06, %v3353_v45  ;;  %v1472_v12 = vor.u32 1.1754944e-38, %v1471_v48  ;;  %vm1505_vm1 = vweird.f32 %v3290_v39  ;;  %v2582_v58 = vld [vmem:[#allocation15 + $0xa8] sm:$0xff] }
 0x644   :  { %v1464_v59 = vadd.f32 %v3299_v47, %v1463_v40  ;;  %v1367_v18 = vmul.f32 %v1366_v41, %v3245_v31  ;;  %v1641_v25 = vmul.f32 %v1640_v51, %v3319_v14  ;;  %v1530_v20 = vmul.f32 3.8918573e-05, %v3353_v45  ;;  %v2568_v41 = vld [vmem:[#allocation15 + $0x38] sm:$0xff]  ;;  %1987 = vmatpush.bf16.msra.mxu0 %v2582_v58 }
 0x645   :  { %v1417_v33 = vadd.f32 0.4994258, %v1416_v57  ;;  %v1617_v5 = vadd.f32 0.4994258, %v1616_v3  ;;  %v1652_v37 = vmul.f32 %v1651_v1, %v3319_v14  ;;  %v1520_v38 = vadd.f32 0.00028619796, %v1519_v4  ;;  %v1310_v57 = vpop.f32.mrf.mxu3  ;;  %1957 = vmatpush.bf16.msra.mxu2 %v2568_v41 }
 0x646   :  { %v1468_v31 = vsel %vm3381_vm2, %v3299_v47, %v1464_v59  ;;  %v1503_v6 = vmul.f32 %v3328_v26, %v1502_v17  ;;  %v1381_v40 = vmul.f32 %v3369_v7, %v3316_v11  ;;  %v1531_v52 = vadd.f32 0.001143296, %v1530_v20  ;;  %v2590_v59 = vld [vmem:[#allocation15 + $0xe8] sm:$0xff]  ;;  %1972 = vmatpush.bf16.msrb.mxu3 %v2575_v32  ;;  %v2588_v58 = vld [vmem:[#allocation15 + $0xd8] sm:$0xff] }
 0x647   :  { %v1605_v19 = vmul.f32 %v1604_v62, %v3286_v36  ;;  %v1618_v44 = vmul.f32 %v1617_v5, %v3286_v36  ;;  %v1653_v48 = vadd.f32 0.014752088, %v1652_v37  ;;  %v1521_v51 = vmul.f32 %v1520_v38, %v3353_v45  ;;  %2001 = vmatpush.bf16.msrb.mxu1 %v2590_v59 }
 0x648   :  { %vm1506_vm3 = vweird.f32 %v3328_v26  ;;  %vm3396_vm4 = vcmp.eq.f32.partialorder %v1509_v8, 8.507059e+37  ;;  %v1642_v53 = vadd.f32 0.0036580483, %v1641_v25  ;;  %v1532_v54 = vmul.f32 %v1531_v52, %v3353_v45 }
 0x649   :  { %v1391_v17 = vand.u32 2147483648, %v3316_v11  ;;  %v1418_v62 = vmul.f32 %v1417_v33, %v3257_v46  ;;  %v3403_v3 = vadd.f32 1.0, %v1618_v44  ;;  %v1654_v1 = vmul.f32 %v1653_v48, %v3319_v14  ;;  %1958 = vmatpush.bf16.msra.mxu2 %v2567_v30  ;;  %vm3421_vm5 = vmor %vm1505_vm1, %vm1506_vm3  ;;  %v2574_v44 = vld [vmem:[#allocation15 + $0x68] sm:$0xff]  ;;  %v2573_v30 = vld [vmem:[#allocation15 + $0x60] sm:$0xff] }
 0x64a   :  { %v1473_v8 = vsel %vm3360_vm15, %v1472_v12, %v1468_v31  ;;  %v1504_v4 = vadd.f32 %v3328_v26, %v1503_v6  ;;  %v1522_v25 = vadd.f32 0.0036580483, %v1521_v51  ;;  %v1533_v20 = vadd.f32 0.014752088, %v1532_v54  ;;  %v2581_v31 = vld [vmem:[#allocation15 + $0xa0] sm:$0xff]  ;;  %1973 = vmatpush.bf16.msrb.mxu3 %v2574_v44 }
 0x64b   :  { %v1382_v5 = vsub.f32 1.0, %v1381_v40  ;;  %v1606_v37 = vadd.f32 0.18741608, %v1605_v19  ;;  %2662 = vrcp.f32 %v3403_v3  ;;  %v3412_v33 = vadd.f32 %v1310_v57, %v1118_v10  ;;  %v2589_v40 = vld [vmem:[#allocation15 + $0xe0] sm:$0xff]  ;;  %1988 = vmatpush.bf16.msra.mxu0 %v2581_v31  ;;  %v2566_v19 = vld [vmem:[#allocation15 + $0x28] sm:$0xff]  ;;  %v2580_v57 = vld [vmem:[#allocation15 + $0x98] sm:$0xff] }
 0x64c   :  { %v1512_v38 = vor.u32 1.1754944e-38, %v1511_v9  ;;  %v3414_v52 = vadd.f32 1.1283791, %v1367_v18  ;;  %v1643_v55 = vmul.f32 %v1642_v53, %v3319_v14  ;;  %v1655_v12 = vadd.f32 0.112945676, %v1654_v1  ;;  %2002 = vmatpush.bf16.msrb.mxu1 %v2589_v40 }
 0x64d   :  { %v1389_v61 = vand.u32 2147483647, %v3316_v11  ;;  %v3426_v10 = vor.u32 1.1754944e-38, %v1391_v17  ;;  %v3428_v9 = vadd.f32 1.0, %v1418_v62  ;;  %v1534_v18 = vmul.f32 %v1533_v20, %v3353_v45  ;;  %1959 = vmatpush.bf16.msra.mxu2 %v2566_v19  ;;  %v2565_v20 = vld [vmem:[#allocation15 + $0x20] sm:$0xff] }
 0x64e   :  { %v3432_v13 = vmul.f32 %v1473_v8, %v3349_v43  ;;  %v1508_v39 = vsel %vm3421_vm5, %v3328_v26, %v1504_v4  ;;  %v1656_v41 = vmul.f32 %v1655_v12, %v3319_v14  ;;  %v1523_v42 = vmul.f32 %v1522_v25, %v3353_v45  ;;  %1974 = vmatpush.bf16.msrb.mxu3 %v2573_v30  ;;  %v2563_v30 = vld [vmem:[#allocation15 + $0x10] sm:$0xff]  ;;  %v2585_v8 = vld [vmem:[#allocation15 + $0xc0] sm:$0xff] }
 0x64f   :  { %v1383_v48 = vmul.f32 %v3369_v7, %v1382_v5  ;;  %v1607_v51 = vmul.f32 %v1606_v37, %v3286_v36  ;;  %v1535_v53 = vadd.f32 0.112945676, %v1534_v18  ;;  %v3442_v54 = vmul.f32 0.70710677, %v3412_v33  ;;  %1989 = vmatpush.bf16.msra.mxu0 %v2580_v57  ;;  %v2587_v18 = vld [vmem:[#allocation15 + $0xd0] sm:$0xff] }
 0x650   :  { %vm1385_vm6 = vweird.f32 %v3316_v11  ;;  %vm1386_vm7 = vweird.f32 %v3369_v7  ;;  %v1644_v26 = vadd.f32 0.05243302, %v1643_v55  ;;  %v1657_v43 = vadd.f32 0.4994258, %v1656_v41  ;;  %2003 = vmatpush.bf16.msrb.mxu1 %v2588_v58 }
 0x651   :  { %v3446_v59 = vpop.eup %2662  ;;  %v1513_v17 = vsel %vm3396_vm4, %v1512_v38, %v1508_v39  ;;  %2664 = vrcp.f32 %v3428_v9  ;;  %v1536_v36 = vmul.f32 %v1535_v53, %v3353_v45  ;;  %v1557_v62 = vmul.f32 %v3442_v54, %v3442_v54  ;;  %1960 = vmatpush.bf16.msra.mxu2 %v2565_v20  ;;  %vm3477_vm9 = vmor %vm1385_vm6, %vm1386_vm7 }
 0x652   :  { %v2362_v1 = vclamps-f32 %v3432_v13, 1.0  ;;  %vm3455_vm8 = vcmp.eq.f32.partialorder %v1389_v61, 8.507059e+37  ;;  %v1621_v4 = vmul.f32 %v3446_v59, %v3403_v3  ;;  %v1658_v47 = vmul.f32 %v1657_v43, %v3319_v14  ;;  %v2579_v61 = vld [vmem:[#allocation15 + $0x90] sm:$0xff] }
 0x653   :  { %v1524_v25 = vadd.f32 0.05243302, %v1523_v42  ;;  %v1384_v32 = vadd.f32 %v3369_v7, %v1383_v48  ;;  %v1608_v5 = vadd.f32 1.1283791, %v1607_v51  ;;  %v1537_v37 = vadd.f32 0.4994258, %v1536_v36  ;;  %1990 = vmatpush.bf16.msra.mxu0 %v2579_v61 }
 0x654   :  { %v3463_v38 = vmin.f32 %v1557_v62, 16.0  ;;  %v1622_v55 = vsub.f32 1.0, %v1621_v4  ;;  %v1629_v12 = vand.u32 2147483647, %v3403_v3  ;;  %v1645_v31 = vmul.f32 %v1644_v26, %v3319_v14  ;;  %v2564_v48 = vld [vmem:[#allocation15 + $0x18] sm:$0xff]  ;;  %2004 = vmatpush.bf16.msrb.mxu1 %v2587_v18  ;;  %v2578_v4 = vld [vmem:[#allocation15 + $0x88] sm:$0xff] }
 0x655   :  { %v3467_v6 = vadd.f32 1.0, %v1658_v47  ;;  %v1631_v40 = vand.u32 2147483648, %v3403_v3  ;;  %v1538_v13 = vmul.f32 %v1537_v37, %v3353_v45  ;;  %vm1626_vm10 = vweird.f32 %v3446_v59  ;;  %v2572_v51 = vld [vmem:[#allocation15 + $0x58] sm:$0xff]  ;;  %1961 = vmatpush.bf16.msra.mxu2 %v2564_v48  ;;  %v2586_v47 = vld [vmem:[#allocation15 + $0xc8] sm:$0xff] }
 0x656   :  { %v1559_v39 = vmul.f32 2.1237322e-06, %v3463_v38  ;;  %v1570_v41 = vmul.f32 3.8918573e-05, %v3463_v38  ;;  %v1623_v19 = vmul.f32 %v3446_v59, %v1622_v55  ;;  %v1525_v44 = vmul.f32 %v1524_v25, %v3353_v45  ;;  %1975 = vmatpush.bf16.msrb.mxu3 %v2572_v51  ;;  %v2570_v42 = vld [vmem:[#allocation15 + $0x48] sm:$0xff] }
 0x657   :  { %2666 = vrcp.f32 %v3467_v6  ;;  %v3485_v53 = vpop.eup %2664  ;;  %v3488_v26 = vmul.f32 %v1513_v17, %v3358_v50  ;;  %v1388_v11 = vsel %vm3477_vm9, %v3369_v7, %v1384_v32  ;;  %v3493_v43 = vadd.f32 1.0, %v1538_v13  ;;  %1991 = vmatpush.bf16.msra.mxu0 %v2578_v4  ;;  %v2571_v32 = vld [vmem:[#allocation15 + $0x50] sm:$0xff] }
 0x658   :  { %v1560_v57 = vadd.f32 0.00028619796, %v1559_v39  ;;  %v1624_v58 = vadd.f32 %v3446_v59, %v1623_v19  ;;  %vm1625_vm11 = vweird.f32 %v3403_v3  ;;  %v1646_v36 = vadd.f32 0.18741608, %v1645_v31  ;;  %2005 = vmatpush.bf16.msrb.mxu1 %v2586_v47 }
 0x659   :  { %v1571_v62 = vadd.f32 0.001143296, %v1570_v41  ;;  %v1679_v25 = vadd.f32 1.0, %v2362_v1  ;;  %v1609_v50 = vmul.f32 %v1608_v5, %v3268_v0  ;;  %vm1627_vm12 = vmor %vm1625_vm11, %vm1626_vm10  ;;  %v1632_v7 = vor.u32 1.1754944e-38, %v1631_v40  ;;  %1962 = vmatpush.bf16.msra.mxu2 %v2563_v30 }
 0x65a   :  { %2668 = vrcp.f32 %v3493_v43  ;;  %v1628_v17 = vsel %vm1627_vm12, %v3446_v59, %v1624_v58  ;;  %vm1630_vm13 = vcmp.eq.f32.partialorder %v1629_v12, 8.507059e+37  ;;  %v1526_v3 = vadd.f32 0.18741608, %v1525_v44  ;;  %1976 = vmatpush.bf16.msrb.mxu3 %v2571_v32 }
 0x65b   :  { %v1561_v20 = vmul.f32 %v1560_v57, %v3463_v38  ;;  %v1393_v0 = vsel %vm3455_vm8, %v3426_v10, %v1388_v11  ;;  %v3508_v1 = vmul.f32 %v3485_v53, %v3428_v9  ;;  %v1633_v5 = vsel %vm1630_vm13, %v1632_v7, %v1628_v17  ;;  %v2577_v10 = vld [vmem:[#allocation15 + $0x80] sm:$0xff] }
 0x65c   :  { %v1572_v37 = vmul.f32 %v1571_v62, %v3463_v38  ;;  %v1369_v59 = vmul.f32 %v3414_v52, %v3234_v22  ;;  %v3514_v12 = vadd.f32 0.18741608, %v3338_v35  ;;  %v1634_v31 = vmul.f32 %v1633_v5, %v1609_v50  ;;  %1992 = vmatpush.bf16.msra.mxu0 %v2577_v10  ;;  %2006 = vmatpush.bf16.msrb.mxu1 %v2585_v8  ;;  %v2561_v50 = vld [vmem:[#allocation15] sm:$0xff] }
 0x65d   :  { %v2667_v55 = vpop.eup %2666  ;;  %v1647_v61 = vmul.f32 %v1646_v36, %v3319_v14  ;;  %v1687_v18 = vmul.f32 %v1679_v25, %v3325_v24  ;;  %v2363_v40 = vclamps-f32 %v3488_v26, 1.0  ;;  %v1527_v35 = vmul.f32 %v1526_v3, %v3353_v45  ;;  %v2562_v14 = vld [vmem:[#allocation15 + $0x8] sm:$0xff]  ;;  %v2569_v7 = vld [vmem:[#allocation15 + $0x40] sm:$0xff] }
 0x65e   :  { %v1661_v13 = vmul.f32 %v2667_v55, %v3467_v6  ;;  %v1573_v39 = vadd.f32 0.014752088, %v1572_v37  ;;  %v3520_v41 = vmul.f32 %v1393_v0, %v1369_v59  ;;  %v2366_v22 = vclamps-f32 %v1634_v31, 1.0  ;;  %1963 = vmatpush.bf16.msra.mxu2 %v2562_v14  ;;  %1977 = vmatpush.bf16.msrb.mxu3 %v2570_v42 }
 0x65f   :  { %v1562_v52 = vadd.f32 0.0036580483, %v1561_v20  ;;  %v1422_v44 = vsub.f32 1.0, %v3508_v1  ;;  %v1671_v24 = vand.u32 2147483648, %v3467_v6  ;;  %v1648_v11 = vadd.f32 1.1283791, %v1647_v61 }
 0x660   :  { %v2669_v19 = vpop.eup %2668  ;;  %v1662_v48 = vsub.f32 1.0, %v1661_v13  ;;  %v1574_v51 = vmul.f32 %v1573_v39, %v3463_v38  ;;  %v1683_v26 = vadd.f32 1.0, %v2366_v22  ;;  %vm1665_vm14 = vweird.f32 %v3467_v6 }
 0x661   :  { %v1541_v57 = vmul.f32 %v2669_v19, %v3493_v43  ;;  %vm1666_vm15 = vweird.f32 %v2667_v55  ;;  %v1669_v58 = vand.u32 2147483647, %v3467_v6  ;;  %v1528_v4 = vadd.f32 1.1283791, %v1527_v35 }
 0x662   :  { %v1663_v45 = vmul.f32 %v2667_v55, %v1662_v48  ;;  %v1575_v36 = vadd.f32 0.112945676, %v1574_v51  ;;  %v1691_v62 = vmul.f32 %v1683_v26, %v3334_v28  ;;  %v1563_v25 = vmul.f32 %v1562_v52, %v3463_v38  ;;  %vm1667_vm0 = vmor %vm1665_vm14, %vm1666_vm15  ;;  %1964 = vmatpush.bf16.msra.mxu2 %v2561_v50  ;;  %1978 = vmatpush.bf16.msrb.mxu3 %v2569_v7 }
 0x663   :  { %v1542_v47 = vsub.f32 1.0, %v1541_v57  ;;  %v1672_v3 = vor.u32 1.1754944e-38, %v1671_v24  ;;  %v1551_v20 = vand.u32 2147483648, %v3493_v43  ;;  %vm1546_vm1 = vweird.f32 %v2669_v19 }
 0x664   :  { %v1664_v17 = vadd.f32 %v2667_v55, %v1663_v45  ;;  %v1576_v30 = vmul.f32 %v1575_v36, %v3463_v38  ;;  %v1695_v32 = vpack.c.bf16 %v1691_v62, %v1687_v18  ;;  %v1549_v28 = vand.u32 2147483647, %v3493_v43 }
 0x665   :  { %v1543_v0 = vmul.f32 %v2669_v19, %v1542_v47  ;;  %v1649_v1 = vmul.f32 %v1648_v11, %v3296_v2  ;;  %vm1670_vm2 = vcmp.eq.f32.partialorder %v1669_v58, 8.507059e+37  ;;  %vm1545_vm3 = vweird.f32 %v3493_v43 }
 0x666   :  { %v1668_v5 = vsel %vm1667_vm0, %v2667_v55, %v1664_v17  ;;  %v1577_v37 = vadd.f32 0.4994258, %v1576_v30  ;;  %v1564_v61 = vadd.f32 0.05243302, %v1563_v25  ;;  %1993 = vmatmul.bf16.vlgmr.msra.gmra.mxu0 %v1695_v32  ;;  %v1423_v6 = vmul.f32 %v3485_v53, %v1422_v44  ;;  %vm1547_vm4 = vmor %vm1545_vm3, %vm1546_vm1 }
 0x667   :  { %v1673_v59 = vsel %vm1670_vm2, %v1672_v3, %v1668_v5  ;;  %v1544_v31 = vadd.f32 %v2669_v19, %v1543_v0  ;;  %v1552_v8 = vor.u32 1.1754944e-38, %v1551_v20  ;;  %v2360_v2 = vclamps-f32 %v3520_v41, 1.0 }
 0x668   :  { %v1674_v10 = vmul.f32 %v1673_v59, %v1649_v1  ;;  %v1578_v18 = vmul.f32 %v1577_v37, %v3463_v38  ;;  %v1529_v55 = vmul.f32 %v1528_v4, %v3322_v23  ;;  %vm1550_vm5 = vcmp.eq.f32.partialorder %v1549_v28, 8.507059e+37 }
 0x669   :  { %v1548_v13 = vsel %vm1547_vm4, %v2669_v19, %v1544_v31  ;;  %v1680_v39 = vadd.f32 1.0, %v2363_v40  ;;  %v1407_v52 = vmul.f32 %v3514_v12, %v3257_v46  ;;  %v1348_v14 = vmul.f32 0.5, %v3284_v34 }
 0x66a   :  { %v2367_v22 = vclamps-f32 %v1674_v10, 1.0  ;;  %v1553_v35 = vsel %vm1550_vm5, %v1552_v8, %v1548_v13  ;;  %v1579_v43 = vadd.f32 1.0, %v1578_v18  ;;  %v1565_v44 = vmul.f32 %v1564_v61, %v3463_v38 }
 0x66b   :  { %v1554_v42 = vmul.f32 %v1553_v35, %v1529_v55  ;;  %v1424_v48 = vadd.f32 %v3485_v53, %v1423_v6  ;;  %vm1426_vm6 = vweird.f32 %v3485_v53  ;;  %v1677_v23 = vadd.f32 1.0, %v2360_v2 }
 0x66c   :  { %v1684_v41 = vadd.f32 1.0, %v2367_v22  ;;  %2670 = vrcp.f32 %v1579_v43  ;;  %v1431_v40 = vand.u32 2147483648, %v3428_v9  ;;  %v1688_v24 = vmul.f32 %v1680_v39, %v3331_v27 }
 0x66d   :  { %v2364_v19 = vclamps-f32 %v1554_v42, 1.0  ;;  %vm1425_vm7 = vweird.f32 %v3428_v9  ;;  %v1429_v46 = vand.u32 2147483647, %v3428_v9  ;;  %v1341_v12 = vmul.f32 0.5, %v3223_v15 }
 0x66e   :  { %v1692_v34 = vmul.f32 %v1684_v41, %v1348_v14  ;;  %vm1427_vm8 = vmor %vm1425_vm7, %vm1426_vm6  ;;  %v1345_v51 = vmul.f32 0.5, %v3303_v49  ;;  %v1566_v11 = vadd.f32 0.18741608, %v1565_v44  ;;  %v1408_v57 = vadd.f32 1.1283791, %v1407_v52 }
 0x66f   :  { %v1681_v26 = vadd.f32 1.0, %v2364_v19  ;;  %v1428_v45 = vsel %vm1427_vm8, %v3485_v53, %v1424_v48  ;;  %v1685_v36 = vmul.f32 %v1677_v23, %v1341_v12  ;;  %v1432_v62 = vor.u32 1.1754944e-38, %v1431_v40 }
 0x670   :  { %v1696_v58 = vpack.c.bf16 %v1692_v34, %v1688_v24  ;;  %vm1430_vm9 = vcmp.eq.f32.partialorder %v1429_v46, 8.507059e+37  ;;  %v1567_v25 = vmul.f32 %v1566_v11, %v3463_v38  ;;  %v1409_v50 = vmul.f32 %v1408_v57, %v3243_v29 }
 0x671   :  { %v1689_v4 = vmul.f32 %v1681_v26, %v1345_v51  ;;  %v1433_v47 = vsel %vm1430_vm9, %v1432_v62, %v1428_v45  ;;  %v1591_v17 = vand.u32 2147483648, %v1579_v43  ;;  %v1589_v20 = vand.u32 2147483647, %v1579_v43 }
 0x672   :  { %v2671_v27 = vpop.eup %2670  ;;  %2007 = vmatmul.bf16.vlgmr.msrb.gmra.mxu1 %v1696_v58  ;;  %v1434_v7 = vmul.f32 %v1433_v47, %v1409_v50  ;;  %v1568_v3 = vadd.f32 1.1283791, %v1567_v25  ;;  %vm1585_vm11 = vweird.f32 %v1579_v43  ;;  %v1342_v59 = vmul.f32 0.5, %v3231_v21 }
 0x673   :  { %v1693_v9 = vpack.c.bf16 %v1689_v4, %v1685_v36  ;;  %v1581_v15 = vmul.f32 %v2671_v27, %v1579_v43  ;;  %vm1586_vm10 = vweird.f32 %v2671_v27  ;;  %v1592_v32 = vor.u32 1.1754944e-38, %v1591_v17 }
 0x674   :  { %vm1587_vm12 = vmor %vm1585_vm11, %vm1586_vm10  ;;  %v2361_v0 = vclamps-f32 %v1434_v7, 1.0  ;;  %v1569_v28 = vmul.f32 %v1568_v3, %v3442_v54  ;;  %vm1590_vm13 = vcmp.eq.f32.partialorder %v1589_v20, 8.507059e+37  ;;  %v1346_v31 = vmul.f32 0.5, %v3412_v33  ;;  %v2617_v54 = vld [vmem:[%s3596_s12] ss:$0 sm:$0xff] }
 0x675   :  { %v1582_v49 = vsub.f32 1.0, %v1581_v15  ;;  %1965 = vmatmul.bf16.vlgmr.msra.gmra.mxu2 %v1693_v9 }
 0x676   :  { %v1678_v29 = vadd.f32 1.0, %v2361_v0 }
 0x677   :  { %v1583_v53 = vmul.f32 %v2671_v27, %v1582_v49 }
 0x678   :  { %v1686_v6 = vmul.f32 %v1678_v29, %v1342_v59 }
 0x679   :  { %v1584_v30 = vadd.f32 %v2671_v27, %v1583_v53 }
 0x67b   :  { %v1588_v1 = vsel %vm1587_vm12, %v2671_v27, %v1584_v30 }
 0x67c   :  { %v1593_v38 = vsel %vm1590_vm13, %v1592_v32, %v1588_v1 }
 0x67d   :  { %v1594_v5 = vmul.f32 %v1593_v38, %v1569_v28  ;;  %v2677_v38 = vld [vmem:[%s3598_s14] ss:$0 sm:$0xff] }
 0x67f   :  { %v2365_v37 = vclamps-f32 %v1594_v5, 1.0 }
 0x681   :  { %v1682_v61 = vadd.f32 1.0, %v2365_v37 }
 0x683   :  { %v1690_v10 = vmul.f32 %v1682_v61, %v1346_v31 }
 0x685   :  { %v1694_v8 = vpack.c.bf16 %v1690_v10, %v1686_v6 }
 0x687   :  { %1979 = vmatmul.bf16.vlgmr.msrb.gmra.mxu3 %v1694_v8 }
 0x6e3   :  { %v1994_v55 = vpop.f32.mrf.mxu0 }
 0x6eb   :  { %v1996_v44 = vpop.f32.mrf.mxu0 }
 0x6ef   :  { %v2008_v22 = vpop.f32.mrf.mxu1 }
 0x6f7   :  { %v2010_v41 = vpop.f32.mrf.mxu1 }
 0x6f8   :  { %v1966_v18 = vpop.f32.mrf.mxu2 }
 0x6f9   :  { %v1967_v2 = vadd.f32 %v2617_v54, %v1966_v18 }
 0x700   :  { %v1968_v35 = vpop.f32.mrf.mxu2 }
 0x701   :  { %v1969_v21 = vadd.f32 %v2617_v54, %v1968_v35 }
 0x70a   :  { %v1980_v13 = vpop.f32.mrf.mxu3 }
 0x70b   :  { %v1981_v39 = vadd.f32 %v1980_v13, %v1967_v2 }
 0x70d   :  { %v1995_v43 = vadd.f32 %v1994_v55, %v1981_v39 }
 0x70f   :  { %v2009_v52 = vadd.f32 %v2008_v22, %v1995_v43 }
 0x711   :  { %v2013_v33 = vadd.f32 %v2009_v52, %v3189_v63 }
 0x712   :  { %v1982_v14 = vpop.f32.mrf.mxu3 }
 0x713   :  { %v1983_v42 = vadd.f32 %v1982_v14, %v1969_v21  ;;  %2015 = vadd.xlane.f32.xlu1 %v2013_v33 }
 0x715   :  { %v1997_v48 = vadd.f32 %v1996_v44, %v1983_v42 }
 0x717   :  { %v2011_v23 = vadd.f32 %v2010_v41, %v1997_v48 }
 0x719   :  { %v2014_v40 = vadd.f32 %v2011_v23, %v3192_v16 }
 0x71b   :  { %2017 = vadd.xlane.f32.xlu0 %v2014_v40 }
 0x786   :  { %v2016_v19 = vpop.xlane.xlu1 %2015 }
 0x787   :  { %v2019_v24 = vmul.f32 %v2016_v19, %v3164_v56 }
 0x789   :  { %v2021_v46 = vsub.f32 %v2013_v33, %v2019_v24 }
 0x78b   :  { %v2023_v34 = vmul.f32 %v2021_v46, %v2021_v46 }
 0x78d   :  { %2025 = vadd.xlane.f32.xlu2 %v2023_v34 }
 0x78e   :  { %v2018_v12 = vpop.xlane.xlu0 %2017 }
 0x78f   :  { %v2020_v51 = vmul.f32 %v2018_v12, %v3164_v56 }
 0x791   :  { %v2022_v63 = vsub.f32 %v2014_v40, %v2020_v51 }
 0x793   :  { %v2024_v26 = vmul.f32 %v2022_v63, %v2022_v63 }
 0x795   :  { %2027 = vadd.xlane.f32.xlu1 %v2024_v26 }
 0x800   :  { %v2026_v11 = vpop.xlane.xlu2 %2025 }
 0x801   :  { %v2029_v57 = vmul.f32 %v2026_v11, %v3164_v56 }
 0x803   :  { %v2031_v45 = vadd.f32 1e-05, %v2029_v57 }
 0x805   :  { %2672 = vrsqrt.f32 %v2031_v45  ;;  %vm2039_vm15 = vweird.f32 %v2031_v45 }
 0x808   :  { %v2028_v58 = vpop.xlane.xlu1 %2027 }
 0x809   :  { %v2030_v16 = vmul.f32 %v2028_v58, %v3164_v56  ;;  %v2676_v56 = vld [vmem:[%s3597_s13] ss:$0 sm:$0xff] }
 0x80b   :  { %v2673_v36 = vpop.eup %2672  ;;  %v2032_v62 = vadd.f32 1e-05, %v2030_v16 }
 0x80c   :  { %v2034_v4 = vmul.f32 %v2673_v36, %v2031_v45  ;;  %vm2040_vm14 = vweird.f32 %v2673_v36 }
 0x80d   :  { %2674 = vrsqrt.f32 %v2032_v62  ;;  %vm2041_vm0 = vmor %vm2039_vm15, %vm2040_vm14  ;;  %vm2049_vm2 = vweird.f32 %v2032_v62 }
 0x80e   :  { %v2035_v27 = vmul.f32 %v2673_v36, %v2034_v4 }
 0x810   :  { %v2036_v47 = vmul.f32 0.5, %v2035_v27 }
 0x812   :  { %v2037_v9 = vsub.f32 1.5, %v2036_v47 }
 0x813   :  { %v2675_v25 = vpop.eup %2674 }
 0x814   :  { %v2038_v15 = vmul.f32 %v2673_v36, %v2037_v9  ;;  %v2044_v50 = vmul.f32 %v2675_v25, %v2032_v62  ;;  %vm2050_vm1 = vweird.f32 %v2675_v25 }
 0x815   :  { %vm2051_vm3 = vmor %vm2049_vm2, %vm2050_vm1 }
 0x816   :  { %v2042_v49 = vsel %vm2041_vm0, %v2673_v36, %v2038_v15  ;;  %v2045_v7 = vmul.f32 %v2675_v25, %v2044_v50 }
 0x817   :  { %v2053_v17 = vmul.f32 %v2042_v49, %v2021_v46 }
 0x818   :  { %v2046_v3 = vmul.f32 0.5, %v2045_v7 }
 0x819   :  { %v2055_v53 = vmul.f32 %v2676_v56, %v2053_v17 }
 0x81a   :  { %v2047_v20 = vsub.f32 1.5, %v2046_v3 }
 0x81b   :  { %v2057_v30 = vadd.f32 %v3186_v60, %v2055_v53 }
 0x81c   :  { %v2048_v32 = vmul.f32 %v2675_v25, %v2047_v20 }
 0x81d   :  { %2059 = vst [vmem:[#allocation17] sm:$0xff] %v2057_v30 }
 0x81e   :  { %v2052_v0 = vsel %vm2051_vm3, %v2675_v25, %v2048_v32 }
 0x81f   :  { %v2054_v28 = vmul.f32 %v2052_v0, %v2022_v63 }
 0x821   :  { %v2056_v1 = vmul.f32 %v2676_v56, %v2054_v28 }
 0x823   :  { %v2058_v5 = vadd.f32 %v2677_v38, %v2056_v1 }
 0x825   :  { %2060 = vst [vmem:[#allocation17 + $0x8] sm:$0xff] %v2058_v5 }
 0x826   :  { %2073 = dma.vmem_to_hbm [thread:$0]  %s2066_s4, 256, %s2068_s25, [#allocation5], %s2912_s23, %s2912_s23, %s2913_s8  }
 0x827   :  { %2904 = dma.done.wait [#allocation5], 256  }
 0x828   :  { %2905 = vsyncadd [#allocation5], 4294967040 }
 0x829   :  { %2078 = vsyncpa [#allocation4], 1 }
 0x82a   :  { %2079 = vsyncpa [#allocation7], 1 }
 0x82b   :  { %2080 = vsyncpa [#allocation10], 1 }
 0x82c   :  { %2081 = vsyncpa [#allocation13], 1 }
 0x82d   :  { %2082 = vsyncpa [#allocation16], 1 }
 0x82e   :  { %2083 = vsyncpa [#allocation5], 1 }

</bundles_post_ra>
